<compile_context>
chip_gen: v6e
topology: v6e:2x2x1
jax: 0.10.0
libtpu: 0.0.40
codegen_flags: <defaults>
</compile_context>

<pallas_src>
import functools

import jax
import jax.numpy as jnp
from jax.experimental import pallas as pl
from jax.experimental.pallas import tpu as pltpu


def _round_up(n, m):
    return ((n + m - 1) // m) * m


def _cdiv(a, b):
    return -(-a // b)


# Flipped to False at runtime if this JAX build doesn't support single-buffered
# (pl.Buffered(1)) operands in pallas_call.
_single_buffer_weights = True


def _mlp_kernel(x_ref, w1_ref, b1_ref, w2_ref, b2_ref,
                w3_ref, b3_ref, w4_ref, b4_ref, o_ref):
    # Layer 1: Linear (eval-BN folded) + ReLU. bf16 MXU inputs, f32 accumulation/epilogue.
    # x arrives as f32 straight from HBM; the bf16 cast rides the VPU under the MXU.
    xb = x_ref[...].astype(jnp.bfloat16)
    h = jnp.dot(xb, w1_ref[...], preferred_element_type=jnp.float32)
    h = jnp.maximum(h + b1_ref[...], 0.0)
    # Layer 2
    h = jnp.dot(h.astype(jnp.bfloat16), w2_ref[...], preferred_element_type=jnp.float32)
    h = jnp.maximum(h + b2_ref[...], 0.0)
    # Layer 3 (output zero-padded 64 -> 128 so layers 3/4 stay lane-dense; padded lanes
    # are exactly 0 after ReLU and padded w4 lanes are 0 -> numerically exact).
    h = jnp.dot(h.astype(jnp.bfloat16), w3_ref[...], preferred_element_type=jnp.float32)
    h = jnp.maximum(h + b3_ref[...], 0.0)                                   # (TB, 128) f32
    # Layer 4 (64->1), computed transposed (w4 row @ h^T) so the result is a lane-dense
    # (1, TB) row that stores without masked per-lane writes. Tiny matmul: M=1, K=128, N=TB.
    logit = jax.lax.dot_general(w4_ref[...], h, (((1,), (1,)), ((), ())),
                                preferred_element_type=jnp.float32)          # (1, TB)
    o_ref[...] = jax.nn.sigmoid(logit + b4_ref[...])                         # (1, TB)


@functools.lru_cache(maxsize=None)
def _build_pallas_call(TB, num_steps, E, H1, H2, H3P, vmem_limit_bytes,
                       single_buffer_weights):
    def resident(shape):
        # Constant index_map -> fetched once, stays VMEM-resident across all grid steps.
        idx = lambda i: (0,) * len(shape)
        if single_buffer_weights:
            return pl.BlockSpec(shape, idx, pipeline_mode=pl.Buffered(1))
        return pl.BlockSpec(shape, idx)

    return pl.pallas_call(
        _mlp_kernel,
        # Lane-dense output: one (1, TB) row per grid step (leading dim squeezed in-kernel).
        out_shape=jax.ShapeDtypeStruct((num_steps, 1, TB), jnp.float32),
        grid=(num_steps,),
        in_specs=[
            pl.BlockSpec((TB, E), lambda i: (i, 0)),     # x tile (pipelined, f32)
            resident((E, H1)),   resident((1, H1)),      # w1 (bf16), b1 (f32)
            resident((H1, H2)),  resident((1, H2)),      # w2, b2
            resident((H2, H3P)), resident((1, H3P)),     # w3 (padded), b3 (padded)
            resident((1, H3P)),  resident((1, 1)),       # w4 row vector (padded), b4
        ],
        out_specs=pl.BlockSpec((None, 1, TB), lambda i: (i, 0, 0)),
        compiler_params=pltpu.CompilerParams(
            dimension_semantics=("parallel",),
            vmem_limit_bytes=vmem_limit_bytes,
        ),
    )


def _default_block_batch():
    """Chip-aware batch tile: big tiles on 128-MiB-VMEM parts (v5e/v6e), 1024 on v7x."""
    try:
        if pltpu.get_tpu_info().vmem_capacity_bytes >= 96 * 1024 * 1024:
            return 2048
    except Exception:
        pass
    return 1024


def prepare_params(params):
    """One-time parameter prep (hoisted out of the forward path): bf16 matmul weights,
    layer-3/4 zero-padding 64 -> 128, w4 as a (1, 128) row vector."""
    w1, b1, w2, b2, w3, b3, w4, b4 = params
    H3, H3P = w3.shape[1], 128
    w3p = jnp.pad(w3, ((0, 0), (0, H3P - H3)))
    b3p = jnp.pad(b3, ((0, 0), (0, H3P - H3))).astype(jnp.float32)
    w4v = jnp.pad(jnp.asarray(w4, jnp.float32).reshape(1, -1), ((0, 0), (0, H3P - H3)))
    b4s = jnp.asarray(b4, jnp.float32).reshape(1, 1)
    return (w1.astype(jnp.bfloat16), jnp.asarray(b1, jnp.float32),
            w2.astype(jnp.bfloat16), jnp.asarray(b2, jnp.float32),
            w3p.astype(jnp.bfloat16), b3p,
            w4v, b4s)


def pro_model_forward(x, prepared_params, block_batch=None):
    """x: (B, E) float32. prepared_params: output of prepare_params(). Returns (B,) f32."""
    global _single_buffer_weights
    w1b, b1, w2b, b2, w3b, b3p, w4v, b4s = prepared_params
    B, E = x.shape
    H1, H2, H3P = w1b.shape[1], w2b.shape[1], w3b.shape[1]

    if block_batch is None:
        block_batch = _default_block_batch()

    # Batch tile: large enough to amortize the ~0.35 us/step grid overhead, capped so the
    # grid has >= 2 steps when B allows (v7x megacore) and doesn't overshoot small batches.
    TB = _round_up(block_batch, 128)
    TB = min(TB, max(128, _round_up(_cdiv(B, 2), 128)))
    TB = min(TB, _round_up(B, 8))
    TB = max(TB, 8)
    num_steps = _cdiv(B, TB)
    vmem_limit = (64 if TB >= 2048 else 48) * 1024 * 1024

    args = (x, w1b, b1, w2b, b2, w3b, b3p, w4v, b4s)
    try:
        call = _build_pallas_call(TB, num_steps, E, H1, H2, H3P, vmem_limit,
                                  _single_buffer_weights)
        out = call(*args)
    except Exception:
        if not _single_buffer_weights:
            raise
        # pl.Buffered(1) single-buffering unsupported here -> fall back to default buffering.
        _single_buffer_weights = False
        call = _build_pallas_call(TB, num_steps, E, H1, H2, H3P, vmem_limit, False)
        out = call(*args)

    # (num_steps, 1, TB) -> flat rows; drop the partial-last-tile padding, squeeze(-1).
    return out.reshape(-1)[:B]


def init_params(key, embedding_dim=1280):
    """Deterministic init mimicking PyTorch defaults; eval-mode BN folded into Linear."""
    dims = [embedding_dim, 512, 256, 64, 1]
    eps = 1e-5
    params = []
    keys = jax.random.split(key, 2 * (len(dims) - 1))
    for i in range(len(dims) - 1):
        fan_in, fan_out = dims[i], dims[i + 1]
        bound = 1.0 / jnp.sqrt(fan_in)
        # PyTorch Linear stores (out, in); we build (in, out) directly.
        W = jax.random.uniform(keys[2 * i], (fan_in, fan_out),
                               minval=-bound, maxval=bound, dtype=jnp.float32)
        b = jax.random.uniform(keys[2 * i + 1], (1, fan_out),
                               minval=-bound, maxval=bound, dtype=jnp.float32)
        if i < len(dims) - 2:
            # Fold eval-mode BatchNorm1d: gamma=1, beta=0, running_mean=0, running_var=1
            gamma = jnp.ones((fan_out,), jnp.float32)
            beta = jnp.zeros((fan_out,), jnp.float32)
            running_mean = jnp.zeros((fan_out,), jnp.float32)
            running_var = jnp.ones((fan_out,), jnp.float32)
            scale = gamma / jnp.sqrt(running_var + eps)
            shift = beta - running_mean * scale
            W = W * scale[None, :]
            b = b * scale[None, :] + shift[None, :]
        params.extend([W, b])
    return tuple(params)


def reference_forward(x, params):
    (w1, b1, w2, b2, w3, b3, w4, b4) = params
    h = jnp.maximum(x @ w1 + b1, 0.0)
    h = jnp.maximum(h @ w2 + b2, 0.0)
    h = jnp.maximum(h @ w3 + b3, 0.0)
    return jax.nn.sigmoid(h @ w4 + b4)[:, 0]


if __name__ == "__main__":
    key = jax.random.PRNGKey(0)
    kx, kp = jax.random.split(key)

    E = 1280
    params = init_params(kp, embedding_dim=E)
    prepared = prepare_params(params)   # one-time prep, reused across calls

    # Small batch (single grid step).
    B = 8
    x = jax.random.normal(kx, (B, E), dtype=jnp.float32)
    out = jax.block_until_ready(pro_model_forward(x, prepared))
    ref = reference_forward(x, params)
    assert out.shape == (B,)
    assert jnp.allclose(out, ref, atol=2e-2, rtol=2e-2), (
        f"mismatch vs reference: max abs diff {jnp.max(jnp.abs(out - ref))}")

    # Multi-tile path with a partial last block (batch not a multiple of the tile).
    B2 = 300
    x2 = jax.random.normal(jax.random.PRNGKey(1), (B2, E), dtype=jnp.float32)
    out2 = jax.block_until_ready(pro_model_forward(x2, prepared, block_batch=256))
    ref2 = reference_forward(x2, params)
    assert out2.shape == (B2,)
    assert jnp.allclose(out2, ref2, atol=2e-2, rtol=2e-2), (
        f"multi-tile mismatch: max abs diff {jnp.max(jnp.abs(out2 - ref2))}")

    print("KERNEL_OK")
</pallas_src>

<mosaic_0001>
module attributes {stable_mosaic.version = 11 : i64} {
  func.func @_mlp_kernel(%arg0: i32, %arg1: memref<8x1280xf32, #tpu.memory_space<vmem>>, %arg2: memref<1280x512xbf16, #tpu.memory_space<vmem>>, %arg3: memref<1x512xf32, #tpu.memory_space<vmem>>, %arg4: memref<512x256xbf16, #tpu.memory_space<vmem>>, %arg5: memref<1x256xf32, #tpu.memory_space<vmem>>, %arg6: memref<256x128xbf16, #tpu.memory_space<vmem>>, %arg7: memref<1x128xf32, #tpu.memory_space<vmem>>, %arg8: memref<1x128xf32, #tpu.memory_space<vmem>>, %arg9: memref<1x1xf32, #tpu.memory_space<vmem>>, %arg10: memref<1x1x8xf32, #tpu.memory_space<vmem>>) attributes {dimension_semantics = [#tpu.dimension_semantics<parallel>], iteration_bounds = array<i64: 1>, scalar_prefetch = 0 : i64, scratch_operands = 0 : i64, tpu.core_type = #tpu.core_type<tc>, window_params = [{transform_indices = @transform_0, window_bounds = array<i64: 8, 1280>}, {pipeline_mode = #tpu.pipeline_mode<synchronous>, transform_indices = @transform_1, window_bounds = array<i64: 1280, 512>}, {pipeline_mode = #tpu.pipeline_mode<synchronous>, transform_indices = @transform_2, window_bounds = array<i64: 1, 512>}, {pipeline_mode = #tpu.pipeline_mode<synchronous>, transform_indices = @transform_3, window_bounds = array<i64: 512, 256>}, {pipeline_mode = #tpu.pipeline_mode<synchronous>, transform_indices = @transform_4, window_bounds = array<i64: 1, 256>}, {pipeline_mode = #tpu.pipeline_mode<synchronous>, transform_indices = @transform_5, window_bounds = array<i64: 256, 128>}, {pipeline_mode = #tpu.pipeline_mode<synchronous>, transform_indices = @transform_6, window_bounds = array<i64: 1, 128>}, {pipeline_mode = #tpu.pipeline_mode<synchronous>, transform_indices = @transform_7, window_bounds = array<i64: 1, 128>}, {pipeline_mode = #tpu.pipeline_mode<synchronous>, transform_indices = @transform_8, window_bounds = array<i64: 1, 1>}, {transform_indices = @transform_9, window_bounds = array<i64: 1, 1, 8>}]} {
    %c0 = arith.constant 0 : index
    %c0_0 = arith.constant 0 : index
    %0 = vector.load %arg1[%c0, %c0_0] : memref<8x1280xf32, #tpu.memory_space<vmem>>, vector<8x1280xf32>
    %1 = arith.truncf %0 : vector<8x1280xf32> to vector<8x1280xbf16>
    %c0_1 = arith.constant 0 : index
    %c0_2 = arith.constant 0 : index
    %2 = vector.load %arg2[%c0_1, %c0_2] : memref<1280x512xbf16, #tpu.memory_space<vmem>>, vector<1280x512xbf16>
    %cst = arith.constant dense<0.000000e+00> : vector<8x512xf32>
    %3 = tpu.matmul %1, %2, %cst {dimension_numbers = #tpu.dot_dimension_numbers<[1], [0], [0], [1], [0, 0, 1, 1], [], []>} : vector<8x1280xbf16>, vector<1280x512xbf16>, vector<8x512xf32> -> vector<8x512xf32>
    %c0_3 = arith.constant 0 : index
    %c0_4 = arith.constant 0 : index
    %4 = vector.load %arg3[%c0_3, %c0_4] : memref<1x512xf32, #tpu.memory_space<vmem>>, vector<1x512xf32>
    %5 = vector.broadcast %4 : vector<1x512xf32> to vector<8x512xf32>
    %6 = arith.addf %3, %5 : vector<8x512xf32>
    %cst_5 = arith.constant 0.000000e+00 : f32
    %7 = vector.broadcast %cst_5 : f32 to vector<8x512xf32>
    %8 = arith.maximumf %6, %7 : vector<8x512xf32>
    %9 = arith.truncf %8 : vector<8x512xf32> to vector<8x512xbf16>
    %c0_6 = arith.constant 0 : index
    %c0_7 = arith.constant 0 : index
    %10 = vector.load %arg4[%c0_6, %c0_7] : memref<512x256xbf16, #tpu.memory_space<vmem>>, vector<512x256xbf16>
    %cst_8 = arith.constant dense<0.000000e+00> : vector<8x256xf32>
    %11 = tpu.matmul %9, %10, %cst_8 {dimension_numbers = #tpu.dot_dimension_numbers<[1], [0], [0], [1], [0, 0, 1, 1], [], []>} : vector<8x512xbf16>, vector<512x256xbf16>, vector<8x256xf32> -> vector<8x256xf32>
    %c0_9 = arith.constant 0 : index
    %c0_10 = arith.constant 0 : index
    %12 = vector.load %arg5[%c0_9, %c0_10] : memref<1x256xf32, #tpu.memory_space<vmem>>, vector<1x256xf32>
    %13 = vector.broadcast %12 : vector<1x256xf32> to vector<8x256xf32>
    %14 = arith.addf %11, %13 : vector<8x256xf32>
    %cst_11 = arith.constant 0.000000e+00 : f32
    %15 = vector.broadcast %cst_11 : f32 to vector<8x256xf32>
    %16 = arith.maximumf %14, %15 : vector<8x256xf32>
    %17 = arith.truncf %16 : vector<8x256xf32> to vector<8x256xbf16>
    %c0_12 = arith.constant 0 : index
    %c0_13 = arith.constant 0 : index
    %18 = vector.load %arg6[%c0_12, %c0_13] : memref<256x128xbf16, #tpu.memory_space<vmem>>, vector<256x128xbf16>
    %cst_14 = arith.constant dense<0.000000e+00> : vector<8x128xf32>
    %19 = tpu.matmul %17, %18, %cst_14 {dimension_numbers = #tpu.dot_dimension_numbers<[1], [0], [0], [1], [0, 0, 1, 1], [], []>} : vector<8x256xbf16>, vector<256x128xbf16>, vector<8x128xf32> -> vector<8x128xf32>
    %c0_15 = arith.constant 0 : index
    %c0_16 = arith.constant 0 : index
    %20 = vector.load %arg7[%c0_15, %c0_16] : memref<1x128xf32, #tpu.memory_space<vmem>>, vector<1x128xf32>
    %21 = vector.broadcast %20 : vector<1x128xf32> to vector<8x128xf32>
    %22 = arith.addf %19, %21 : vector<8x128xf32>
    %cst_17 = arith.constant 0.000000e+00 : f32
    %23 = vector.broadcast %cst_17 : f32 to vector<8x128xf32>
    %24 = arith.maximumf %22, %23 : vector<8x128xf32>
    %c0_18 = arith.constant 0 : index
    %c0_19 = arith.constant 0 : index
    %25 = vector.load %arg8[%c0_18, %c0_19] : memref<1x128xf32, #tpu.memory_space<vmem>>, vector<1x128xf32>
    %cst_20 = arith.constant dense<0.000000e+00> : vector<1x8xf32>
    %26 = tpu.matmul %25, %24, %cst_20 {dimension_numbers = #tpu.dot_dimension_numbers<[1], [1], [0], [0], [0, 0, 1, 0], [], []>} : vector<1x128xf32>, vector<8x128xf32>, vector<1x8xf32> -> vector<1x8xf32>
    %c0_21 = arith.constant 0 : index
    %c0_22 = arith.constant 0 : index
    %27 = vector.load %arg9[%c0_21, %c0_22] : memref<1x1xf32, #tpu.memory_space<vmem>>, vector<1x1xf32>
    %28 = vector.broadcast %27 : vector<1x1xf32> to vector<1x8xf32>
    %29 = arith.addf %26, %28 : vector<1x8xf32>
    %30 = arith.negf %29 : vector<1x8xf32>
    %31 = math.exp %30 : vector<1x8xf32>
    %cst_23 = arith.constant 1.000000e+00 : f32
    %32 = vector.broadcast %cst_23 : f32 to vector<1x8xf32>
    %33 = arith.addf %32, %31 : vector<1x8xf32>
    %34 = arith.divf %32, %33 : vector<1x8xf32>
    %c0_24 = arith.constant 0 : index
    %c0_25 = arith.constant 0 : index
    %c0_26 = arith.constant 0 : index
    %35 = vector.load %arg10[%c0_24, %c0_25, %c0_26] : memref<1x1x8xf32, #tpu.memory_space<vmem>>, vector<1x1x8xf32>
    %36 = vector.shape_cast %35 : vector<1x1x8xf32> to vector<1x8xf32>
    %37 = vector.shape_cast %34 : vector<1x8xf32> to vector<1x1x8xf32>
    tpu.vector_store %arg10[%c0_24, %c0_25, %c0_26], %37 {strides = array<i32>} : memref<1x1x8xf32, #tpu.memory_space<vmem>>, vector<1x1x8xf32>,
    return
  }
  func.func @transform_0(%arg0: i32) -> (i32, i32) {
    %c0_i32 = arith.constant 0 : i32
    %c0_i32_0 = arith.constant 0 : i32
    return %arg0, %c0_i32 : i32, i32
  }
  func.func @transform_1(%arg0: i32) -> (i32, i32) {
    %c0_i32 = arith.constant 0 : i32
    %c0_i32_0 = arith.constant 0 : i32
    %c0_i32_1 = arith.constant 0 : i32
    return %c0_i32, %c0_i32_0 : i32, i32
  }
  func.func @transform_2(%arg0: i32) -> (i32, i32) {
    %c0_i32 = arith.constant 0 : i32
    %c0_i32_0 = arith.constant 0 : i32
    %c0_i32_1 = arith.constant 0 : i32
    return %c0_i32, %c0_i32_0 : i32, i32
  }
  func.func @transform_3(%arg0: i32) -> (i32, i32) {
    %c0_i32 = arith.constant 0 : i32
    %c0_i32_0 = arith.constant 0 : i32
    %c0_i32_1 = arith.constant 0 : i32
    return %c0_i32, %c0_i32_0 : i32, i32
  }
  func.func @transform_4(%arg0: i32) -> (i32, i32) {
    %c0_i32 = arith.constant 0 : i32
    %c0_i32_0 = arith.constant 0 : i32
    %c0_i32_1 = arith.constant 0 : i32
    return %c0_i32, %c0_i32_0 : i32, i32
  }
  func.func @transform_5(%arg0: i32) -> (i32, i32) {
    %c0_i32 = arith.constant 0 : i32
    %c0_i32_0 = arith.constant 0 : i32
    %c0_i32_1 = arith.constant 0 : i32
    return %c0_i32, %c0_i32_0 : i32, i32
  }
  func.func @transform_6(%arg0: i32) -> (i32, i32) {
    %c0_i32 = arith.constant 0 : i32
    %c0_i32_0 = arith.constant 0 : i32
    %c0_i32_1 = arith.constant 0 : i32
    return %c0_i32, %c0_i32_0 : i32, i32
  }
  func.func @transform_7(%arg0: i32) -> (i32, i32) {
    %c0_i32 = arith.constant 0 : i32
    %c0_i32_0 = arith.constant 0 : i32
    %c0_i32_1 = arith.constant 0 : i32
    return %c0_i32, %c0_i32_0 : i32, i32
  }
  func.func @transform_8(%arg0: i32) -> (i32, i32) {
    %c0_i32 = arith.constant 0 : i32
    %c0_i32_0 = arith.constant 0 : i32
    %c0_i32_1 = arith.constant 0 : i32
    return %c0_i32, %c0_i32_0 : i32, i32
  }
  func.func @transform_9(%arg0: i32) -> (i32, i32, i32) {
    %c0_i32 = arith.constant 0 : i32
    %c0_i32_0 = arith.constant 0 : i32
    %c0_i32_1 = arith.constant 0 : i32
    return %arg0, %c0_i32, %c0_i32_0 : i32, i32, i32
  }
}

module attributes {stable_mosaic.version = 11 : i64} {
  func.func @_mlp_kernel(%arg0: i32, %arg1: memref<8x1280xf32, #tpu.memory_space<vmem>>, %arg2: memref<1280x512xbf16, #tpu.memory_space<vmem>>, %arg3: memref<1x512xf32, #tpu.memory_space<vmem>>, %arg4: memref<512x256xbf16, #tpu.memory_space<vmem>>, %arg5: memref<1x256xf32, #tpu.memory_space<vmem>>, %arg6: memref<256x128xbf16, #tpu.memory_space<vmem>>, %arg7: memref<1x128xf32, #tpu.memory_space<vmem>>, %arg8: memref<1x128xf32, #tpu.memory_space<vmem>>, %arg9: memref<1x1xf32, #tpu.memory_space<vmem>>, %arg10: memref<1x1x8xf32, #tpu.memory_space<vmem>>) attributes {dimension_semantics = [#tpu.dimension_semantics<parallel>], iteration_bounds = array<i64: 1>, scalar_prefetch = 0 : i64, scratch_operands = 0 : i64, tpu.core_type = #tpu.core_type<tc>, window_params = [{transform_indices = @transform_0, window_bounds = array<i64: 8, 1280>}, {pipeline_mode = #tpu.pipeline_mode<synchronous>, transform_indices = @transform_1, window_bounds = array<i64: 1280, 512>}, {pipeline_mode = #tpu.pipeline_mode<synchronous>, transform_indices = @transform_2, window_bounds = array<i64: 1, 512>}, {pipeline_mode = #tpu.pipeline_mode<synchronous>, transform_indices = @transform_3, window_bounds = array<i64: 512, 256>}, {pipeline_mode = #tpu.pipeline_mode<synchronous>, transform_indices = @transform_4, window_bounds = array<i64: 1, 256>}, {pipeline_mode = #tpu.pipeline_mode<synchronous>, transform_indices = @transform_5, window_bounds = array<i64: 256, 128>}, {pipeline_mode = #tpu.pipeline_mode<synchronous>, transform_indices = @transform_6, window_bounds = array<i64: 1, 128>}, {pipeline_mode = #tpu.pipeline_mode<synchronous>, transform_indices = @transform_7, window_bounds = array<i64: 1, 128>}, {pipeline_mode = #tpu.pipeline_mode<synchronous>, transform_indices = @transform_8, window_bounds = array<i64: 1, 1>}, {transform_indices = @transform_9, window_bounds = array<i64: 1, 1, 8>}]} {
    %c0 = arith.constant 0 : index
    %c0_0 = arith.constant 0 : index
    %0 = vector.load %arg1[%c0, %c0_0] : memref<8x1280xf32, #tpu.memory_space<vmem>>, vector<8x1280xf32>
    %1 = arith.truncf %0 : vector<8x1280xf32> to vector<8x1280xbf16>
    %c0_1 = arith.constant 0 : index
    %c0_2 = arith.constant 0 : index
    %2 = vector.load %arg2[%c0_1, %c0_2] : memref<1280x512xbf16, #tpu.memory_space<vmem>>, vector<1280x512xbf16>
    %cst = arith.constant dense<0.000000e+00> : vector<8x512xf32>
    %3 = tpu.matmul %1, %2, %cst {dimension_numbers = #tpu.dot_dimension_numbers<[1], [0], [0], [1], [0, 0, 1, 1], [], []>} : vector<8x1280xbf16>, vector<1280x512xbf16>, vector<8x512xf32> -> vector<8x512xf32>
    %c0_3 = arith.constant 0 : index
    %c0_4 = arith.constant 0 : index
    %4 = vector.load %arg3[%c0_3, %c0_4] : memref<1x512xf32, #tpu.memory_space<vmem>>, vector<1x512xf32>
    %5 = vector.broadcast %4 : vector<1x512xf32> to vector<8x512xf32>
    %6 = arith.addf %3, %5 : vector<8x512xf32>
    %cst_5 = arith.constant 0.000000e+00 : f32
    %7 = vector.broadcast %cst_5 : f32 to vector<8x512xf32>
    %8 = arith.maximumf %6, %7 : vector<8x512xf32>
    %9 = arith.truncf %8 : vector<8x512xf32> to vector<8x512xbf16>
    %c0_6 = arith.constant 0 : index
    %c0_7 = arith.constant 0 : index
    %10 = vector.load %arg4[%c0_6, %c0_7] : memref<512x256xbf16, #tpu.memory_space<vmem>>, vector<512x256xbf16>
    %cst_8 = arith.constant dense<0.000000e+00> : vector<8x256xf32>
    %11 = tpu.matmul %9, %10, %cst_8 {dimension_numbers = #tpu.dot_dimension_numbers<[1], [0], [0], [1], [0, 0, 1, 1], [], []>} : vector<8x512xbf16>, vector<512x256xbf16>, vector<8x256xf32> -> vector<8x256xf32>
    %c0_9 = arith.constant 0 : index
    %c0_10 = arith.constant 0 : index
    %12 = vector.load %arg5[%c0_9, %c0_10] : memref<1x256xf32, #tpu.memory_space<vmem>>, vector<1x256xf32>
    %13 = vector.broadcast %12 : vector<1x256xf32> to vector<8x256xf32>
    %14 = arith.addf %11, %13 : vector<8x256xf32>
    %cst_11 = arith.constant 0.000000e+00 : f32
    %15 = vector.broadcast %cst_11 : f32 to vector<8x256xf32>
    %16 = arith.maximumf %14, %15 : vector<8x256xf32>
    %17 = arith.truncf %16 : vector<8x256xf32> to vector<8x256xbf16>
    %c0_12 = arith.constant 0 : index
    %c0_13 = arith.constant 0 : index
    %18 = vector.load %arg6[%c0_12, %c0_13] : memref<256x128xbf16, #tpu.memory_space<vmem>>, vector<256x128xbf16>
    %cst_14 = arith.constant dense<0.000000e+00> : vector<8x128xf32>
    %19 = tpu.matmul %17, %18, %cst_14 {dimension_numbers = #tpu.dot_dimension_numbers<[1], [0], [0], [1], [0, 0, 1, 1], [], []>} : vector<8x256xbf16>, vector<256x128xbf16>, vector<8x128xf32> -> vector<8x128xf32>
    %c0_15 = arith.constant 0 : index
    %c0_16 = arith.constant 0 : index
    %20 = vector.load %arg7[%c0_15, %c0_16] : memref<1x128xf32, #tpu.memory_space<vmem>>, vector<1x128xf32>
    %21 = vector.broadcast %20 : vector<1x128xf32> to vector<8x128xf32>
    %22 = arith.addf %19, %21 : vector<8x128xf32>
    %cst_17 = arith.constant 0.000000e+00 : f32
    %23 = vector.broadcast %cst_17 : f32 to vector<8x128xf32>
    %24 = arith.maximumf %22, %23 : vector<8x128xf32>
    %c0_18 = arith.constant 0 : index
    %c0_19 = arith.constant 0 : index
    %25 = vector.load %arg8[%c0_18, %c0_19] : memref<1x128xf32, #tpu.memory_space<vmem>>, vector<1x128xf32>
    %cst_20 = arith.constant dense<0.000000e+00> : vector<1x8xf32>
    %26 = tpu.matmul %25, %24, %cst_20 {dimension_numbers = #tpu.dot_dimension_numbers<[1], [1], [0], [0], [0, 0, 1, 0], [], []>} : vector<1x128xf32>, vector<8x128xf32>, vector<1x8xf32> -> vector<1x8xf32>
    %c0_21 = arith.constant 0 : index
    %c0_22 = arith.constant 0 : index
    %27 = vector.load %arg9[%c0_21, %c0_22] : memref<1x1xf32, #tpu.memory_space<vmem>>, vector<1x1xf32>
    %28 = vector.broadcast %27 : vector<1x1xf32> to vector<1x8xf32>
    %29 = arith.addf %26, %28 : vector<1x8xf32>
    %30 = arith.negf %29 : vector<1x8xf32>
    %31 = math.exp %30 : vector<1x8xf32>
    %cst_23 = arith.constant 1.000000e+00 : f32
    %32 = vector.broadcast %cst_23 : f32 to vector<1x8xf32>
    %33 = arith.addf %32, %31 : vector<1x8xf32>
    %34 = arith.divf %32, %33 : vector<1x8xf32>
    %c0_24 = arith.constant 0 : index
    %c0_25 = arith.constant 0 : index
    %c0_26 = arith.constant 0 : index
    %35 = vector.load %arg10[%c0_24, %c0_25, %c0_26] : memref<1x1x8xf32, #tpu.memory_space<vmem>>, vector<1x1x8xf32>
    %36 = vector.shape_cast %35 : vector<1x1x8xf32> to vector<1x8xf32>
    %37 = vector.shape_cast %34 : vector<1x8xf32> to vector<1x1x8xf32>
    tpu.vector_store %arg10[%c0_24, %c0_25, %c0_26], %37 {strides = array<i32>} : memref<1x1x8xf32, #tpu.memory_space<vmem>>, vector<1x1x8xf32>,
    return
  }
  func.func @transform_0(%arg0: i32) -> (i32, i32) {
    %c0_i32 = arith.constant 0 : i32
    %c0_i32_0 = arith.constant 0 : i32
    return %arg0, %c0_i32 : i32, i32
  }
  func.func @transform_1(%arg0: i32) -> (i32, i32) {
    %c0_i32 = arith.constant 0 : i32
    %c0_i32_0 = arith.constant 0 : i32
    %c0_i32_1 = arith.constant 0 : i32
    return %c0_i32, %c0_i32_0 : i32, i32
  }
  func.func @transform_2(%arg0: i32) -> (i32, i32) {
    %c0_i32 = arith.constant 0 : i32
    %c0_i32_0 = arith.constant 0 : i32
    %c0_i32_1 = arith.constant 0 : i32
    return %c0_i32, %c0_i32_0 : i32, i32
  }
  func.func @transform_3(%arg0: i32) -> (i32, i32) {
    %c0_i32 = arith.constant 0 : i32
    %c0_i32_0 = arith.constant 0 : i32
    %c0_i32_1 = arith.constant 0 : i32
    return %c0_i32, %c0_i32_0 : i32, i32
  }
  func.func @transform_4(%arg0: i32) -> (i32, i32) {
    %c0_i32 = arith.constant 0 : i32
    %c0_i32_0 = arith.constant 0 : i32
    %c0_i32_1 = arith.constant 0 : i32
    return %c0_i32, %c0_i32_0 : i32, i32
  }
  func.func @transform_5(%arg0: i32) -> (i32, i32) {
    %c0_i32 = arith.constant 0 : i32
    %c0_i32_0 = arith.constant 0 : i32
    %c0_i32_1 = arith.constant 0 : i32
    return %c0_i32, %c0_i32_0 : i32, i32
  }
  func.func @transform_6(%arg0: i32) -> (i32, i32) {
    %c0_i32 = arith.constant 0 : i32
    %c0_i32_0 = arith.constant 0 : i32
    %c0_i32_1 = arith.constant 0 : i32
    return %c0_i32, %c0_i32_0 : i32, i32
  }
  func.func @transform_7(%arg0: i32) -> (i32, i32) {
    %c0_i32 = arith.constant 0 : i32
    %c0_i32_0 = arith.constant 0 : i32
    %c0_i32_1 = arith.constant 0 : i32
    return %c0_i32, %c0_i32_0 : i32, i32
  }
  func.func @transform_8(%arg0: i32) -> (i32, i32) {
    %c0_i32 = arith.constant 0 : i32
    %c0_i32_0 = arith.constant 0 : i32
    %c0_i32_1 = arith.constant 0 : i32
    return %c0_i32, %c0_i32_0 : i32, i32
  }
  func.func @transform_9(%arg0: i32) -> (i32, i32, i32) {
    %c0_i32 = arith.constant 0 : i32
    %c0_i32_0 = arith.constant 0 : i32
    %c0_i32_1 = arith.constant 0 : i32
    return %arg0, %c0_i32, %c0_i32_0 : i32, i32, i32
  }
}

</mosaic_0001>

<bundles_post_ra>
// kernel: tpu_custom_call.1
= control target key start
LH: loop header
LB: loop body
LE: loop exit
PB: predicated region body
PF: predicated region fallthrough
CT: control target
= control target key end

     0   :  { %s4693_s0 = inlined_call_operand.hbm [shape: f32[8,1280], index: 0, kind: input, shape index: {}]   ;;  %s4694_s1 = inlined_call_operand.hbm [shape: bf16[1280,512], index: 1, kind: input, shape index: {}]   ;;  %s4695_s2 = inlined_call_operand.hbm [shape: f32[1,512], index: 2, kind: input, shape index: {}]   ;;  %s4696_s3 = inlined_call_operand.hbm [shape: bf16[512,256], index: 3, kind: input, shape index: {}]   ;;  %s4697_s4 = inlined_call_operand.hbm [shape: f32[1,256], index: 4, kind: input, shape index: {}]   ;;  %s4698_s5 = inlined_call_operand.hbm [shape: bf16[256,128], index: 5, kind: input, shape index: {}]   ;;  %s4699_s6 = inlined_call_operand.hbm [shape: f32[1,128], index: 6, kind: input, shape index: {}]   ;;  %s4700_s7 = inlined_call_operand.hbm [shape: f32[1,128], index: 7, kind: input, shape index: {}]   ;;  %s4701_s8 = inlined_call_operand.<no memory space> [shape: f32[1,1], index: 8, kind: input, shape index: {}]   ;;  %s4702_s9 = inlined_call_operand.hbm [shape: f32[1,1,8], index: 9, kind: output, shape index: {}]  }
   0x1   :  { %v14_v0 = vstv %s4701_s8 }
   0x2   :  { %15 = vst [vmem:[#allocation2] sm:$0x1] %v14_v0 }
   0x3   :  { %16 = vsyncpa [#allocation4], 0 }
   0x4   :  { %17 = vsyncpa [#allocation7], 0 }
   0x5   :  { %18 = vsyncpa [#allocation10], 0 }
   0x6   :  { %19 = vsyncpa [#allocation13], 0 }
   0x7   :  { %20 = vsyncpa [#allocation16], 0 }
   0x8   :  { %21 = vsyncpa [#allocation5], 0  ;;  %s4519_s11 = smov [#allocation6]  }
   0x9   :  { %s37_s12 = sshll.u32 %s4519_s11, 4  ;;  %s38_s12 = int_to_ptr.vmem [resolvable:$true] %s37_s12 }
   0xa   :  { %s4335_s13 = scalar_lea.vmem %s38_s12, 40960  ;;  %p4340_p1 = scmp.lt.s32.totalorder %s38_s12, %s38_s12 }
   0xb   :  { %p4336_p0 = scmp.ne.s32.totalorder %s38_s12, %s4335_s13  ;;  %p4341_p2 = scmp.lt.s32.totalorder %s4335_s13, %s4335_s13 }
   0xd   :  { %p4342_p3 = por %p4341_p2, %p4340_p1 }
   0xf   :  { %p4343_p4 = pnand %p4342_p3, %p4336_p0 }
  0x11   :  { %4346 = shalt.err (!%p4343_p4)
}
  0x12   :  { %s4520_s14 = smov 256   ;;  %s4521_s15 = smov 16  }
  0x13   :  { %43 = dma.hbm_to_vmem [thread:$0]  %s4694_s1, 40960, %s38_s12, [#allocation7], %s4520_s14, %s4520_s14, %s4521_s15  }
  0x14   :  { %s4522_s17 = smov [#allocation9]  }
  0x15   :  { %s59_s18 = sshll.u32 %s4522_s17, 4  ;;  %s60_s18 = int_to_ptr.vmem [resolvable:$true] %s59_s18 }
  0x16   :  { %s4355_s19 = scalar_lea.vmem %s60_s18, 8192  ;;  %p4360_p6 = scmp.lt.s32.totalorder %s60_s18, %s60_s18 }
  0x17   :  { %p4356_p5 = scmp.ne.s32.totalorder %s60_s18, %s4355_s19  ;;  %p4361_p7 = scmp.lt.s32.totalorder %s4355_s19, %s4355_s19 }
  0x19   :  { %p4362_p8 = por %p4361_p7, %p4360_p6 }
  0x1b   :  { %p4363_p9 = pnand %p4362_p8, %p4356_p5 }
  0x1d   :  { %4366 = shalt.err (!%p4363_p9)
}
  0x1e   :  { %s4523_s20 = smov 128   ;;  %s4524_s21 = smov 8  }
  0x1f   :  { %65 = dma.hbm_to_vmem [thread:$0]  %s4696_s3, 8192, %s60_s18, [#allocation10], %s4523_s20, %s4523_s20, %s4524_s21  }
  0x20   :  { %s4525_s24 = smov [#allocation12]  }
  0x21   :  { %s81_s25 = sshll.u32 %s4525_s24, 4  ;;  %s82_s25 = int_to_ptr.vmem [resolvable:$true] %s81_s25 }
  0x22   :  { %s4375_s1 = scalar_lea.vmem %s82_s25, 2048  ;;  %p4380_p11 = scmp.lt.s32.totalorder %s82_s25, %s82_s25 }
  0x23   :  { %p4376_p10 = scmp.ne.s32.totalorder %s82_s25, %s4375_s1  ;;  %p4381_p12 = scmp.lt.s32.totalorder %s4375_s1, %s4375_s1 }
  0x25   :  { %p4382_p13 = por %p4381_p12, %p4380_p11 }
  0x27   :  { %p4383_p0 = pnand %p4382_p13, %p4376_p10 }
  0x29   :  { %4386 = shalt.err (!%p4383_p0)
}
  0x2a   :  { %s4526_s26 = smov 64   ;;  %s4527_s27 = smov 4  }
  0x2b   :  { %87 = dma.hbm_to_vmem [thread:$0]  %s4698_s5, 2048, %s82_s25, [#allocation13], %s4526_s26, %s4526_s26, %s4527_s27  }
  0x2c   :  { %s4528_s30 = smov [#allocation3]   ;;  %s4529_s3 = smov [#allocation8]  }
  0x2d   :  { %s28_s10 = sshll.u32 %s4528_s30, 4  ;;  %s50_s11 = sshll.u32 %s4529_s3, 4  ;;  %s29_s10 = int_to_ptr.vmem [resolvable:$true] %s28_s10  ;;  %s51_s11 = int_to_ptr.vmem [resolvable:$true] %s50_s11 }
  0x2e   :  { %s4395_s12 = scalar_lea.vmem %s29_s10, 1280  ;;  %p4400_p2 = scmp.lt.s32.totalorder %s29_s10, %s29_s10 }
  0x2f   :  { %p4396_p1 = scmp.ne.s32.totalorder %s29_s10, %s4395_s12  ;;  %p4401_p3 = scmp.lt.s32.totalorder %s4395_s12, %s4395_s12 }
  0x31   :  { %p4402_p4 = por %p4401_p3, %p4400_p2 }
  0x33   :  { %p4403_p5 = pnand %p4402_p4, %p4396_p1 }
  0x35   :  { %4406 = shalt.err (!%p4403_p5)
}
  0x36   :  { %31 = dma.hbm_to_vmem [thread:$0]  %s4693_s0, 1280, %s29_s10, [#allocation4]  }
  0x37   :  { %s4415_s15 = scalar_lea.vmem %s51_s11, 64  ;;  %p4420_p7 = scmp.lt.s32.totalorder %s51_s11, %s51_s11 }
  0x38   :  { %p4416_p6 = scmp.ne.s32.totalorder %s51_s11, %s4415_s15  ;;  %p4421_p8 = scmp.lt.s32.totalorder %s4415_s15, %s4415_s15 }
  0x3a   :  { %p4422_p9 = por %p4421_p8, %p4420_p7 }
  0x3c   :  { %p4423_p10 = pnand %p4422_p9, %p4416_p6 }
  0x3e   :  { %4426 = shalt.err (!%p4423_p10)
}
  0x3f   :  { %53 = dma.hbm_to_vmem [thread:$0]  %s4695_s2, 64, %s51_s11, [#allocation7]  }
  0x40   :  { %s4530_s16 = smov [#allocation11]   ;;  %s4531_s18 = smov [#allocation14]  }
  0x41   :  { %s72_s17 = sshll.u32 %s4530_s16, 4  ;;  %s94_s19 = sshll.u32 %s4531_s18, 4  ;;  %s73_s17 = int_to_ptr.vmem [resolvable:$true] %s72_s17  ;;  %s95_s19 = int_to_ptr.vmem [resolvable:$true] %s94_s19 }
  0x42   :  { %s4435_s20 = scalar_lea.vmem %s73_s17, 32  ;;  %p4440_p12 = scmp.lt.s32.totalorder %s73_s17, %s73_s17 }
  0x43   :  { %p4436_p11 = scmp.ne.s32.totalorder %s73_s17, %s4435_s20  ;;  %p4441_p13 = scmp.lt.s32.totalorder %s4435_s20, %s4435_s20 }
  0x45   :  { %p4442_p0 = por %p4441_p13, %p4440_p12 }
  0x47   :  { %p4443_p1 = pnand %p4442_p0, %p4436_p11 }
  0x49   :  { %4446 = shalt.err (!%p4443_p1)
}
  0x4a   :  { %75 = dma.hbm_to_vmem [thread:$0]  %s4697_s4, 32, %s73_s17, [#allocation10]  }
  0x4b   :  { %s4455_s22 = scalar_lea.vmem %s95_s19, 16  ;;  %s4459_s2 = scalar_lea.vmem %s95_s19, 32 }
  0x4c   :  { %p4456_p2 = scmp.ne.s32.totalorder %s95_s19, %s4455_s22  ;;  %p4460_p3 = scmp.lt.s32.totalorder %s95_s19, %s95_s19 }
  0x4d   :  { %p4461_p4 = scmp.lt.s32.totalorder %s4459_s2, %s4455_s22 }
  0x4f   :  { %p4462_p5 = por %p4461_p4, %p4460_p3 }
  0x51   :  { %p4463_p6 = pnand %p4462_p5, %p4456_p2 }
  0x53   :  { %4466 = shalt.err (!%p4463_p6)
}
  0x54   :  { %97 = dma.hbm_to_vmem [thread:$0]  %s4699_s6, 16, %s95_s19, [#allocation13]  }
  0x55   :  { %s4532_s25 = smov [#allocation15]  }
  0x56   :  { %s104_s1 = sshll.u32 %s4532_s25, 4  ;;  %s105_s1 = int_to_ptr.vmem [resolvable:$true] %s104_s1 }
  0x57   :  { %s4475_s26 = scalar_lea.vmem %s105_s1, 16  ;;  %s4479_s27 = scalar_lea.vmem %s105_s1, 32 }
  0x58   :  { %p4476_p7 = scmp.ne.s32.totalorder %s105_s1, %s4475_s26  ;;  %p4480_p8 = scmp.lt.s32.totalorder %s105_s1, %s105_s1 }
  0x59   :  { %p4481_p9 = scmp.lt.s32.totalorder %s4479_s27, %s4475_s26 }
  0x5b   :  { %p4482_p10 = por %p4481_p9, %p4480_p8 }
  0x5d   :  { %p4483_p11 = pnand %p4482_p10, %p4476_p7 }
  0x5f   :  { %4486 = shalt.err (!%p4483_p11)
}
  0x60   :  { %107 = dma.hbm_to_vmem [thread:$0]  %s4700_s7, 16, %s105_s1, [#allocation16]  }
  0x61   :  { %4507 = dma.done.wait [#allocation4], 1280  }
  0x62   :  { %4508 = vsyncadd [#allocation4], 4294966016 }
  0x63   :  { %4509 = dma.done.wait [#allocation7], 41024  }
  0x64   :  { %4510 = vsyncadd [#allocation7], 4294926272 }
  0x65   :  { %4511 = dma.done.wait [#allocation10], 8224  }
  0x66   :  { %4512 = vsyncadd [#allocation10], 4294959072 }
  0x67   :  { %4513 = dma.done.wait [#allocation13], 2064  }
  0x68   :  { %4514 = vsyncadd [#allocation13], 4294965232 }
  0x69   :  { %4515 = dma.done.wait [#allocation16], 16  }
  0x6a   :  { %4516 = vsyncadd [#allocation16], 4294967280  ;;  %v3731_v1 = vld [vmem:[#allocation6 + $0xe4] ss:$16 sps:$4 sm:$0xff]   ;;  %v3735_v3 = vld [vmem:[#allocation6 + $0xe0] ss:$16 sps:$4 sm:$0xff]  }
  0x6b   :  { %v3733_v2 = vld [vmem:[#allocation6 + $0x2e4] ss:$16 sps:$4 sm:$0xff]   ;;  %2097 = vmatprep.subr.bf16.mxu0 %v3731_v1  ;;  %v3736_v4 = vld [vmem:[#allocation6 + $0x2e0] ss:$16 sps:$4 sm:$0xff]   ;;  %v136_v47 = vld [vmem:[#allocation3 + $0x8] sm:$0xff]  ;;  %vm4534_vm0 = vmmov 0  }
  0x6c   :  { %2138 = vmatprep.subr.bf16.mxu1 %v3733_v2  ;;  %v3737_v5 = vld [vmem:[#allocation6 + $0xc4] ss:$16 sps:$4 sm:$0xff]   ;;  %2098 = vmatpush1.bf16.msra.mxu0 %v3735_v3  ;;  %v3741_v7 = vld [vmem:[#allocation6 + $0xc0] ss:$16 sps:$4 sm:$0xff]   ;;  %v4614_v50 = vpack.c.bf16 %v136_v47, %v136_v47  ;;  %v138_v51 = vld [vmem:[#allocation3 + $0x18] sm:$0xff]  ;;  %s4536_s6 = smov [#allocation17]  }
  0x6d   :  { %2139 = vmatpush1.bf16.msra.mxu1 %v3736_v4  ;;  %v3739_v6 = vld [vmem:[#allocation6 + $0x2c4] ss:$16 sps:$4 sm:$0xff]   ;;  %2099 = vmatprep.subr.bf16.mxu0 %v3737_v5  ;;  %v3742_v8 = vld [vmem:[#allocation6 + $0x2c0] ss:$16 sps:$4 sm:$0xff]   ;;  %v4616_v53 = vpack.c.bf16 %v138_v51, %v138_v51  ;;  %s3268_s7 = sshll.u32 %s4536_s6, 4  ;;  %vm3260_vm1 = vcmask 57344   ;;  %s3269_s7 = int_to_ptr.vmem [resolvable:$true] %s3268_s7 }
  0x6e   :  { %2140 = vmatprep.subr.bf16.mxu1 %v3739_v6  ;;  %v3743_v9 = vld [vmem:[#allocation6 + $0xa4] ss:$16 sps:$4 sm:$0xff]   ;;  %v3747_v11 = vld [vmem:[#allocation6 + $0xa0] ss:$16 sps:$4 sm:$0xff]   ;;  %2129 = vmatprep.mubr.bf16.mxu0 %v4614_v50  ;;  %s4487_s29 = scalar_lea.vmem %s3269_s7, 16  ;;  %s4491_s30 = scalar_lea.vmem %s3269_s7, 32 }
  0x6f   :  { %v3745_v10 = vld [vmem:[#allocation6 + $0x2a4] ss:$16 sps:$4 sm:$0xff]   ;;  %v3748_v12 = vld [vmem:[#allocation6 + $0x2a0] ss:$16 sps:$4 sm:$0xff]   ;;  %2170 = vmatprep.mubr.bf16.mxu1 %v4616_v53  ;;  %p4488_p12 = scmp.ne.s32.totalorder %s3269_s7, %s4487_s29  ;;  %p4492_p13 = scmp.lt.s32.totalorder %s3269_s7, %s3269_s7 }
  0x70   :  { %2100 = vmatpush1.bf16.msra.mxu0 %v3741_v7  ;;  %v3749_v13 = vld [vmem:[#allocation6 + $0x84] ss:$16 sps:$4 sm:$0xff]   ;;  %v3753_v15 = vld [vmem:[#allocation6 + $0x80] ss:$16 sps:$4 sm:$0xff]   ;;  %p4493_p0 = scmp.lt.s32.totalorder %s4491_s30, %s4487_s29 }
  0x71   :  { %2141 = vmatpush1.bf16.msra.mxu1 %v3742_v8  ;;  %2101 = vmatprep.subr.bf16.mxu0 %v3743_v9  ;;  %v3751_v14 = vld [vmem:[#allocation6 + $0x284] ss:$16 sps:$4 sm:$0xff]   ;;  %v3754_v16 = vld [vmem:[#allocation6 + $0x280] ss:$16 sps:$4 sm:$0xff]  }
  0x72   :  { %2142 = vmatprep.subr.bf16.mxu1 %v3745_v10  ;;  %v3755_v17 = vld [vmem:[#allocation6 + $0x64] ss:$16 sps:$4 sm:$0xff]   ;;  %v3759_v19 = vld [vmem:[#allocation6 + $0x60] ss:$16 sps:$4 sm:$0xff]   ;;  %p4494_p1 = por %p4493_p0, %p4492_p13 }
  0x73   :  { %v3757_v18 = vld [vmem:[#allocation6 + $0x264] ss:$16 sps:$4 sm:$0xff]   ;;  %v3760_v20 = vld [vmem:[#allocation6 + $0x260] ss:$16 sps:$4 sm:$0xff]  }
  0x74   :  { %2102 = vmatpush1.bf16.msra.mxu0 %v3747_v11  ;;  %v3761_v21 = vld [vmem:[#allocation6 + $0x44] ss:$16 sps:$4 sm:$0xff]   ;;  %v3765_v23 = vld [vmem:[#allocation6 + $0x40] ss:$16 sps:$4 sm:$0xff]   ;;  %p4495_p2 = pnand %p4494_p1, %p4488_p12 }
  0x75   :  { %2143 = vmatpush1.bf16.msra.mxu1 %v3748_v12  ;;  %2103 = vmatprep.subr.bf16.mxu0 %v3749_v13  ;;  %v3763_v22 = vld [vmem:[#allocation6 + $0x244] ss:$16 sps:$4 sm:$0xff]   ;;  %v3766_v24 = vld [vmem:[#allocation6 + $0x240] ss:$16 sps:$4 sm:$0xff]  }
  0x76   :  { %2144 = vmatprep.subr.bf16.mxu1 %v3751_v14  ;;  %v3767_v25 = vld [vmem:[#allocation6 + $0x24] ss:$16 sps:$4 sm:$0xff]   ;;  %v3771_v27 = vld [vmem:[#allocation6 + $0x20] ss:$16 sps:$4 sm:$0xff]  }
  0x77   :  { %v3769_v26 = vld [vmem:[#allocation6 + $0x224] ss:$16 sps:$4 sm:$0xff]   ;;  %v3772_v28 = vld [vmem:[#allocation6 + $0x220] ss:$16 sps:$4 sm:$0xff]  }
  0x78   :  { %2104 = vmatpush1.bf16.msra.mxu0 %v3753_v15  ;;  %v3773_v29 = vld [vmem:[#allocation6 + $0x4] ss:$16 sps:$4 sm:$0xff]   ;;  %v3777_v31 = vld [vmem:[#allocation6] ss:$16 sps:$4 sm:$0xff]  }
  0x79   :  { %2145 = vmatpush1.bf16.msra.mxu1 %v3754_v16  ;;  %2105 = vmatprep.subr.bf16.mxu0 %v3755_v17  ;;  %v3775_v30 = vld [vmem:[#allocation6 + $0x204] ss:$16 sps:$4 sm:$0xff]   ;;  %v3778_v32 = vld [vmem:[#allocation6 + $0x200] ss:$16 sps:$4 sm:$0xff]  }
  0x7a   :  { %2146 = vmatprep.subr.bf16.mxu1 %v3757_v18  ;;  %v3779_v33 = vld [vmem:[#allocation6 + $0x1e4] ss:$16 sps:$4 sm:$0xff]   ;;  %v3783_v35 = vld [vmem:[#allocation6 + $0x1e0] ss:$16 sps:$4 sm:$0xff]  }
  0x7b   :  { %v3781_v34 = vld [vmem:[#allocation6 + $0x3e4] ss:$16 sps:$4 sm:$0xff]   ;;  %v3784_v36 = vld [vmem:[#allocation6 + $0x3e0] ss:$16 sps:$4 sm:$0xff]  }
  0x7c   :  { %2106 = vmatpush1.bf16.msra.mxu0 %v3759_v19  ;;  %v3785_v37 = vld [vmem:[#allocation6 + $0x1c4] ss:$16 sps:$4 sm:$0xff]   ;;  %v3789_v39 = vld [vmem:[#allocation6 + $0x1c0] ss:$16 sps:$4 sm:$0xff]  }
  0x7d   :  { %2147 = vmatpush1.bf16.msra.mxu1 %v3760_v20  ;;  %2107 = vmatprep.subr.bf16.mxu0 %v3761_v21  ;;  %v3787_v38 = vld [vmem:[#allocation6 + $0x3c4] ss:$16 sps:$4 sm:$0xff]   ;;  %v3790_v40 = vld [vmem:[#allocation6 + $0x3c0] ss:$16 sps:$4 sm:$0xff]  }
  0x7e   :  { %2148 = vmatprep.subr.bf16.mxu1 %v3763_v22  ;;  %v3791_v41 = vld [vmem:[#allocation6 + $0x1a4] ss:$16 sps:$4 sm:$0xff]   ;;  %v3795_v43 = vld [vmem:[#allocation6 + $0x1a0] ss:$16 sps:$4 sm:$0xff]  }
  0x7f   :  { %v3793_v42 = vld [vmem:[#allocation6 + $0x3a4] ss:$16 sps:$4 sm:$0xff]   ;;  %v3796_v44 = vld [vmem:[#allocation6 + $0x3a0] ss:$16 sps:$4 sm:$0xff]  }
  0x80   :  { %2108 = vmatpush1.bf16.msra.mxu0 %v3765_v23  ;;  %v3797_v45 = vld [vmem:[#allocation6 + $0x184] ss:$16 sps:$4 sm:$0xff]   ;;  %v3801_v48 = vld [vmem:[#allocation6 + $0x180] ss:$16 sps:$4 sm:$0xff]  }
  0x81   :  { %2149 = vmatpush1.bf16.msra.mxu1 %v3766_v24  ;;  %2109 = vmatprep.subr.bf16.mxu0 %v3767_v25  ;;  %v3799_v46 = vld [vmem:[#allocation6 + $0x384] ss:$16 sps:$4 sm:$0xff]   ;;  %v3802_v49 = vld [vmem:[#allocation6 + $0x380] ss:$16 sps:$4 sm:$0xff]  }
  0x82   :  { %2150 = vmatprep.subr.bf16.mxu1 %v3769_v26  ;;  %v3803_v52 = vld [vmem:[#allocation6 + $0x164] ss:$16 sps:$4 sm:$0xff]   ;;  %v3807_v55 = vld [vmem:[#allocation6 + $0x160] ss:$16 sps:$4 sm:$0xff]  }
  0x83   :  { %v3805_v54 = vld [vmem:[#allocation6 + $0x364] ss:$16 sps:$4 sm:$0xff]   ;;  %v3808_v56 = vld [vmem:[#allocation6 + $0x360] ss:$16 sps:$4 sm:$0xff]  }
  0x84   :  { %2110 = vmatpush1.bf16.msra.mxu0 %v3771_v27  ;;  %v3809_v57 = vld [vmem:[#allocation6 + $0x144] ss:$16 sps:$4 sm:$0xff]   ;;  %v3813_v59 = vld [vmem:[#allocation6 + $0x140] ss:$16 sps:$4 sm:$0xff]  }
  0x85   :  { %2151 = vmatpush1.bf16.msra.mxu1 %v3772_v28  ;;  %2111 = vmatprep.subr.bf16.mxu0 %v3773_v29  ;;  %v3811_v58 = vld [vmem:[#allocation6 + $0x344] ss:$16 sps:$4 sm:$0xff]   ;;  %v3814_v60 = vld [vmem:[#allocation6 + $0x340] ss:$16 sps:$4 sm:$0xff]  }
  0x86   :  { %2152 = vmatprep.subr.bf16.mxu1 %v3775_v30  ;;  %v3815_v61 = vld [vmem:[#allocation6 + $0x124] ss:$16 sps:$4 sm:$0xff]   ;;  %v3819_v63 = vld [vmem:[#allocation6 + $0x120] ss:$16 sps:$4 sm:$0xff]  }
  0x87   :  { %v3817_v62 = vld [vmem:[#allocation6 + $0x324] ss:$16 sps:$4 sm:$0xff]   ;;  %v3820_v0 = vld [vmem:[#allocation6 + $0x320] ss:$16 sps:$4 sm:$0xff]  }
  0x88   :  { %2112 = vmatpush1.bf16.msra.mxu0 %v3777_v31  ;;  %v3821_v1 = vld [vmem:[#allocation6 + $0x104] ss:$16 sps:$4 sm:$0xff]   ;;  %v3825_v3 = vld [vmem:[#allocation6 + $0x100] ss:$16 sps:$4 sm:$0xff]  }
  0x89   :  { %2153 = vmatpush1.bf16.msra.mxu1 %v3778_v32  ;;  %2113 = vmatprep.subr.bf16.mxu0 %v3779_v33  ;;  %v3823_v2 = vld [vmem:[#allocation6 + $0x304] ss:$16 sps:$4 sm:$0xff]   ;;  %v3826_v4 = vld [vmem:[#allocation6 + $0x300] ss:$16 sps:$4 sm:$0xff]  }
  0x8a   :  { %2154 = vmatprep.subr.bf16.mxu1 %v3781_v34  ;;  %v135_v5 = vld [vmem:[#allocation3] sm:$0xff]  ;;  %v137_v6 = vld [vmem:[#allocation3 + $0x10] sm:$0xff] }
  0x8b   :  { %v3829_v7 = vld [vmem:[#allocation6 + $0x4e4] ss:$16 sps:$4 sm:$0xff]   ;;  %v4620_v9 = vpack.c.bf16 %v135_v5, %v135_v5  ;;  %v4622_v10 = vpack.c.bf16 %v137_v6, %v137_v6  ;;  %v3827_v11 = vld [vmem:[#allocation6 + $0x4e0] ss:$16 sps:$4 sm:$0xff]  }
  0x8c   :  { %2114 = vmatpush2.bf16.msra.mxu0 %v3783_v35  ;;  %v3832_v8 = vld [vmem:[#allocation6 + $0x6e4] ss:$16 sps:$4 sm:$0xff]   ;;  %v3830_v12 = vld [vmem:[#allocation6 + $0x6e0] ss:$16 sps:$4 sm:$0xff]   ;;  %v140_v35 = vld [vmem:[#allocation3 + $0x28] sm:$0xff] }
  0x8d   :  { %2155 = vmatpush2.bf16.msra.mxu1 %v3784_v36  ;;  %2115 = vmatprep.subr.bf16.mxu0 %v3785_v37  ;;  %v3835_v13 = vld [vmem:[#allocation6 + $0x4c4] ss:$16 sps:$4 sm:$0xff]   ;;  %v3833_v15 = vld [vmem:[#allocation6 + $0x4c0] ss:$16 sps:$4 sm:$0xff]  }
  0x8e   :  { %2156 = vmatprep.subr.bf16.mxu1 %v3787_v38  ;;  %v3838_v14 = vld [vmem:[#allocation6 + $0x6c4] ss:$16 sps:$4 sm:$0xff]   ;;  %v3836_v16 = vld [vmem:[#allocation6 + $0x6c0] ss:$16 sps:$4 sm:$0xff]   ;;  %v4626_v38 = vpack.c.bf16 %v140_v35, %v140_v35 }
  0x8f   :  { %v3841_v17 = vld [vmem:[#allocation6 + $0x4a4] ss:$16 sps:$4 sm:$0xff]   ;;  %v3839_v19 = vld [vmem:[#allocation6 + $0x4a0] ss:$16 sps:$4 sm:$0xff]  }
  0x90   :  { %2116 = vmatpush2.bf16.msra.mxu0 %v3789_v39  ;;  %v3844_v18 = vld [vmem:[#allocation6 + $0x6a4] ss:$16 sps:$4 sm:$0xff]   ;;  %v3842_v20 = vld [vmem:[#allocation6 + $0x6a0] ss:$16 sps:$4 sm:$0xff]   ;;  %v142_v39 = vld [vmem:[#allocation3 + $0x38] sm:$0xff] }
  0x91   :  { %2157 = vmatpush2.bf16.msra.mxu1 %v3790_v40  ;;  %2117 = vmatprep.subr.bf16.mxu0 %v3791_v41  ;;  %v3847_v21 = vld [vmem:[#allocation6 + $0x484] ss:$16 sps:$4 sm:$0xff]   ;;  %v3845_v23 = vld [vmem:[#allocation6 + $0x480] ss:$16 sps:$4 sm:$0xff]   ;;  %v4628_v41 = vpack.c.bf16 %v142_v39, %v142_v39  ;;  %v3944_v39 = vld [vmem:[#allocation6 + $0x88] ss:$16 sps:$4 sm:$0xff]  }
  0x92   :  { %2158 = vmatprep.subr.bf16.mxu1 %v3793_v42  ;;  %v3850_v22 = vld [vmem:[#allocation6 + $0x684] ss:$16 sps:$4 sm:$0xff]   ;;  %v3848_v24 = vld [vmem:[#allocation6 + $0x680] ss:$16 sps:$4 sm:$0xff]  }
  0x93   :  { %v3853_v25 = vld [vmem:[#allocation6 + $0x464] ss:$16 sps:$4 sm:$0xff]   ;;  %v3851_v27 = vld [vmem:[#allocation6 + $0x460] ss:$16 sps:$4 sm:$0xff]  }
  0x94   :  { %2118 = vmatpush2.bf16.msra.mxu0 %v3795_v43  ;;  %v3856_v26 = vld [vmem:[#allocation6 + $0x664] ss:$16 sps:$4 sm:$0xff]   ;;  %v3854_v28 = vld [vmem:[#allocation6 + $0x660] ss:$16 sps:$4 sm:$0xff]  }
  0x95   :  { %2159 = vmatpush2.bf16.msra.mxu1 %v3796_v44  ;;  %2119 = vmatprep.subr.bf16.mxu0 %v3797_v45  ;;  %v3859_v29 = vld [vmem:[#allocation6 + $0x444] ss:$16 sps:$4 sm:$0xff]   ;;  %v3857_v31 = vld [vmem:[#allocation6 + $0x440] ss:$16 sps:$4 sm:$0xff]  }
  0x96   :  { %2160 = vmatprep.subr.bf16.mxu1 %v3799_v46  ;;  %v3862_v30 = vld [vmem:[#allocation6 + $0x644] ss:$16 sps:$4 sm:$0xff]   ;;  %v3860_v32 = vld [vmem:[#allocation6 + $0x640] ss:$16 sps:$4 sm:$0xff]  }
  0x97   :  { %v3865_v33 = vld [vmem:[#allocation6 + $0x424] ss:$16 sps:$4 sm:$0xff]   ;;  %v3863_v36 = vld [vmem:[#allocation6 + $0x420] ss:$16 sps:$4 sm:$0xff]  }
  0x98   :  { %2120 = vmatpush2.bf16.msra.mxu0 %v3801_v48  ;;  %v3868_v34 = vld [vmem:[#allocation6 + $0x624] ss:$16 sps:$4 sm:$0xff]   ;;  %v3866_v37 = vld [vmem:[#allocation6 + $0x620] ss:$16 sps:$4 sm:$0xff]  }
  0x99   :  { %2161 = vmatpush2.bf16.msra.mxu1 %v3802_v49  ;;  %2121 = vmatprep.subr.bf16.mxu0 %v3803_v52  ;;  %v3871_v40 = vld [vmem:[#allocation6 + $0x404] ss:$16 sps:$4 sm:$0xff]   ;;  %v3869_v43 = vld [vmem:[#allocation6 + $0x400] ss:$16 sps:$4 sm:$0xff]  }
  0x9a   :  { %2162 = vmatprep.subr.bf16.mxu1 %v3805_v54  ;;  %v3874_v42 = vld [vmem:[#allocation6 + $0x604] ss:$16 sps:$4 sm:$0xff]   ;;  %v3872_v44 = vld [vmem:[#allocation6 + $0x600] ss:$16 sps:$4 sm:$0xff]  }
  0x9b   :  { %v3877_v45 = vld [vmem:[#allocation6 + $0x5e4] ss:$16 sps:$4 sm:$0xff]   ;;  %v3875_v47 = vld [vmem:[#allocation6 + $0x5e0] ss:$16 sps:$4 sm:$0xff]  }
  0x9c   :  { %2122 = vmatpush2.bf16.msra.mxu0 %v3807_v55  ;;  %v3880_v46 = vld [vmem:[#allocation6 + $0x7e4] ss:$16 sps:$4 sm:$0xff]   ;;  %v3878_v48 = vld [vmem:[#allocation6 + $0x7e0] ss:$16 sps:$4 sm:$0xff]  }
  0x9d   :  { %2163 = vmatpush2.bf16.msra.mxu1 %v3808_v56  ;;  %2123 = vmatprep.subr.bf16.mxu0 %v3809_v57  ;;  %v3883_v49 = vld [vmem:[#allocation6 + $0x5c4] ss:$16 sps:$4 sm:$0xff]   ;;  %v3881_v52 = vld [vmem:[#allocation6 + $0x5c0] ss:$16 sps:$4 sm:$0xff]  }
  0x9e   :  { %2164 = vmatprep.subr.bf16.mxu1 %v3811_v58  ;;  %v3886_v51 = vld [vmem:[#allocation6 + $0x7c4] ss:$16 sps:$4 sm:$0xff]   ;;  %v3884_v54 = vld [vmem:[#allocation6 + $0x7c0] ss:$16 sps:$4 sm:$0xff]  }
  0x9f   :  { %v3889_v55 = vld [vmem:[#allocation6 + $0x5a4] ss:$16 sps:$4 sm:$0xff]   ;;  %v3887_v57 = vld [vmem:[#allocation6 + $0x5a0] ss:$16 sps:$4 sm:$0xff]  }
  0xa0   :  { %2124 = vmatpush2.bf16.msra.mxu0 %v3813_v59  ;;  %v3892_v56 = vld [vmem:[#allocation6 + $0x7a4] ss:$16 sps:$4 sm:$0xff]   ;;  %v3890_v58 = vld [vmem:[#allocation6 + $0x7a0] ss:$16 sps:$4 sm:$0xff]  }
  0xa1   :  { %2165 = vmatpush2.bf16.msra.mxu1 %v3814_v60  ;;  %2125 = vmatprep.subr.bf16.mxu0 %v3815_v61  ;;  %v3895_v59 = vld [vmem:[#allocation6 + $0x584] ss:$16 sps:$4 sm:$0xff]   ;;  %v3893_v61 = vld [vmem:[#allocation6 + $0x580] ss:$16 sps:$4 sm:$0xff]  }
  0xa2   :  { %2166 = vmatprep.subr.bf16.mxu1 %v3817_v62  ;;  %v3898_v60 = vld [vmem:[#allocation6 + $0x784] ss:$16 sps:$4 sm:$0xff]   ;;  %v3896_v62 = vld [vmem:[#allocation6 + $0x780] ss:$16 sps:$4 sm:$0xff]  }
  0xa3   :  { %v3905_v5 = vld [vmem:[#allocation6 + $0x540] ss:$16 sps:$4 sm:$0xff]   ;;  %v3943_v35 = vld [vmem:[#allocation6 + $0x884] ss:$16 sps:$4 sm:$0xff]  }
  0xa4   :  { %2126 = vmatpush2.bf16.msra.mxu0 %v3819_v63  ;;  %v3901_v63 = vld [vmem:[#allocation6 + $0x564] ss:$16 sps:$4 sm:$0xff]   ;;  %v3908_v6 = vld [vmem:[#allocation6 + $0x740] ss:$16 sps:$4 sm:$0xff]  }
  0xa5   :  { %2167 = vmatpush2.bf16.msra.mxu1 %v3820_v0  ;;  %2127 = vmatprep.subr.bf16.mxu0 %v3821_v1  ;;  %v3904_v0 = vld [vmem:[#allocation6 + $0x764] ss:$16 sps:$4 sm:$0xff]   ;;  %v3899_v1 = vld [vmem:[#allocation6 + $0x560] ss:$16 sps:$4 sm:$0xff]  }
  0xa6   :  { %2168 = vmatprep.subr.bf16.mxu1 %v3823_v2  ;;  %v3902_v2 = vld [vmem:[#allocation6 + $0x760] ss:$16 sps:$4 sm:$0xff]  }
  0xa8   :  { %2128 = vmatpush2.bf16.msra.mxu0 %v3825_v3  ;;  %v3907_v3 = vld [vmem:[#allocation6 + $0x544] ss:$16 sps:$4 sm:$0xff]  }
  0xa9   :  { %2169 = vmatpush2.bf16.msra.mxu1 %v3826_v4  ;;  %2179 = vmatprep.subr.bf16.mxu0 %v3829_v7  ;;  %v3910_v4 = vld [vmem:[#allocation6 + $0x744] ss:$16 sps:$4 sm:$0xff]  }
  0xaa   :  { %2220 = vmatprep.subr.bf16.mxu1 %v3832_v8  ;;  %v3913_v7 = vld [vmem:[#allocation6 + $0x524] ss:$16 sps:$4 sm:$0xff]  }
  0xab   :  { %2130 = vmatmul.mubr.bf16.vlgmr.msra.gmra.mxu0 %v4620_v9  ;;  %v3916_v8 = vld [vmem:[#allocation6 + $0x724] ss:$16 sps:$4 sm:$0xff]  }
  0xac   :  { %2171 = vmatmul.mubr.bf16.vlgmr.msra.gmra.mxu1 %v4622_v10  ;;  %2180 = vmatpush1.bf16.msra.mxu0 %v3827_v11  ;;  %v3911_v11 = vld [vmem:[#allocation6 + $0x520] ss:$16 sps:$4 sm:$0xff]  }
  0xad   :  { %2221 = vmatpush1.bf16.msra.mxu1 %v3830_v12  ;;  %2181 = vmatprep.subr.bf16.mxu0 %v3835_v13  ;;  %v3914_v12 = vld [vmem:[#allocation6 + $0x720] ss:$16 sps:$4 sm:$0xff]   ;;  %v3919_v13 = vld [vmem:[#allocation6 + $0x504] ss:$16 sps:$4 sm:$0xff]  }
  0xae   :  { %2222 = vmatprep.subr.bf16.mxu1 %v3838_v14  ;;  %2211 = vmatprep.mubr.bf16.mxu0 %v4626_v38  ;;  %v3922_v14 = vld [vmem:[#allocation6 + $0x704] ss:$16 sps:$4 sm:$0xff]  }
  0xaf   :  { %2252 = vmatprep.mubr.bf16.mxu1 %v4628_v41 }
  0xb0   :  { %2182 = vmatpush1.bf16.msra.mxu0 %v3833_v15  ;;  %v3917_v15 = vld [vmem:[#allocation6 + $0x500] ss:$16 sps:$4 sm:$0xff]  }
  0xb1   :  { %2223 = vmatpush1.bf16.msra.mxu1 %v3836_v16  ;;  %2183 = vmatprep.subr.bf16.mxu0 %v3841_v17  ;;  %v3920_v16 = vld [vmem:[#allocation6 + $0x700] ss:$16 sps:$4 sm:$0xff]  }
  0xb2   :  { %2224 = vmatprep.subr.bf16.mxu1 %v3844_v18  ;;  %v139_v17 = vld [vmem:[#allocation3 + $0x20] sm:$0xff]  ;;  %v141_v18 = vld [vmem:[#allocation3 + $0x30] sm:$0xff] }
  0xb4   :  { %2184 = vmatpush1.bf16.msra.mxu0 %v3839_v19  ;;  %v3925_v19 = vld [vmem:[#allocation6 + $0x8e4] ss:$16 sps:$4 sm:$0xff]  }
  0xb5   :  { %2225 = vmatpush1.bf16.msra.mxu1 %v3842_v20  ;;  %2185 = vmatprep.subr.bf16.mxu0 %v3847_v21  ;;  %v3928_v20 = vld [vmem:[#allocation6 + $0xec] ss:$16 sps:$4 sm:$0xff]   ;;  %v4632_v21 = vpack.c.bf16 %v139_v17, %v139_v17 }
  0xb6   :  { %2226 = vmatprep.subr.bf16.mxu1 %v3850_v22  ;;  %v4634_v22 = vpack.c.bf16 %v141_v18, %v141_v18  ;;  %v4006_v17 = vld [vmem:[#allocation6 + $0x14c] ss:$16 sps:$4 sm:$0xff]   ;;  %v4001_v18 = vld [vmem:[#allocation6 + $0x940] ss:$16 sps:$4 sm:$0xff]  }
  0xb8   :  { %2186 = vmatpush1.bf16.msra.mxu0 %v3845_v23  ;;  %v3923_v23 = vld [vmem:[#allocation6 + $0x8e0] ss:$16 sps:$4 sm:$0xff]  }
  0xb9   :  { %2227 = vmatpush1.bf16.msra.mxu1 %v3848_v24  ;;  %2187 = vmatprep.subr.bf16.mxu0 %v3853_v25  ;;  %v3926_v24 = vld [vmem:[#allocation6 + $0xe8] ss:$16 sps:$4 sm:$0xff]   ;;  %v3931_v25 = vld [vmem:[#allocation6 + $0x8c4] ss:$16 sps:$4 sm:$0xff]  }
  0xba   :  { %2228 = vmatprep.subr.bf16.mxu1 %v3856_v26  ;;  %v3934_v26 = vld [vmem:[#allocation6 + $0xcc] ss:$16 sps:$4 sm:$0xff]  }
  0xbc   :  { %2188 = vmatpush1.bf16.msra.mxu0 %v3851_v27  ;;  %v144_v27 = vld [vmem:[#allocation3 + $0x48] sm:$0xff] }
  0xbd   :  { %2229 = vmatpush1.bf16.msra.mxu1 %v3854_v28  ;;  %2189 = vmatprep.subr.bf16.mxu0 %v3859_v29  ;;  %v4638_v28 = vpack.c.bf16 %v144_v27, %v144_v27  ;;  %v3929_v29 = vld [vmem:[#allocation6 + $0x8c0] ss:$16 sps:$4 sm:$0xff]   ;;  %v4018_v27 = vld [vmem:[#allocation6 + $0x10c] ss:$16 sps:$4 sm:$0xff]  }
  0xbe   :  { %2230 = vmatprep.subr.bf16.mxu1 %v3862_v30  ;;  %v3932_v30 = vld [vmem:[#allocation6 + $0xc8] ss:$16 sps:$4 sm:$0xff]  }
  0xc0   :  { %2190 = vmatpush1.bf16.msra.mxu0 %v3857_v31  ;;  %v3937_v31 = vld [vmem:[#allocation6 + $0x8a4] ss:$16 sps:$4 sm:$0xff]  }
  0xc1   :  { %2231 = vmatpush1.bf16.msra.mxu1 %v3860_v32  ;;  %2191 = vmatprep.subr.bf16.mxu0 %v3865_v33  ;;  %v3940_v32 = vld [vmem:[#allocation6 + $0xac] ss:$16 sps:$4 sm:$0xff]   ;;  %v3935_v33 = vld [vmem:[#allocation6 + $0x8a0] ss:$16 sps:$4 sm:$0xff]  }
  0xc2   :  { %2232 = vmatprep.subr.bf16.mxu1 %v3868_v34  ;;  %v3938_v34 = vld [vmem:[#allocation6 + $0xa8] ss:$16 sps:$4 sm:$0xff]  }
  0xc4   :  { %2192 = vmatpush1.bf16.msra.mxu0 %v3863_v36  ;;  %v3946_v36 = vld [vmem:[#allocation6 + $0x8c] ss:$16 sps:$4 sm:$0xff]  }
  0xc5   :  { %2233 = vmatpush1.bf16.msra.mxu1 %v3866_v37  ;;  %2193 = vmatprep.subr.bf16.mxu0 %v3871_v40  ;;  %v3941_v37 = vld [vmem:[#allocation6 + $0x880] ss:$16 sps:$4 sm:$0xff]   ;;  %v3949_v40 = vld [vmem:[#allocation6 + $0x864] ss:$16 sps:$4 sm:$0xff]  }
  0xc6   :  { %2234 = vmatprep.subr.bf16.mxu1 %v3874_v42  ;;  %v3952_v42 = vld [vmem:[#allocation6 + $0x6c] ss:$16 sps:$4 sm:$0xff]  }
  0xc8   :  { %2194 = vmatpush1.bf16.msra.mxu0 %v3869_v43  ;;  %v3947_v43 = vld [vmem:[#allocation6 + $0x860] ss:$16 sps:$4 sm:$0xff]  }
  0xc9   :  { %2235 = vmatpush1.bf16.msra.mxu1 %v3872_v44  ;;  %2195 = vmatprep.subr.bf16.mxu0 %v3877_v45  ;;  %v3955_v44 = vld [vmem:[#allocation6 + $0x844] ss:$16 sps:$4 sm:$0xff]   ;;  %v3958_v45 = vld [vmem:[#allocation6 + $0x4c] ss:$16 sps:$4 sm:$0xff]  }
  0xca   :  { %2236 = vmatprep.subr.bf16.mxu1 %v3880_v46  ;;  %v3953_v46 = vld [vmem:[#allocation6 + $0x840] ss:$16 sps:$4 sm:$0xff]  }
  0xcc   :  { %2196 = vmatpush2.bf16.msra.mxu0 %v3875_v47  ;;  %v3956_v47 = vld [vmem:[#allocation6 + $0x48] ss:$16 sps:$4 sm:$0xff]  }
  0xcd   :  { %2237 = vmatpush2.bf16.msra.mxu1 %v3878_v48  ;;  %2197 = vmatprep.subr.bf16.mxu0 %v3883_v49  ;;  %v3961_v48 = vld [vmem:[#allocation6 + $0x824] ss:$16 sps:$4 sm:$0xff]   ;;  %v3964_v49 = vld [vmem:[#allocation6 + $0x2c] ss:$16 sps:$4 sm:$0xff]  }
  0xce   :  { %2238 = vmatprep.subr.bf16.mxu1 %v3886_v51  ;;  %v3959_v51 = vld [vmem:[#allocation6 + $0x820] ss:$16 sps:$4 sm:$0xff]  }
  0xd0   :  { %2198 = vmatpush2.bf16.msra.mxu0 %v3881_v52  ;;  %v3962_v52 = vld [vmem:[#allocation6 + $0x28] ss:$16 sps:$4 sm:$0xff]  }
  0xd1   :  { %2239 = vmatpush2.bf16.msra.mxu1 %v3884_v54  ;;  %2199 = vmatprep.subr.bf16.mxu0 %v3889_v55  ;;  %v3967_v54 = vld [vmem:[#allocation6 + $0x804] ss:$16 sps:$4 sm:$0xff]   ;;  %v3970_v55 = vld [vmem:[#allocation6 + $0xc] ss:$16 sps:$4 sm:$0xff]  }
  0xd2   :  { %2240 = vmatprep.subr.bf16.mxu1 %v3892_v56  ;;  %v3965_v56 = vld [vmem:[#allocation6 + $0x800] ss:$16 sps:$4 sm:$0xff]  }
  0xd4   :  { %2200 = vmatpush2.bf16.msra.mxu0 %v3887_v57  ;;  %v3968_v57 = vld [vmem:[#allocation6 + $0x8] ss:$16 sps:$4 sm:$0xff]  }
  0xd5   :  { %2241 = vmatpush2.bf16.msra.mxu1 %v3890_v58  ;;  %2201 = vmatprep.subr.bf16.mxu0 %v3895_v59  ;;  %v3973_v58 = vld [vmem:[#allocation6 + $0x9e4] ss:$16 sps:$4 sm:$0xff]   ;;  %v3976_v59 = vld [vmem:[#allocation6 + $0x1ec] ss:$16 sps:$4 sm:$0xff]  }
  0xd6   :  { %2242 = vmatprep.subr.bf16.mxu1 %v3898_v60  ;;  %v3971_v60 = vld [vmem:[#allocation6 + $0x9e0] ss:$16 sps:$4 sm:$0xff]  }
  0xd8   :  { %2202 = vmatpush2.bf16.msra.mxu0 %v3893_v61  ;;  %v3974_v61 = vld [vmem:[#allocation6 + $0x1e8] ss:$16 sps:$4 sm:$0xff]  }
  0xd9   :  { %2243 = vmatpush2.bf16.msra.mxu1 %v3896_v62  ;;  %2203 = vmatprep.subr.bf16.mxu0 %v3901_v63  ;;  %v3979_v62 = vld [vmem:[#allocation6 + $0x9c4] ss:$16 sps:$4 sm:$0xff]   ;;  %v3982_v63 = vld [vmem:[#allocation6 + $0x1cc] ss:$16 sps:$4 sm:$0xff]  }
  0xda   :  { %2244 = vmatprep.subr.bf16.mxu1 %v3904_v0  ;;  %v3977_v0 = vld [vmem:[#allocation6 + $0x9c0] ss:$16 sps:$4 sm:$0xff]  }
  0xdc   :  { %2204 = vmatpush2.bf16.msra.mxu0 %v3899_v1  ;;  %v3980_v1 = vld [vmem:[#allocation6 + $0x1c8] ss:$16 sps:$4 sm:$0xff]  }
  0xdd   :  { %2245 = vmatpush2.bf16.msra.mxu1 %v3902_v2  ;;  %2205 = vmatprep.subr.bf16.mxu0 %v3907_v3  ;;  %v3985_v2 = vld [vmem:[#allocation6 + $0x9a4] ss:$16 sps:$4 sm:$0xff]   ;;  %v3988_v3 = vld [vmem:[#allocation6 + $0x1ac] ss:$16 sps:$4 sm:$0xff]  }
  0xde   :  { %2246 = vmatprep.subr.bf16.mxu1 %v3910_v4  ;;  %v3983_v4 = vld [vmem:[#allocation6 + $0x9a0] ss:$16 sps:$4 sm:$0xff]  }
  0xe0   :  { %2206 = vmatpush2.bf16.msra.mxu0 %v3905_v5  ;;  %v3986_v5 = vld [vmem:[#allocation6 + $0x1a8] ss:$16 sps:$4 sm:$0xff]  }
  0xe1   :  { %2247 = vmatpush2.bf16.msra.mxu1 %v3908_v6  ;;  %2207 = vmatprep.subr.bf16.mxu0 %v3913_v7  ;;  %v3991_v6 = vld [vmem:[#allocation6 + $0x984] ss:$16 sps:$4 sm:$0xff]   ;;  %v3994_v7 = vld [vmem:[#allocation6 + $0x18c] ss:$16 sps:$4 sm:$0xff]  }
  0xe2   :  { %2248 = vmatprep.subr.bf16.mxu1 %v3916_v8  ;;  %v3989_v8 = vld [vmem:[#allocation6 + $0x980] ss:$16 sps:$4 sm:$0xff]  }
  0xe4   :  { %2208 = vmatpush2.bf16.msra.mxu0 %v3911_v11  ;;  %v3992_v11 = vld [vmem:[#allocation6 + $0x188] ss:$16 sps:$4 sm:$0xff]  }
  0xe5   :  { %2249 = vmatpush2.bf16.msra.mxu1 %v3914_v12  ;;  %2209 = vmatprep.subr.bf16.mxu0 %v3919_v13  ;;  %v3997_v12 = vld [vmem:[#allocation6 + $0x964] ss:$16 sps:$4 sm:$0xff]   ;;  %v4000_v13 = vld [vmem:[#allocation6 + $0x16c] ss:$16 sps:$4 sm:$0xff]  }
  0xe6   :  { %2250 = vmatprep.subr.bf16.mxu1 %v3922_v14  ;;  %v3995_v14 = vld [vmem:[#allocation6 + $0x960] ss:$16 sps:$4 sm:$0xff]  }
  0xe8   :  { %2210 = vmatpush2.bf16.msra.mxu0 %v3917_v15  ;;  %v3998_v15 = vld [vmem:[#allocation6 + $0x168] ss:$16 sps:$4 sm:$0xff]  }
  0xe9   :  { %2251 = vmatpush2.bf16.msra.mxu1 %v3920_v16  ;;  %2261 = vmatprep.subr.bf16.mxu0 %v3925_v19  ;;  %v4003_v16 = vld [vmem:[#allocation6 + $0x944] ss:$16 sps:$4 sm:$0xff]   ;;  %v4004_v19 = vld [vmem:[#allocation6 + $0x148] ss:$16 sps:$4 sm:$0xff]  }
  0xea   :  { %2302 = vmatprep.subr.bf16.mxu1 %v3928_v20  ;;  %v4009_v20 = vld [vmem:[#allocation6 + $0x924] ss:$16 sps:$4 sm:$0xff]  }
  0xeb   :  { %2212 = vmatmul.mubr.bf16.vlgmr.msra.gmra.mxu0 %v4632_v21 }
  0xec   :  { %2253 = vmatmul.mubr.bf16.vlgmr.msra.gmra.mxu1 %v4634_v22  ;;  %2262 = vmatpush1.bf16.msra.mxu0 %v3923_v23  ;;  %v4012_v23 = vld [vmem:[#allocation6 + $0x12c] ss:$16 sps:$4 sm:$0xff]  }
  0xed   :  { %2303 = vmatpush1.bf16.msra.mxu1 %v3926_v24  ;;  %2263 = vmatprep.subr.bf16.mxu0 %v3931_v25  ;;  %v4007_v24 = vld [vmem:[#allocation6 + $0x920] ss:$16 sps:$4 sm:$0xff]   ;;  %v4010_v25 = vld [vmem:[#allocation6 + $0x128] ss:$16 sps:$4 sm:$0xff]  }
  0xee   :  { %2304 = vmatprep.subr.bf16.mxu1 %v3934_v26  ;;  %2293 = vmatprep.mubr.bf16.mxu0 %v4638_v28  ;;  %v4015_v26 = vld [vmem:[#allocation6 + $0x904] ss:$16 sps:$4 sm:$0xff]  }
  0xef   :  { %2334 = vmatprep.mubr.bf16.mxu1 %v4614_v50  ;;  %v3950_v50 = vld [vmem:[#allocation6 + $0x68] ss:$16 sps:$4 sm:$0xff]  }
  0xf0   :  { %2264 = vmatpush1.bf16.msra.mxu0 %v3929_v29  ;;  %v4013_v29 = vld [vmem:[#allocation6 + $0x900] ss:$16 sps:$4 sm:$0xff]  }
  0xf1   :  { %2305 = vmatpush1.bf16.msra.mxu1 %v3932_v30  ;;  %2265 = vmatprep.subr.bf16.mxu0 %v3937_v31  ;;  %v4016_v30 = vld [vmem:[#allocation6 + $0x108] ss:$16 sps:$4 sm:$0xff]   ;;  %v143_v31 = vld [vmem:[#allocation3 + $0x40] sm:$0xff] }
  0xf2   :  { %2306 = vmatprep.subr.bf16.mxu1 %v3940_v32  ;;  %v4021_v32 = vld [vmem:[#allocation6 + $0x2ec] ss:$16 sps:$4 sm:$0xff]  }
  0xf4   :  { %2266 = vmatpush1.bf16.msra.mxu0 %v3935_v33  ;;  %v4024_v33 = vld [vmem:[#allocation6 + $0x4ec] ss:$16 sps:$4 sm:$0xff]  }
  0xf5   :  { %2307 = vmatpush1.bf16.msra.mxu1 %v3938_v34  ;;  %2267 = vmatprep.subr.bf16.mxu0 %v3943_v35  ;;  %v4642_v34 = vpack.c.bf16 %v143_v31, %v143_v31  ;;  %v4019_v35 = vld [vmem:[#allocation6 + $0x2e8] ss:$16 sps:$4 sm:$0xff]  }
  0xf6   :  { %2308 = vmatprep.subr.bf16.mxu1 %v3946_v36  ;;  %v4022_v36 = vld [vmem:[#allocation6 + $0x4e8] ss:$16 sps:$4 sm:$0xff]  }
  0xf8   :  { %2268 = vmatpush1.bf16.msra.mxu0 %v3941_v37  ;;  %v4027_v37 = vld [vmem:[#allocation6 + $0x2cc] ss:$16 sps:$4 sm:$0xff]  }
  0xf9   :  { %2309 = vmatpush1.bf16.msra.mxu1 %v3944_v39  ;;  %2269 = vmatprep.subr.bf16.mxu0 %v3949_v40  ;;  %v4030_v39 = vld [vmem:[#allocation6 + $0x4cc] ss:$16 sps:$4 sm:$0xff]   ;;  %v4025_v40 = vld [vmem:[#allocation6 + $0x2c8] ss:$16 sps:$4 sm:$0xff]  }
  0xfa   :  { %2310 = vmatprep.subr.bf16.mxu1 %v3952_v42  ;;  %v4028_v42 = vld [vmem:[#allocation6 + $0x4c8] ss:$16 sps:$4 sm:$0xff]  }
  0xfc   :  { %2270 = vmatpush1.bf16.msra.mxu0 %v3947_v43  ;;  %v4033_v43 = vld [vmem:[#allocation6 + $0x2ac] ss:$16 sps:$4 sm:$0xff]  }
  0xfd   :  { %2311 = vmatpush1.bf16.msra.mxu1 %v3950_v50  ;;  %2271 = vmatprep.subr.bf16.mxu0 %v3955_v44  ;;  %v4036_v50 = vld [vmem:[#allocation6 + $0x4ac] ss:$16 sps:$4 sm:$0xff]   ;;  %v4031_v44 = vld [vmem:[#allocation6 + $0x2a8] ss:$16 sps:$4 sm:$0xff]  }
  0xfe   :  { %2312 = vmatprep.subr.bf16.mxu1 %v3958_v45  ;;  %v4034_v45 = vld [vmem:[#allocation6 + $0x4a8] ss:$16 sps:$4 sm:$0xff]  }
 0x100   :  { %2272 = vmatpush1.bf16.msra.mxu0 %v3953_v46  ;;  %v4039_v46 = vld [vmem:[#allocation6 + $0x28c] ss:$16 sps:$4 sm:$0xff]  }
 0x101   :  { %2313 = vmatpush1.bf16.msra.mxu1 %v3956_v47  ;;  %2273 = vmatprep.subr.bf16.mxu0 %v3961_v48  ;;  %v4037_v47 = vld [vmem:[#allocation6 + $0x288] ss:$16 sps:$4 sm:$0xff]  }
 0x102   :  { %2314 = vmatprep.subr.bf16.mxu1 %v3964_v49  ;;  %v4040_v48 = vld [vmem:[#allocation6 + $0x488] ss:$16 sps:$4 sm:$0xff]   ;;  %v4045_v49 = vld [vmem:[#allocation6 + $0x26c] ss:$16 sps:$4 sm:$0xff]  }
 0x104   :  { %2274 = vmatpush1.bf16.msra.mxu0 %v3959_v51  ;;  %v4048_v51 = vld [vmem:[#allocation6 + $0x46c] ss:$16 sps:$4 sm:$0xff]  }
 0x105   :  { %2315 = vmatpush1.bf16.msra.mxu1 %v3962_v52  ;;  %2275 = vmatprep.subr.bf16.mxu0 %v3967_v54  ;;  %v4043_v52 = vld [vmem:[#allocation6 + $0x268] ss:$16 sps:$4 sm:$0xff]   ;;  %v4054_v54 = vld [vmem:[#allocation6 + $0x44c] ss:$16 sps:$4 sm:$0xff]  }
 0x106   :  { %2316 = vmatprep.subr.bf16.mxu1 %v3970_v55  ;;  %v4049_v55 = vld [vmem:[#allocation6 + $0x248] ss:$16 sps:$4 sm:$0xff]  }
 0x108   :  { %2276 = vmatpush1.bf16.msra.mxu0 %v3965_v56  ;;  %v4052_v56 = vld [vmem:[#allocation6 + $0x448] ss:$16 sps:$4 sm:$0xff]  }
 0x109   :  { %2317 = vmatpush1.bf16.msra.mxu1 %v3968_v57  ;;  %2277 = vmatprep.subr.bf16.mxu0 %v3973_v58  ;;  %v4057_v57 = vld [vmem:[#allocation6 + $0x22c] ss:$16 sps:$4 sm:$0xff]  }
 0x10a   :  { %2318 = vmatprep.subr.bf16.mxu1 %v3976_v59  ;;  %v4060_v58 = vld [vmem:[#allocation6 + $0x42c] ss:$16 sps:$4 sm:$0xff]   ;;  %v4055_v59 = vld [vmem:[#allocation6 + $0x228] ss:$16 sps:$4 sm:$0xff]  }
 0x10c   :  { %2278 = vmatpush2.bf16.msra.mxu0 %v3971_v60  ;;  %v4058_v60 = vld [vmem:[#allocation6 + $0x428] ss:$16 sps:$4 sm:$0xff]  }
 0x10d   :  { %2319 = vmatpush2.bf16.msra.mxu1 %v3974_v61  ;;  %2279 = vmatprep.subr.bf16.mxu0 %v3979_v62  ;;  %v4063_v61 = vld [vmem:[#allocation6 + $0x20c] ss:$16 sps:$4 sm:$0xff]  }
 0x10e   :  { %2320 = vmatprep.subr.bf16.mxu1 %v3982_v63  ;;  %v4066_v62 = vld [vmem:[#allocation6 + $0x40c] ss:$16 sps:$4 sm:$0xff]   ;;  %v4061_v63 = vld [vmem:[#allocation6 + $0x208] ss:$16 sps:$4 sm:$0xff]  }
 0x110   :  { %2280 = vmatpush2.bf16.msra.mxu0 %v3977_v0  ;;  %v4064_v0 = vld [vmem:[#allocation6 + $0x408] ss:$16 sps:$4 sm:$0xff]  }
 0x111   :  { %2321 = vmatpush2.bf16.msra.mxu1 %v3980_v1  ;;  %2281 = vmatprep.subr.bf16.mxu0 %v3985_v2  ;;  %v4069_v1 = vld [vmem:[#allocation6 + $0x3ec] ss:$16 sps:$4 sm:$0xff]  }
 0x112   :  { %2322 = vmatprep.subr.bf16.mxu1 %v3988_v3  ;;  %v4072_v2 = vld [vmem:[#allocation6 + $0x5ec] ss:$16 sps:$4 sm:$0xff]   ;;  %v4067_v3 = vld [vmem:[#allocation6 + $0x3e8] ss:$16 sps:$4 sm:$0xff]  }
 0x114   :  { %2282 = vmatpush2.bf16.msra.mxu0 %v3983_v4  ;;  %v4070_v4 = vld [vmem:[#allocation6 + $0x5e8] ss:$16 sps:$4 sm:$0xff]  }
 0x115   :  { %2323 = vmatpush2.bf16.msra.mxu1 %v3986_v5  ;;  %2283 = vmatprep.subr.bf16.mxu0 %v3991_v6  ;;  %v4075_v5 = vld [vmem:[#allocation6 + $0x3cc] ss:$16 sps:$4 sm:$0xff]  }
 0x116   :  { %2324 = vmatprep.subr.bf16.mxu1 %v3994_v7  ;;  %v4078_v6 = vld [vmem:[#allocation6 + $0x5cc] ss:$16 sps:$4 sm:$0xff]   ;;  %v4073_v7 = vld [vmem:[#allocation6 + $0x3c8] ss:$16 sps:$4 sm:$0xff]  }
 0x118   :  { %2284 = vmatpush2.bf16.msra.mxu0 %v3989_v8  ;;  %v4076_v8 = vld [vmem:[#allocation6 + $0x5c8] ss:$16 sps:$4 sm:$0xff]  }
 0x119   :  { %2325 = vmatpush2.bf16.msra.mxu1 %v3992_v11  ;;  %2285 = vmatprep.subr.bf16.mxu0 %v3997_v12  ;;  %v4081_v11 = vld [vmem:[#allocation6 + $0x3ac] ss:$16 sps:$4 sm:$0xff]  }
 0x11a   :  { %2326 = vmatprep.subr.bf16.mxu1 %v4000_v13  ;;  %v4084_v12 = vld [vmem:[#allocation6 + $0x5ac] ss:$16 sps:$4 sm:$0xff]   ;;  %v4079_v13 = vld [vmem:[#allocation6 + $0x3a8] ss:$16 sps:$4 sm:$0xff]  }
 0x11c   :  { %2286 = vmatpush2.bf16.msra.mxu0 %v3995_v14  ;;  %v4082_v14 = vld [vmem:[#allocation6 + $0x5a8] ss:$16 sps:$4 sm:$0xff]  }
 0x11d   :  { %2327 = vmatpush2.bf16.msra.mxu1 %v3998_v15  ;;  %2287 = vmatprep.subr.bf16.mxu0 %v4003_v16  ;;  %v4087_v15 = vld [vmem:[#allocation6 + $0x38c] ss:$16 sps:$4 sm:$0xff]  }
 0x11e   :  { %2328 = vmatprep.subr.bf16.mxu1 %v4006_v17  ;;  %v4090_v16 = vld [vmem:[#allocation6 + $0x58c] ss:$16 sps:$4 sm:$0xff]   ;;  %v4085_v17 = vld [vmem:[#allocation6 + $0x388] ss:$16 sps:$4 sm:$0xff]  }
 0x120   :  { %2288 = vmatpush2.bf16.msra.mxu0 %v4001_v18  ;;  %v4088_v18 = vld [vmem:[#allocation6 + $0x588] ss:$16 sps:$4 sm:$0xff]  }
 0x121   :  { %2329 = vmatpush2.bf16.msra.mxu1 %v4004_v19  ;;  %2289 = vmatprep.subr.bf16.mxu0 %v4009_v20  ;;  %v4093_v19 = vld [vmem:[#allocation6 + $0x36c] ss:$16 sps:$4 sm:$0xff]  }
 0x122   :  { %2330 = vmatprep.subr.bf16.mxu1 %v4012_v23  ;;  %v4096_v20 = vld [vmem:[#allocation6 + $0x56c] ss:$16 sps:$4 sm:$0xff]   ;;  %v4091_v23 = vld [vmem:[#allocation6 + $0x368] ss:$16 sps:$4 sm:$0xff]  }
 0x124   :  { %2290 = vmatpush2.bf16.msra.mxu0 %v4007_v24  ;;  %v4094_v24 = vld [vmem:[#allocation6 + $0x568] ss:$16 sps:$4 sm:$0xff]  }
 0x125   :  { %2331 = vmatpush2.bf16.msra.mxu1 %v4010_v25  ;;  %2291 = vmatprep.subr.bf16.mxu0 %v4015_v26  ;;  %v477_v25 = vlaneseq  ;;  %v4099_v26 = vld [vmem:[#allocation6 + $0x34c] ss:$16 sps:$4 sm:$0xff]  }
 0x126   :  { %2332 = vmatprep.subr.bf16.mxu1 %v4018_v27  ;;  %v4102_v27 = vld [vmem:[#allocation6 + $0x54c] ss:$16 sps:$4 sm:$0xff]  }
 0x127   :  { %v4648_v31 = vshrl.u32 %v477_v25, 7  ;;  %v4160_v25 = vld [vmem:[#allocation6 + $0x808] ss:$16 sps:$4 sm:$0xff]  }
 0x128   :  { %2292 = vmatpush2.bf16.msra.mxu0 %v4013_v29  ;;  %v4097_v29 = vld [vmem:[#allocation6 + $0x348] ss:$16 sps:$4 sm:$0xff]  }
 0x129   :  { %2333 = vmatpush2.bf16.msra.mxu1 %v4016_v30  ;;  %2343 = vmatprep.subr.bf16.mxu0 %v4021_v32  ;;  %v4100_v30 = vld [vmem:[#allocation6 + $0x548] ss:$16 sps:$4 sm:$0xff]   ;;  %v4105_v32 = vld [vmem:[#allocation6 + $0x32c] ss:$16 sps:$4 sm:$0xff]  }
 0x12a   :  { %2384 = vmatprep.subr.bf16.mxu1 %v4024_v33  ;;  %v4108_v33 = vld [vmem:[#allocation6 + $0x52c] ss:$16 sps:$4 sm:$0xff]  }
 0x12b   :  { %2294 = vmatmul.mubr.bf16.vlgmr.msra.gmra.mxu0 %v4642_v34 }
 0x12c   :  { %2335 = vmatmul.mubr.bf16.vlgmr.msra.gmra.mxu1 %v4620_v9  ;;  %2344 = vmatpush1.bf16.msra.mxu0 %v4019_v35  ;;  %v4042_v9 = vld [vmem:[#allocation6 + $0x48c] ss:$16 sps:$4 sm:$0xff]   ;;  %v4103_v35 = vld [vmem:[#allocation6 + $0x328] ss:$16 sps:$4 sm:$0xff]  }
 0x12d   :  { %2385 = vmatpush1.bf16.msra.mxu1 %v4022_v36  ;;  %2345 = vmatprep.subr.bf16.mxu0 %v4027_v37  ;;  %v4106_v36 = vld [vmem:[#allocation6 + $0x528] ss:$16 sps:$4 sm:$0xff]   ;;  %v4111_v37 = vld [vmem:[#allocation6 + $0x30c] ss:$16 sps:$4 sm:$0xff]  }
 0x12e   :  { %2386 = vmatprep.subr.bf16.mxu1 %v4030_v39  ;;  %2375 = vmatprep.mubr.bf16.mxu0 %v4616_v53  ;;  %v4046_v53 = vld [vmem:[#allocation6 + $0x468] ss:$16 sps:$4 sm:$0xff]   ;;  %v4114_v39 = vld [vmem:[#allocation6 + $0x50c] ss:$16 sps:$4 sm:$0xff]  }
 0x12f   :  { %2416 = vmatprep.mubr.bf16.mxu1 %v4626_v38  ;;  %v4051_v38 = vld [vmem:[#allocation6 + $0x24c] ss:$16 sps:$4 sm:$0xff]  }
 0x130   :  { %2346 = vmatpush1.bf16.msra.mxu0 %v4025_v40  ;;  %v4651_v40 = vsub.s32 0, %v4648_v31 }
 0x131   :  { %2387 = vmatpush1.bf16.msra.mxu1 %v4028_v42  ;;  %2347 = vmatprep.subr.bf16.mxu0 %v4033_v43  ;;  %v483_v42 = vsub.s32 1, %v4648_v31  ;;  %v4109_v43 = vld [vmem:[#allocation6 + $0x308] ss:$16 sps:$4 sm:$0xff]  }
 0x132   :  { %2388 = vmatprep.subr.bf16.mxu1 %v4036_v50  ;;  %v4112_v50 = vld [vmem:[#allocation6 + $0x508] ss:$16 sps:$4 sm:$0xff]  }
 0x134   :  { %2348 = vmatpush1.bf16.msra.mxu0 %v4031_v44  ;;  %v4654_v44 = vld [vmem:[#allocation8] sm:$0xf] }
 0x135   :  { %2389 = vmatpush1.bf16.msra.mxu1 %v4034_v45  ;;  %2349 = vmatprep.subr.bf16.mxu0 %v4039_v46  ;;  %v4117_v45 = vld [vmem:[#allocation6 + $0x6ec] ss:$16 sps:$4 sm:$0xff]  }
 0x136   :  { %2390 = vmatprep.subr.bf16.mxu1 %v4042_v9  ;;  %v4120_v46 = vld [vmem:[#allocation6 + $0x8ec] ss:$16 sps:$4 sm:$0xff]   ;;  %v4115_v9 = vld [vmem:[#allocation6 + $0x6e8] ss:$16 sps:$4 sm:$0xff]  }
 0x138   :  { %2350 = vmatpush1.bf16.msra.mxu0 %v4037_v47  ;;  %v4118_v47 = vld [vmem:[#allocation6 + $0x8e8] ss:$16 sps:$4 sm:$0xff]  }
 0x139   :  { %2391 = vmatpush1.bf16.msra.mxu1 %v4040_v48  ;;  %2351 = vmatprep.subr.bf16.mxu0 %v4045_v49  ;;  %v4123_v48 = vld [vmem:[#allocation6 + $0x6cc] ss:$16 sps:$4 sm:$0xff]  }
 0x13a   :  { %2392 = vmatprep.subr.bf16.mxu1 %v4048_v51  ;;  %v4126_v49 = vld [vmem:[#allocation6 + $0x8cc] ss:$16 sps:$4 sm:$0xff]   ;;  %v480_v51 = vrot.slane %v4654_v44, %v4651_v40 }
 0x13c   :  { %2352 = vmatpush1.bf16.msra.mxu0 %v4043_v52  ;;  %v484_v52 = vrot.slane %v4654_v44, %v483_v42 }
 0x13d   :  { %2393 = vmatpush1.bf16.msra.mxu1 %v4046_v53  ;;  %2353 = vmatprep.subr.bf16.mxu0 %v4051_v38 }
 0x13e   :  { %2394 = vmatprep.subr.bf16.mxu1 %v4054_v54 }
 0x140   :  { %2354 = vmatpush1.bf16.msra.mxu0 %v4049_v55  ;;  %v4121_v55 = vld [vmem:[#allocation6 + $0x6c8] ss:$16 sps:$4 sm:$0xff]  }
 0x141   :  { %2395 = vmatpush1.bf16.msra.mxu1 %v4052_v56  ;;  %2355 = vmatprep.subr.bf16.mxu0 %v4057_v57  ;;  %v4124_v56 = vld [vmem:[#allocation6 + $0x8c8] ss:$16 sps:$4 sm:$0xff]  }
 0x142   :  { %2396 = vmatprep.subr.bf16.mxu1 %v4060_v58 }
 0x144   :  { %2356 = vmatpush1.bf16.msra.mxu0 %v4055_v59  ;;  %v4129_v59 = vld [vmem:[#allocation6 + $0x6ac] ss:$16 sps:$4 sm:$0xff]  }
 0x145   :  { %2397 = vmatpush1.bf16.msra.mxu1 %v4058_v60  ;;  %2357 = vmatprep.subr.bf16.mxu0 %v4063_v61  ;;  %v4132_v60 = vld [vmem:[#allocation6 + $0x8ac] ss:$16 sps:$4 sm:$0xff]  }
 0x146   :  { %2398 = vmatprep.subr.bf16.mxu1 %v4066_v62 }
 0x148   :  { %2358 = vmatpush1.bf16.msra.mxu0 %v4061_v63 }
 0x149   :  { %2399 = vmatpush1.bf16.msra.mxu1 %v4064_v0  ;;  %2359 = vmatprep.subr.bf16.mxu0 %v4069_v1  ;;  %v4127_v0 = vld [vmem:[#allocation6 + $0x6a8] ss:$16 sps:$4 sm:$0xff]  }
 0x14a   :  { %2400 = vmatprep.subr.bf16.mxu1 %v4072_v2  ;;  %v4130_v1 = vld [vmem:[#allocation6 + $0x8a8] ss:$16 sps:$4 sm:$0xff]  }
 0x14c   :  { %2360 = vmatpush2.bf16.msra.mxu0 %v4067_v3 }
 0x14d   :  { %2401 = vmatpush2.bf16.msra.mxu1 %v4070_v4  ;;  %2361 = vmatprep.subr.bf16.mxu0 %v4075_v5  ;;  %v4135_v4 = vld [vmem:[#allocation6 + $0x68c] ss:$16 sps:$4 sm:$0xff]  }
 0x14e   :  { %2402 = vmatprep.subr.bf16.mxu1 %v4078_v6  ;;  %v4138_v5 = vld [vmem:[#allocation6 + $0x88c] ss:$16 sps:$4 sm:$0xff]   ;;  %v4133_v6 = vld [vmem:[#allocation6 + $0x688] ss:$16 sps:$4 sm:$0xff]  }
 0x150   :  { %2362 = vmatpush2.bf16.msra.mxu0 %v4073_v7  ;;  %v4144_v7 = vld [vmem:[#allocation6 + $0x86c] ss:$16 sps:$4 sm:$0xff]  }
 0x151   :  { %2403 = vmatpush2.bf16.msra.mxu1 %v4076_v8  ;;  %2363 = vmatprep.subr.bf16.mxu0 %v4081_v11  ;;  %v4139_v8 = vld [vmem:[#allocation6 + $0x668] ss:$16 sps:$4 sm:$0xff]  }
 0x152   :  { %2404 = vmatprep.subr.bf16.mxu1 %v4084_v12  ;;  %v4142_v11 = vld [vmem:[#allocation6 + $0x868] ss:$16 sps:$4 sm:$0xff]   ;;  %v4147_v12 = vld [vmem:[#allocation6 + $0x64c] ss:$16 sps:$4 sm:$0xff]  }
 0x154   :  { %2364 = vmatpush2.bf16.msra.mxu0 %v4079_v13  ;;  %v4150_v13 = vld [vmem:[#allocation6 + $0x84c] ss:$16 sps:$4 sm:$0xff]  }
 0x155   :  { %2405 = vmatpush2.bf16.msra.mxu1 %v4082_v14  ;;  %2365 = vmatprep.subr.bf16.mxu0 %v4087_v15  ;;  %v4145_v14 = vld [vmem:[#allocation6 + $0x648] ss:$16 sps:$4 sm:$0xff]  }
 0x156   :  { %2406 = vmatprep.subr.bf16.mxu1 %v4090_v16  ;;  %v4148_v15 = vld [vmem:[#allocation6 + $0x848] ss:$16 sps:$4 sm:$0xff]   ;;  %v4153_v16 = vld [vmem:[#allocation6 + $0x62c] ss:$16 sps:$4 sm:$0xff]  }
 0x158   :  { %2366 = vmatpush2.bf16.msra.mxu0 %v4085_v17  ;;  %v4156_v17 = vld [vmem:[#allocation6 + $0x82c] ss:$16 sps:$4 sm:$0xff]  }
 0x159   :  { %2407 = vmatpush2.bf16.msra.mxu1 %v4088_v18  ;;  %2367 = vmatprep.subr.bf16.mxu0 %v4093_v19  ;;  %v4151_v18 = vld [vmem:[#allocation6 + $0x628] ss:$16 sps:$4 sm:$0xff]  }
 0x15a   :  { %2408 = vmatprep.subr.bf16.mxu1 %v4096_v20  ;;  %v4154_v19 = vld [vmem:[#allocation6 + $0x828] ss:$16 sps:$4 sm:$0xff]   ;;  %v4159_v20 = vld [vmem:[#allocation6 + $0x60c] ss:$16 sps:$4 sm:$0xff]  }
 0x15c   :  { %2368 = vmatpush2.bf16.msra.mxu0 %v4091_v23  ;;  %v4162_v23 = vld [vmem:[#allocation6 + $0x80c] ss:$16 sps:$4 sm:$0xff]  }
 0x15d   :  { %2409 = vmatpush2.bf16.msra.mxu1 %v4094_v24  ;;  %2369 = vmatprep.subr.bf16.mxu0 %v4099_v26  ;;  %v4157_v24 = vld [vmem:[#allocation6 + $0x608] ss:$16 sps:$4 sm:$0xff]   ;;  %v4165_v26 = vld [vmem:[#allocation6 + $0x7ec] ss:$16 sps:$4 sm:$0xff]  }
 0x15e   :  { %2410 = vmatprep.subr.bf16.mxu1 %v4102_v27  ;;  %v4168_v27 = vld [vmem:[#allocation6 + $0x9ec] ss:$16 sps:$4 sm:$0xff]  }
 0x160   :  { %2370 = vmatpush2.bf16.msra.mxu0 %v4097_v29  ;;  %v4163_v29 = vld [vmem:[#allocation6 + $0x7e8] ss:$16 sps:$4 sm:$0xff]  }
 0x161   :  { %2411 = vmatpush2.bf16.msra.mxu1 %v4100_v30  ;;  %2371 = vmatprep.subr.bf16.mxu0 %v4105_v32  ;;  %v4166_v30 = vld [vmem:[#allocation6 + $0x9e8] ss:$16 sps:$4 sm:$0xff]   ;;  %v4171_v32 = vld [vmem:[#allocation6 + $0x7cc] ss:$16 sps:$4 sm:$0xff]  }
 0x162   :  { %2412 = vmatprep.subr.bf16.mxu1 %v4108_v33  ;;  %v4174_v33 = vld [vmem:[#allocation6 + $0x9cc] ss:$16 sps:$4 sm:$0xff]  }
 0x164   :  { %2372 = vmatpush2.bf16.msra.mxu0 %v4103_v35  ;;  %v4169_v35 = vld [vmem:[#allocation6 + $0x7c8] ss:$16 sps:$4 sm:$0xff]  }
 0x165   :  { %2413 = vmatpush2.bf16.msra.mxu1 %v4106_v36  ;;  %2373 = vmatprep.subr.bf16.mxu0 %v4111_v37  ;;  %v4172_v36 = vld [vmem:[#allocation6 + $0x9c8] ss:$16 sps:$4 sm:$0xff]   ;;  %v4177_v37 = vld [vmem:[#allocation6 + $0x7ac] ss:$16 sps:$4 sm:$0xff]  }
 0x166   :  { %2414 = vmatprep.subr.bf16.mxu1 %v4114_v39  ;;  %v4180_v39 = vld [vmem:[#allocation6 + $0x9ac] ss:$16 sps:$4 sm:$0xff]  }
 0x168   :  { %2374 = vmatpush2.bf16.msra.mxu0 %v4109_v43  ;;  %v4175_v43 = vld [vmem:[#allocation6 + $0x7a8] ss:$16 sps:$4 sm:$0xff]  }
 0x169   :  { %2415 = vmatpush2.bf16.msra.mxu1 %v4112_v50  ;;  %2425 = vmatprep.subr.bf16.mxu0 %v4117_v45  ;;  %v4178_v50 = vld [vmem:[#allocation6 + $0x9a8] ss:$16 sps:$4 sm:$0xff]   ;;  %v4183_v45 = vld [vmem:[#allocation6 + $0x78c] ss:$16 sps:$4 sm:$0xff]  }
 0x16a   :  { %2466 = vmatprep.subr.bf16.mxu1 %v4120_v46  ;;  %v4186_v46 = vld [vmem:[#allocation6 + $0x98c] ss:$16 sps:$4 sm:$0xff]  }
 0x16b   :  { %v2131_v53 = vpop.f32.mrf.mxu0  ;;  %2376 = vmatmul.mubr.bf16.vlgmr.msra.gmra.mxu0 %v4622_v10 }
 0x16c   :  { %v2172_v38 = vpop.f32.mrf.mxu1  ;;  %2417 = vmatmul.mubr.bf16.vlgmr.msra.gmra.mxu1 %v4632_v21  ;;  %v2132_v54 = vadd.f32 %v2131_v53, %v480_v51  ;;  %2426 = vmatpush1.bf16.msra.mxu0 %v4115_v9  ;;  %v4181_v9 = vld [vmem:[#allocation6 + $0x788] ss:$16 sps:$4 sm:$0xff]   ;;  %v4195_v53 = vld [vmem:[#allocation6 + $0x74c] ss:$16 sps:$4 sm:$0xff]  }
 0x16d   :  { %2467 = vmatpush1.bf16.msra.mxu1 %v4118_v47  ;;  %v2133_v57 = vpop.f32.mrf.mxu0  ;;  %2427 = vmatprep.subr.bf16.mxu0 %v4123_v48  ;;  %v4184_v47 = vld [vmem:[#allocation6 + $0x988] ss:$16 sps:$4 sm:$0xff]   ;;  %v4189_v48 = vld [vmem:[#allocation6 + $0x76c] ss:$16 sps:$4 sm:$0xff]  }
 0x16e   :  { %v2174_v58 = vpop.f32.mrf.mxu1  ;;  %2468 = vmatprep.subr.bf16.mxu1 %v4126_v49  ;;  %v4663_v61 = vadd.f32 %v2172_v38, %v2132_v54  ;;  %v2134_v62 = vadd.f32 %v2133_v57, %v484_v52  ;;  %2457 = vmatprep.mubr.bf16.mxu0 %v4628_v41  ;;  %v4136_v41 = vld [vmem:[#allocation6 + $0x888] ss:$16 sps:$4 sm:$0xff]   ;;  %v4192_v49 = vld [vmem:[#allocation6 + $0x96c] ss:$16 sps:$4 sm:$0xff]  }
 0x16f   :  { %2498 = vmatprep.mubr.bf16.mxu1 %v4638_v28  ;;  %v2135_v10 = vpop.f32.mrf.mxu0  ;;  %v4141_v28 = vld [vmem:[#allocation6 + $0x66c] ss:$16 sps:$4 sm:$0xff]   ;;  %v4187_v51 = vld [vmem:[#allocation6 + $0x768] ss:$16 sps:$4 sm:$0xff]  }
 0x170   :  { %v2176_v21 = vpop.f32.mrf.mxu1  ;;  %v4667_v63 = vadd.f32 %v2174_v58, %v2134_v62  ;;  %2428 = vmatpush1.bf16.msra.mxu0 %v4121_v55  ;;  %v4190_v52 = vld [vmem:[#allocation6 + $0x968] ss:$16 sps:$4 sm:$0xff]   ;;  %v4198_v38 = vld [vmem:[#allocation6 + $0x94c] ss:$16 sps:$4 sm:$0xff]  }
 0x171   :  { %2469 = vmatpush1.bf16.msra.mxu1 %v4124_v56  ;;  %v2136_v2 = vpop.f32.mrf.mxu0  ;;  %2429 = vmatprep.subr.bf16.mxu0 %v4129_v59  ;;  %v4193_v54 = vld [vmem:[#allocation6 + $0x748] ss:$16 sps:$4 sm:$0xff]   ;;  %v4201_v56 = vld [vmem:[#allocation6 + $0x72c] ss:$16 sps:$4 sm:$0xff]  }
 0x172   :  { %v2177_v3 = vpop.f32.mrf.mxu1  ;;  %2470 = vmatprep.subr.bf16.mxu1 %v4132_v60  ;;  %v4196_v55 = vld [vmem:[#allocation6 + $0x948] ss:$16 sps:$4 sm:$0xff]   ;;  %v4204_v57 = vld [vmem:[#allocation6 + $0x92c] ss:$16 sps:$4 sm:$0xff]  }
 0x173   :  { %v4199_v58 = vld [vmem:[#allocation6 + $0x728] ss:$16 sps:$4 sm:$0xff]   ;;  %v4207_v60 = vld [vmem:[#allocation6 + $0x70c] ss:$16 sps:$4 sm:$0xff]  }
 0x174   :  { %2430 = vmatpush1.bf16.msra.mxu0 %v4127_v0  ;;  %v4202_v59 = vld [vmem:[#allocation6 + $0x928] ss:$16 sps:$4 sm:$0xff]   ;;  %v4210_v62 = vld [vmem:[#allocation6 + $0x90c] ss:$16 sps:$4 sm:$0xff]  }
 0x175   :  { %2471 = vmatpush1.bf16.msra.mxu1 %v4130_v1  ;;  %2431 = vmatprep.subr.bf16.mxu0 %v4135_v4  ;;  %v4205_v10 = vld [vmem:[#allocation6 + $0x708] ss:$16 sps:$4 sm:$0xff]   ;;  %v4211_v1 = vld [vmem:[#allocation9 + $0x70] ss:$8 sps:$4 sm:$0xff]  }
 0x176   :  { %2472 = vmatprep.subr.bf16.mxu1 %v4138_v5  ;;  %v4208_v21 = vld [vmem:[#allocation6 + $0x908] ss:$16 sps:$4 sm:$0xff]  }
 0x177   :  { %v4213_v0 = vld [vmem:[#allocation9 + $0x74] ss:$8 sps:$4 sm:$0xff]   ;;  %v4216_v2 = vld [vmem:[#allocation9 + $0x64] ss:$8 sps:$4 sm:$0xff]  }
 0x178   :  { %2432 = vmatpush1.bf16.msra.mxu0 %v4133_v6  ;;  %v4214_v6 = vld [vmem:[#allocation9 + $0x60] ss:$8 sps:$4 sm:$0xff]  }
 0x179   :  { %2473 = vmatpush1.bf16.msra.mxu1 %v4136_v41  ;;  %2433 = vmatprep.subr.bf16.mxu0 %v4141_v28 }
 0x17a   :  { %2474 = vmatprep.subr.bf16.mxu1 %v4144_v7  ;;  %v4219_v7 = vld [vmem:[#allocation9 + $0x54] ss:$8 sps:$4 sm:$0xff]  }
 0x17c   :  { %2434 = vmatpush1.bf16.msra.mxu0 %v4139_v8 }
 0x17d   :  { %2475 = vmatpush1.bf16.msra.mxu1 %v4142_v11  ;;  %2435 = vmatprep.subr.bf16.mxu0 %v4147_v12 }
 0x17e   :  { %2476 = vmatprep.subr.bf16.mxu1 %v4150_v13  ;;  %v4217_v13 = vld [vmem:[#allocation9 + $0x50] ss:$8 sps:$4 sm:$0xff]  }
 0x180   :  { %2436 = vmatpush1.bf16.msra.mxu0 %v4145_v14 }
 0x181   :  { %2477 = vmatpush1.bf16.msra.mxu1 %v4148_v15  ;;  %2437 = vmatprep.subr.bf16.mxu0 %v4153_v16  ;;  %v4259_v15 = vld [vmem:[#allocation9 + $0x170] ss:$8 sps:$4 sm:$0xff]   ;;  %v4264_v16 = vld [vmem:[#allocation9 + $0x164] ss:$8 sps:$4 sm:$0xff]  }
 0x182   :  { %2478 = vmatprep.subr.bf16.mxu1 %v4156_v17  ;;  %v4220_v17 = vld [vmem:[#allocation9 + $0x40] ss:$8 sps:$4 sm:$0xff]  }
 0x184   :  { %2438 = vmatpush1.bf16.msra.mxu0 %v4151_v18  ;;  %v4262_v18 = vld [vmem:[#allocation9 + $0x160] ss:$8 sps:$4 sm:$0xff]  }
 0x185   :  { %2479 = vmatpush1.bf16.msra.mxu1 %v4154_v19  ;;  %2439 = vmatprep.subr.bf16.mxu0 %v4159_v20  ;;  %v4225_v19 = vld [vmem:[#allocation9 + $0x34] ss:$8 sps:$4 sm:$0xff]  }
 0x186   :  { %2480 = vmatprep.subr.bf16.mxu1 %v4162_v23  ;;  %v4267_v20 = vld [vmem:[#allocation9 + $0x154] ss:$8 sps:$4 sm:$0xff]   ;;  %v4223_v23 = vld [vmem:[#allocation9 + $0x30] ss:$8 sps:$4 sm:$0xff]  }
 0x188   :  { %2440 = vmatpush1.bf16.msra.mxu0 %v4157_v24  ;;  %v4265_v24 = vld [vmem:[#allocation9 + $0x150] ss:$8 sps:$4 sm:$0xff]  }
 0x189   :  { %2481 = vmatpush1.bf16.msra.mxu1 %v4160_v25  ;;  %2441 = vmatprep.subr.bf16.mxu0 %v4165_v26  ;;  %v4228_v25 = vld [vmem:[#allocation9 + $0x24] ss:$8 sps:$4 sm:$0xff]  }
 0x18a   :  { %2482 = vmatprep.subr.bf16.mxu1 %v4168_v27  ;;  %v4270_v26 = vld [vmem:[#allocation9 + $0x144] ss:$8 sps:$4 sm:$0xff]   ;;  %v4226_v27 = vld [vmem:[#allocation9 + $0x20] ss:$8 sps:$4 sm:$0xff]  }
 0x18c   :  { %2442 = vmatpush2.bf16.msra.mxu0 %v4163_v29  ;;  %v4268_v29 = vld [vmem:[#allocation9 + $0x140] ss:$8 sps:$4 sm:$0xff]  }
 0x18d   :  { %2483 = vmatpush2.bf16.msra.mxu1 %v4166_v30  ;;  %2443 = vmatprep.subr.bf16.mxu0 %v4171_v32  ;;  %v4231_v30 = vld [vmem:[#allocation9 + $0x14] ss:$8 sps:$4 sm:$0xff]  }
 0x18e   :  { %2484 = vmatprep.subr.bf16.mxu1 %v4174_v33  ;;  %v4273_v32 = vld [vmem:[#allocation9 + $0x134] ss:$8 sps:$4 sm:$0xff]   ;;  %v4229_v33 = vld [vmem:[#allocation9 + $0x10] ss:$8 sps:$4 sm:$0xff]  }
 0x190   :  { %2444 = vmatpush2.bf16.msra.mxu0 %v4169_v35  ;;  %v4271_v35 = vld [vmem:[#allocation9 + $0x130] ss:$8 sps:$4 sm:$0xff]  }
 0x191   :  { %2485 = vmatpush2.bf16.msra.mxu1 %v4172_v36  ;;  %2445 = vmatprep.subr.bf16.mxu0 %v4177_v37  ;;  %v4234_v36 = vld [vmem:[#allocation9 + $0x4] ss:$8 sps:$4 sm:$0xff]  }
 0x192   :  { %2486 = vmatprep.subr.bf16.mxu1 %v4180_v39  ;;  %v4276_v37 = vld [vmem:[#allocation9 + $0x124] ss:$8 sps:$4 sm:$0xff]   ;;  %v4232_v39 = vld [vmem:[#allocation9] ss:$8 sps:$4 sm:$0xff]  }
 0x194   :  { %2446 = vmatpush2.bf16.msra.mxu0 %v4175_v43  ;;  %v4274_v43 = vld [vmem:[#allocation9 + $0x120] ss:$8 sps:$4 sm:$0xff]  }
 0x195   :  { %2487 = vmatpush2.bf16.msra.mxu1 %v4178_v50  ;;  %2447 = vmatprep.subr.bf16.mxu0 %v4183_v45  ;;  %v4237_v50 = vld [vmem:[#allocation9 + $0xf4] ss:$8 sps:$4 sm:$0xff]  }
 0x196   :  { %2488 = vmatprep.subr.bf16.mxu1 %v4186_v46  ;;  %v4279_v45 = vld [vmem:[#allocation9 + $0x114] ss:$8 sps:$4 sm:$0xff]   ;;  %v4235_v46 = vld [vmem:[#allocation9 + $0xf0] ss:$8 sps:$4 sm:$0xff]  }
 0x198   :  { %2448 = vmatpush2.bf16.msra.mxu0 %v4181_v9  ;;  %v4277_v9 = vld [vmem:[#allocation9 + $0x110] ss:$8 sps:$4 sm:$0xff]  }
 0x199   :  { %2489 = vmatpush2.bf16.msra.mxu1 %v4184_v47  ;;  %2449 = vmatprep.subr.bf16.mxu0 %v4189_v48  ;;  %v4240_v47 = vld [vmem:[#allocation9 + $0xe4] ss:$8 sps:$4 sm:$0xff]  }
 0x19a   :  { %2490 = vmatprep.subr.bf16.mxu1 %v4192_v49  ;;  %v4282_v48 = vld [vmem:[#allocation9 + $0x104] ss:$8 sps:$4 sm:$0xff]   ;;  %v4238_v49 = vld [vmem:[#allocation9 + $0xe0] ss:$8 sps:$4 sm:$0xff]  }
 0x19c   :  { %2450 = vmatpush2.bf16.msra.mxu0 %v4187_v51  ;;  %v4280_v51 = vld [vmem:[#allocation9 + $0x100] ss:$8 sps:$4 sm:$0xff]  }
 0x19d   :  { %2491 = vmatpush2.bf16.msra.mxu1 %v4190_v52  ;;  %2451 = vmatprep.subr.bf16.mxu0 %v4195_v53  ;;  %v4243_v52 = vld [vmem:[#allocation9 + $0xd4] ss:$8 sps:$4 sm:$0xff]  }
 0x19e   :  { %2492 = vmatprep.subr.bf16.mxu1 %v4198_v38  ;;  %v4285_v53 = vld [vmem:[#allocation9 + $0x1f4] ss:$8 sps:$4 sm:$0xff]   ;;  %v4241_v38 = vld [vmem:[#allocation9 + $0xd0] ss:$8 sps:$4 sm:$0xff]  }
 0x1a0   :  { %2452 = vmatpush2.bf16.msra.mxu0 %v4193_v54  ;;  %v4283_v54 = vld [vmem:[#allocation9 + $0x1f0] ss:$8 sps:$4 sm:$0xff]  }
 0x1a1   :  { %2493 = vmatpush2.bf16.msra.mxu1 %v4196_v55  ;;  %2453 = vmatprep.subr.bf16.mxu0 %v4201_v56  ;;  %v4246_v55 = vld [vmem:[#allocation9 + $0xc4] ss:$8 sps:$4 sm:$0xff]  }
 0x1a2   :  { %2494 = vmatprep.subr.bf16.mxu1 %v4204_v57  ;;  %v4288_v56 = vld [vmem:[#allocation9 + $0x1e4] ss:$8 sps:$4 sm:$0xff]   ;;  %v4244_v57 = vld [vmem:[#allocation9 + $0xc0] ss:$8 sps:$4 sm:$0xff]  }
 0x1a4   :  { %2454 = vmatpush2.bf16.msra.mxu0 %v4199_v58  ;;  %v4286_v58 = vld [vmem:[#allocation9 + $0x1e0] ss:$8 sps:$4 sm:$0xff]  }
 0x1a5   :  { %2495 = vmatpush2.bf16.msra.mxu1 %v4202_v59  ;;  %2455 = vmatprep.subr.bf16.mxu0 %v4207_v60  ;;  %v4249_v59 = vld [vmem:[#allocation9 + $0xb4] ss:$8 sps:$4 sm:$0xff]  }
 0x1a6   :  { %2496 = vmatprep.subr.bf16.mxu1 %v4210_v62  ;;  %v4291_v60 = vld [vmem:[#allocation9 + $0x1d4] ss:$8 sps:$4 sm:$0xff]   ;;  %v4247_v62 = vld [vmem:[#allocation9 + $0xb0] ss:$8 sps:$4 sm:$0xff]  }
 0x1a8   :  { %2456 = vmatpush2.bf16.msra.mxu0 %v4205_v10  ;;  %v4289_v10 = vld [vmem:[#allocation9 + $0x1d0] ss:$8 sps:$4 sm:$0xff]  }
 0x1a9   :  { %2497 = vmatpush2.bf16.msra.mxu1 %v4208_v21  ;;  %2911 = vmatprep.subr.bf16.mxu0 %v4213_v0  ;;  %v4252_v21 = vld [vmem:[#allocation9 + $0xa4] ss:$8 sps:$4 sm:$0xff]  }
 0x1aa   :  { %v4294_v0 = vld [vmem:[#allocation9 + $0x1c4] ss:$8 sps:$4 sm:$0xff]  }
 0x1ab   :  { %v2213_v3 = vpop.f32.mrf.mxu0  ;;  %2458 = vmatmul.mubr.bf16.vlgmr.msra.gmra.mxu0 %v4634_v22 }
 0x1ac   :  { %v2254_v4 = vpop.f32.mrf.mxu1  ;;  %2499 = vmatmul.mubr.bf16.vlgmr.msra.gmra.mxu1 %v4642_v34  ;;  %v2214_v5 = vadd.f32 %v2213_v3, %v4663_v61  ;;  %2912 = vmatpush1.bf16.msra.mxu0 %v4211_v1  ;;  %v4222_v34 = vld [vmem:[#allocation9 + $0x44] ss:$8 sps:$4 sm:$0xff]   ;;  %v4261_v61 = vld [vmem:[#allocation9 + $0x174] ss:$8 sps:$4 sm:$0xff]   ;;  %v4250_v1 = vld [vmem:[#allocation9 + $0xa0] ss:$8 sps:$4 sm:$0xff]  }
 0x1ad   :  { %v4672_v41 = vpop.f32.mrf.mxu0  ;;  %2913 = vmatprep.subr.bf16.mxu0 %v4216_v2  ;;  %2952 = vmatprep.subr.bf16.mxu1 %v4261_v61  ;;  %v4292_v2 = vld [vmem:[#allocation9 + $0x1c0] ss:$8 sps:$4 sm:$0xff]   ;;  %v4255_v3 = vld [vmem:[#allocation9 + $0x94] ss:$8 sps:$4 sm:$0xff]  }
 0x1ae   :  { %v4674_v28 = vpop.f32.mrf.mxu1  ;;  %v4676_v8 = vadd.f32 %v2254_v4, %v2214_v5  ;;  %2953 = vmatpush1.bf16.msra.mxu1 %v4259_v15  ;;  %v4297_v4 = vld [vmem:[#allocation9 + $0x1b4] ss:$8 sps:$4 sm:$0xff]   ;;  %v4253_v5 = vld [vmem:[#allocation9 + $0x90] ss:$8 sps:$4 sm:$0xff]  }
 0x1af   :  { %v2217_v11 = vpop.f32.mrf.mxu0  ;;  %2954 = vmatprep.subr.bf16.mxu1 %v4264_v16 }
 0x1b0   :  { %v2258_v12 = vpop.f32.mrf.mxu1  ;;  %2914 = vmatpush1.bf16.msra.mxu0 %v4214_v6  ;;  %v4295_v6 = vld [vmem:[#allocation9 + $0x1b0] ss:$8 sps:$4 sm:$0xff]   ;;  %v4256_v11 = vld [vmem:[#allocation9 + $0x80] ss:$8 sps:$4 sm:$0xff]  }
 0x1b1   :  { %v2218_v14 = vpop.f32.mrf.mxu0  ;;  %2915 = vmatprep.subr.bf16.mxu0 %v4219_v7  ;;  %v4258_v7 = vld [vmem:[#allocation9 + $0x84] ss:$8 sps:$4 sm:$0xff]   ;;  %v2216_v12 = vadd.f32 %v4672_v41, %v4667_v63 }
 0x1b2   :  { %v2259_v22 = vpop.f32.mrf.mxu1  ;;  %2955 = vmatpush1.bf16.msra.mxu1 %v4262_v18  ;;  %v4298_v14 = vld [vmem:[#allocation9 + $0x1a0] ss:$8 sps:$4 sm:$0xff]   ;;  %v4303_v18 = vld [vmem:[#allocation9 + $0x194] ss:$8 sps:$4 sm:$0xff]  }
 0x1b3   :  { %2956 = vmatprep.subr.bf16.mxu1 %v4267_v20  ;;  %v2257_v15 = vadd.f32 %v4674_v28, %v2216_v12  ;;  %v4301_v20 = vld [vmem:[#allocation9 + $0x190] ss:$8 sps:$4 sm:$0xff]  }
 0x1b4   :  { %2916 = vmatpush1.bf16.msra.mxu0 %v4217_v13  ;;  %v4300_v13 = vld [vmem:[#allocation9 + $0x1a4] ss:$8 sps:$4 sm:$0xff]  }
 0x1b5   :  { %2917 = vmatprep.subr.bf16.mxu0 %v4222_v34 }
 0x1b6   :  { %2957 = vmatpush1.bf16.msra.mxu1 %v4265_v24 }
 0x1b7   :  { %2958 = vmatprep.subr.bf16.mxu1 %v4270_v26 }
 0x1b8   :  { %2918 = vmatpush1.bf16.msra.mxu0 %v4220_v17 }
 0x1b9   :  { %2919 = vmatprep.subr.bf16.mxu0 %v4225_v19 }
 0x1ba   :  { %2959 = vmatpush1.bf16.msra.mxu1 %v4268_v29 }
 0x1bb   :  { %2960 = vmatprep.subr.bf16.mxu1 %v4273_v32 }
 0x1bc   :  { %2920 = vmatpush1.bf16.msra.mxu0 %v4223_v23 }
 0x1bd   :  { %2921 = vmatprep.subr.bf16.mxu0 %v4228_v25 }
 0x1be   :  { %2961 = vmatpush1.bf16.msra.mxu1 %v4271_v35 }
 0x1bf   :  { %2962 = vmatprep.subr.bf16.mxu1 %v4276_v37 }
 0x1c0   :  { %2922 = vmatpush1.bf16.msra.mxu0 %v4226_v27  ;;  %v4306_v27 = vld [vmem:[#allocation9 + $0x184] ss:$8 sps:$4 sm:$0xff]  }
 0x1c1   :  { %2923 = vmatprep.subr.bf16.mxu0 %v4231_v30  ;;  %v4304_v30 = vld [vmem:[#allocation9 + $0x180] ss:$8 sps:$4 sm:$0xff]  }
 0x1c2   :  { %2963 = vmatpush1.bf16.msra.mxu1 %v4274_v43 }
 0x1c3   :  { %2964 = vmatprep.subr.bf16.mxu1 %v4279_v45 }
 0x1c4   :  { %2924 = vmatpush1.bf16.msra.mxu0 %v4229_v33 }
 0x1c5   :  { %2925 = vmatprep.subr.bf16.mxu0 %v4234_v36 }
 0x1c6   :  { %2965 = vmatpush1.bf16.msra.mxu1 %v4277_v9 }
 0x1c7   :  { %2966 = vmatprep.subr.bf16.mxu1 %v4282_v48  ;;  %v4307_v48 = vld [vmem:[#allocation12 + $0x78] sm:$0xff]  }
 0x1c8   :  { %2926 = vmatpush1.bf16.msra.mxu0 %v4232_v39 }
 0x1c9   :  { %2927 = vmatprep.subr.bf16.mxu0 %v4237_v50 }
 0x1ca   :  { %2967 = vmatpush1.bf16.msra.mxu1 %v4280_v51  ;;  %v4309_v51 = vld [vmem:[#allocation12 + $0x70] sm:$0xff]  }
 0x1cb   :  { %2968 = vmatprep.subr.bf16.mxu1 %v4285_v53  ;;  %v4311_v53 = vld [vmem:[#allocation12 + $0x68] sm:$0xff]  }
 0x1cc   :  { %2928 = vmatpush2.bf16.msra.mxu0 %v4235_v46 }
 0x1cd   :  { %2929 = vmatprep.subr.bf16.mxu0 %v4240_v47 }
 0x1ce   :  { %2969 = vmatpush2.bf16.msra.mxu1 %v4283_v54  ;;  %v4313_v54 = vld [vmem:[#allocation12 + $0x60] sm:$0xff]  }
 0x1cf   :  { %2970 = vmatprep.subr.bf16.mxu1 %v4288_v56  ;;  %v4315_v56 = vld [vmem:[#allocation12 + $0x58] sm:$0xff]  }
 0x1d0   :  { %2930 = vmatpush2.bf16.msra.mxu0 %v4238_v49  ;;  %v4308_v49 = vld [vmem:[#allocation12 + $0x38] sm:$0xff]  }
 0x1d1   :  { %2931 = vmatprep.subr.bf16.mxu0 %v4243_v52  ;;  %v4310_v52 = vld [vmem:[#allocation12 + $0x30] sm:$0xff]  }
 0x1d2   :  { %2971 = vmatpush2.bf16.msra.mxu1 %v4286_v58  ;;  %v4317_v58 = vld [vmem:[#allocation12 + $0x50] sm:$0xff]  }
 0x1d3   :  { %2972 = vmatprep.subr.bf16.mxu1 %v4291_v60  ;;  %v491_v60 = vsub.s32 3, %v4648_v31 }
 0x1d4   :  { %2932 = vmatpush2.bf16.msra.mxu0 %v4241_v38  ;;  %v4312_v38 = vld [vmem:[#allocation12 + $0x28] sm:$0xff]  }
 0x1d5   :  { %2933 = vmatprep.subr.bf16.mxu0 %v4246_v55  ;;  %v4314_v55 = vld [vmem:[#allocation12 + $0x20] sm:$0xff]  }
 0x1d6   :  { %2973 = vmatpush2.bf16.msra.mxu1 %v4289_v10 }
 0x1d7   :  { %2974 = vmatprep.subr.bf16.mxu1 %v4294_v0 }
 0x1d8   :  { %2934 = vmatpush2.bf16.msra.mxu0 %v4244_v57  ;;  %v4316_v57 = vld [vmem:[#allocation12 + $0x18] sm:$0xff]  }
 0x1d9   :  { %2935 = vmatprep.subr.bf16.mxu0 %v4249_v59  ;;  %v4318_v59 = vld [vmem:[#allocation12 + $0x10] sm:$0xff]  }
 0x1da   :  { %2975 = vmatpush2.bf16.msra.mxu1 %v4292_v2 }
 0x1db   :  { %2976 = vmatprep.subr.bf16.mxu1 %v4297_v4 }
 0x1dc   :  { %2936 = vmatpush2.bf16.msra.mxu0 %v4247_v62  ;;  %v492_v62 = vrot.slane %v4654_v44, %v491_v60 }
 0x1dd   :  { %2937 = vmatprep.subr.bf16.mxu0 %v4252_v21 }
 0x1de   :  { %2977 = vmatpush2.bf16.msra.mxu1 %v4295_v6 }
 0x1df   :  { %2978 = vmatprep.subr.bf16.mxu1 %v4300_v13 }
 0x1e0   :  { %2938 = vmatpush2.bf16.msra.mxu0 %v4250_v1 }
 0x1e1   :  { %2939 = vmatprep.subr.bf16.mxu0 %v4255_v3 }
 0x1e2   :  { %2979 = vmatpush2.bf16.msra.mxu1 %v4298_v14 }
 0x1e3   :  { %2980 = vmatprep.subr.bf16.mxu1 %v4303_v18  ;;  %v4319_v18 = vld [vmem:[#allocation12 + $0x48] sm:$0xff]  }
 0x1e4   :  { %2940 = vmatpush2.bf16.msra.mxu0 %v4253_v5 }
 0x1e5   :  { %2941 = vmatprep.subr.bf16.mxu0 %v4258_v7 }
 0x1e6   :  { %2981 = vmatpush2.bf16.msra.mxu1 %v4301_v20 }
 0x1e7   :  { %2982 = vmatprep.subr.bf16.mxu1 %v4306_v27 }
 0x1e8   :  { %2942 = vmatpush2.bf16.msra.mxu0 %v4256_v11 }
 0x1e9   :  { %3683 = vmatprep.subr.bf16.mxu0 %v4307_v48 }
 0x1ea   :  { %2983 = vmatpush2.bf16.msra.mxu1 %v4304_v30 }
 0x1eb   :  { %v2295_v22 = vpop.f32.mrf.mxu0 }
 0x1ec   :  { %v2336_v34 = vpop.f32.mrf.mxu1  ;;  %v2296_v61 = vadd.f32 %v2295_v22, %v4676_v8  ;;  %v487_v8 = vsub.s32 2, %v4648_v31  ;;  %v3174_v31 = vld [vmem:[#allocation2] sm:$0x1] }
 0x1ed   :  { %v2297_v16 = vpop.f32.mrf.mxu0 }
 0x1ee   :  { %v2338_v17 = vpop.f32.mrf.mxu1  ;;  %v2298_v19 = vadd.f32 %v2297_v16, %v2257_v15  ;;  %v2507_v23 = vmax.f32 %v2296_v61, 0.0  ;;  %v488_v32 = vrot.slane %v4654_v44, %v487_v8 }
 0x1ef   :  { %v2299_v24 = vpop.f32.mrf.mxu0  ;;  %v2339_v10 = vadd.f32 %v2338_v17, %v492_v62 }
 0x1f0   :  { %v2340_v25 = vpop.f32.mrf.mxu1  ;;  %v2508_v63 = vmax.f32 %v2298_v19, 0.0  ;;  %v2511_v28 = vpack.c.bf16 %v2507_v23, %v2507_v23  ;;  %v2337_v33 = vadd.f32 %v2336_v34, %v488_v32  ;;  %v4320_v19 = vld [vmem:[#allocation12 + $0x8] sm:$0xff]   ;;  %v4321_v24 = vld [vmem:[#allocation12 + $0x40] sm:$0xff]  }
 0x1f1   :  { %v2300_v41 = vpop.f32.mrf.mxu0  ;;  %v4322_v25 = vld [vmem:[#allocation12] sm:$0xff]  }
 0x1f2   :  { %v2341_v26 = vpop.f32.mrf.mxu1  ;;  %v2512_v29 = vpack.c.bf16 %v2508_v63, %v2508_v63  ;;  %v2579_v63 = vld [vmem:[#allocation11] sm:$0x3] }
 0x1f3   :  { %v2584_v41 = vrot.slane %v2579_v63, %v4651_v40  ;;  %v2588_v26 = vrot.slane %v2579_v63, %v483_v42  ;;  %v4535_v42 = vmov 0  }
 0x1f4   :  { %2943 = vmatprep.mubr.bf16.mxu0 %v2512_v29  ;;  %3730 = vset.pattern.permute.xlu0 %v4535_v42 }
 0x1f5   :  { %2944 = vmatmul.mubr.bf16.vlgmr.msra.gmra.mxu0 %v2511_v28  ;;  %3177 = vperm.xlu0 %3730, %v3174_v31  }
 0x1f6   :  { %3684 = vmatpush3.bf16.msra.mxu0 %v4308_v49 }
 0x1f7   :  { %3685 = vmatprep.subr.bf16.mxu0 %v4309_v51 }
 0x1fa   :  { %3686 = vmatpush3.bf16.msra.mxu0 %v4310_v52 }
 0x1fb   :  { %3687 = vmatprep.subr.bf16.mxu0 %v4311_v53  ;;  %v3173_v53 = vld [vmem:[#allocation15] sm:$0x1] }
 0x1fe   :  { %3688 = vmatpush3.bf16.msra.mxu0 %v4312_v38 }
 0x1ff   :  { %3689 = vmatprep.subr.bf16.mxu0 %v4313_v54 }
 0x202   :  { %3690 = vmatpush3.bf16.msra.mxu0 %v4314_v55 }
 0x203   :  { %3691 = vmatprep.subr.bf16.mxu0 %v4315_v56 }
 0x206   :  { %3692 = vmatpush3.bf16.msra.mxu0 %v4316_v57 }
 0x207   :  { %3693 = vmatprep.subr.bf16.mxu0 %v4317_v58 }
 0x20a   :  { %3694 = vmatpush3.bf16.msra.mxu0 %v4318_v59 }
 0x20b   :  { %3695 = vmatprep.subr.bf16.mxu0 %v4319_v18 }
 0x20e   :  { %3696 = vmatpush3.bf16.msra.mxu0 %v4320_v19 }
 0x20f   :  { %3697 = vmatprep.subr.bf16.mxu0 %v4321_v24 }
 0x212   :  { %3698 = vmatpush3.bf16.msra.mxu0 %v4322_v25 }
 0x22b   :  { %v2377_v35 = vpop.f32.mrf.mxu0 }
 0x22c   :  { %v2418_v36 = vpop.f32.mrf.mxu1  ;;  %v2378_v37 = vadd.f32 %v2377_v35, %v2337_v33 }
 0x22d   :  { %v2379_v39 = vpop.f32.mrf.mxu0 }
 0x22e   :  { %v2420_v43 = vpop.f32.mrf.mxu1  ;;  %v2419_v50 = vadd.f32 %v2418_v36, %v2378_v37  ;;  %v2380_v21 = vadd.f32 %v2379_v39, %v2339_v10 }
 0x22f   :  { %v2381_v45 = vpop.f32.mrf.mxu0 }
 0x230   :  { %v2422_v46 = vpop.f32.mrf.mxu1  ;;  %v2421_v2 = vadd.f32 %v2420_v43, %v2380_v21 }
 0x231   :  { %v2382_v9 = vpop.f32.mrf.mxu0  ;;  %v3665_v46 = vld [vmem:[#allocation14] ss:$0 sm:$0xff] }
 0x232   :  { %v2423_v47 = vpop.f32.mrf.mxu1 }
 0x26b   :  { %v2459_v0 = vpop.f32.mrf.mxu0 }
 0x26c   :  { %v2500_v1 = vpop.f32.mrf.mxu1  ;;  %v2460_v3 = vadd.f32 %v2459_v0, %v2419_v50  ;;  %v4533_v50 = vmov 0.0  }
 0x26d   :  { %v2461_v4 = vpop.f32.mrf.mxu0  ;;  %3707 = vmatprep.subr.mxu1 %v4533_v50 }
 0x26e   :  { %v2502_v5 = vpop.f32.mrf.mxu1  ;;  %v2501_v6 = vadd.f32 %v2500_v1, %v2460_v3  ;;  %v2462_v7 = vadd.f32 %v2461_v4, %v2421_v2 }
 0x26f   :  { %v2463_v11 = vpop.f32.mrf.mxu0 }
 0x270   :  { %v2504_v12 = vpop.f32.mrf.mxu1  ;;  %v2503_v13 = vadd.f32 %v2502_v5, %v2462_v7  ;;  %v2509_v14 = vmax.f32 %v2501_v6, 0.0  ;;  %v3178_v38 = vpop.permute.xlu0 %3177 }
 0x271   :  { %v2464_v22 = vpop.f32.mrf.mxu0  ;;  %v3183_v54 = vrot.slane %v3178_v38, %v4651_v40 }
 0x272   :  { %v2505_v34 = vpop.f32.mrf.mxu1  ;;  %v2510_v15 = vmax.f32 %v2503_v13, 0.0  ;;  %v2513_v16 = vpack.c.bf16 %v2509_v14, %v2509_v14 }
 0x274   :  { %v2514_v61 = vpack.c.bf16 %v2510_v15, %v2510_v15 }
 0x276   :  { %2984 = vmatprep.mubr.bf16.mxu1 %v2514_v61 }
 0x277   :  { %2985 = vmatmul.mubr.bf16.vlgmr.msra.gmra.mxu1 %v2513_v16 }
 0x278   :  { %3709 = vmatprep.mubr.msk.f32.mxu1 %vm4534_vm0, %v4533_v50 }
 0x2b5   :  { %v2945_v44 = vpop.f32.mrf.mxu0 }
 0x2b6   :  { %v2946_v27 = vadd.f32 %v2945_v44, %v2584_v41 }
 0x2b7   :  { %v2947_v17 = vpop.f32.mrf.mxu0 }
 0x2b8   :  { %v2948_v30 = vadd.f32 %v2947_v17, %v2588_v26 }
 0x2b9   :  { %v2949_v20 = vpop.f32.mrf.mxu0 }
 0x2bb   :  { %v2950_v23 = vpop.f32.mrf.mxu0 }
 0x337   :  { %v2986_v29 = vpop.f32.mrf.mxu1 }
 0x338   :  { %v2987_v28 = vadd.f32 %v2986_v29, %v2946_v27 }
 0x339   :  { %v2988_v8 = vpop.f32.mrf.mxu1 }
 0x33a   :  { %v2989_v32 = vadd.f32 %v2988_v8, %v2948_v30  ;;  %v2993_v33 = vmax.f32 %v2987_v28, 0.0 }
 0x33b   :  { %v2990_v35 = vpop.f32.mrf.mxu1 }
 0x33c   :  { %v2994_v36 = vmax.f32 %v2989_v32, 0.0  ;;  %v2995_v43 = vpack.c.bf16 %v2993_v33, %v2993_v33 }
 0x33d   :  { %v2991_v37 = vpop.f32.mrf.mxu1 }
 0x33e   :  { %v2996_v39 = vpack.c.bf16 %v2994_v36, %v2994_v36 }
 0x340   :  { %3164 = vmatprep.mubr.bf16.mxu0 %v2996_v39 }
 0x341   :  { %3165 = vmatmul.mubr.bf16.vlgmr.msra.gmra.mxu0 %v2995_v43 }
 0x401   :  { %v3699_v45 = vpop.f32.mrf.mxu0 }
 0x403   :  { %v3700_v9 = vpop.f32.mrf.mxu0 }
 0x404   :  { %v3701_v47 = vadd.f32 %v3700_v9, %v3699_v45 }
 0x405   :  { %v3702_v48 = vpop.f32.mrf.mxu0 }
 0x406   :  { %v3167_v49 = vadd.f32 %v3701_v47, %v3665_v46 }
 0x407   :  { %v3703_v51 = vpop.f32.mrf.mxu0 }
 0x408   :  { %v3172_v52 = vmax.f32 %v3167_v49, 0.0 }
 0x40a   :  { %3708 = vmatpush3.xpose.msra.mxu1 %v3172_v52 }
 0x40d   :  { %3710 = vmatmul.mubr.f32.vlgmr.msra.gmra.mxu1 %v3173_v53 }
 0x4cd   :  { %v3250_v55 = vpop.f32.mrf.mxu1 }
 0x4ce   :  { %v3251_v56 = vadd.f32 %v3250_v55, %v3183_v54 }
 0x4cf   :  { %v3711_v57 = vpop.f32.mrf.mxu1 }
 0x4d0   :  { %v3682_v58 = vmul.f32 -1.442695, %v3251_v56 }
 0x4d2   :  { %4323 = vpow2.f32 %v3682_v58 }
 0x4df   :  { %v4324_v59 = vpop.eup %4323 }
 0x4e0   :  { %v3257_v60 = vadd.f32 1.0, %v4324_v59 }
 0x4e2   :  { %4325 = vrcp.f32 %v3257_v60 }
 0x4ef   :  { %v4326_v62 = vpop.eup %4325 }
 0x4f0   :  { %3261 = vst.msk [vmem:[#allocation17] sm:$0x1] %vm3260_vm1, %v4326_v62 }
 0x4f1   :  { %4498 = shalt.err (!%p4495_p2)
}
 0x4f2   :  { %3271 = dma.vmem_to_hbm [thread:$0]  %s3269_s7, 16, %s4702_s9, [#allocation5]  }
 0x4f3   :  { %4517 = dma.done.wait [#allocation5], 16  }
 0x4f4   :  { %4518 = vsyncadd [#allocation5], 4294967280 }
 0x4f5   :  { %3275 = vsyncpa [#allocation4], 1 }
 0x4f6   :  { %3276 = vsyncpa [#allocation7], 1 }
 0x4f7   :  { %3277 = vsyncpa [#allocation10], 1 }
 0x4f8   :  { %3278 = vsyncpa [#allocation13], 1 }
 0x4f9   :  { %3279 = vsyncpa [#allocation16], 1 }
 0x4fa   :  { %3280 = vsyncpa [#allocation5], 1 }

// kernel: tpu_custom_call.1
= control target key start
LH: loop header
LB: loop body
LE: loop exit
PB: predicated region body
PF: predicated region fallthrough
CT: control target
= control target key end

     0   :  { %s4693_s0 = inlined_call_operand.hbm [shape: f32[8,1280], index: 0, kind: input, shape index: {}]   ;;  %s4694_s1 = inlined_call_operand.hbm [shape: bf16[1280,512], index: 1, kind: input, shape index: {}]   ;;  %s4695_s2 = inlined_call_operand.hbm [shape: f32[1,512], index: 2, kind: input, shape index: {}]   ;;  %s4696_s3 = inlined_call_operand.hbm [shape: bf16[512,256], index: 3, kind: input, shape index: {}]   ;;  %s4697_s4 = inlined_call_operand.hbm [shape: f32[1,256], index: 4, kind: input, shape index: {}]   ;;  %s4698_s5 = inlined_call_operand.hbm [shape: bf16[256,128], index: 5, kind: input, shape index: {}]   ;;  %s4699_s6 = inlined_call_operand.hbm [shape: f32[1,128], index: 6, kind: input, shape index: {}]   ;;  %s4700_s7 = inlined_call_operand.hbm [shape: f32[1,128], index: 7, kind: input, shape index: {}]   ;;  %s4701_s8 = inlined_call_operand.<no memory space> [shape: f32[1,1], index: 8, kind: input, shape index: {}]   ;;  %s4702_s9 = inlined_call_operand.hbm [shape: f32[1,1,8], index: 9, kind: output, shape index: {}]  }
   0x1   :  { %v14_v0 = vstv %s4701_s8 }
   0x2   :  { %15 = vst [vmem:[#allocation2] sm:$0x1] %v14_v0 }
   0x3   :  { %16 = vsyncpa [#allocation4], 0 }
   0x4   :  { %17 = vsyncpa [#allocation7], 0 }
   0x5   :  { %18 = vsyncpa [#allocation10], 0 }
   0x6   :  { %19 = vsyncpa [#allocation13], 0 }
   0x7   :  { %20 = vsyncpa [#allocation16], 0 }
   0x8   :  { %21 = vsyncpa [#allocation5], 0  ;;  %s4519_s11 = smov [#allocation6]  }
   0x9   :  { %s37_s12 = sshll.u32 %s4519_s11, 4  ;;  %s38_s12 = int_to_ptr.vmem [resolvable:$true] %s37_s12 }
   0xa   :  { %s4335_s13 = scalar_lea.vmem %s38_s12, 40960  ;;  %p4340_p1 = scmp.lt.s32.totalorder %s38_s12, %s38_s12 }
   0xb   :  { %p4336_p0 = scmp.ne.s32.totalorder %s38_s12, %s4335_s13  ;;  %p4341_p2 = scmp.lt.s32.totalorder %s4335_s13, %s4335_s13 }
   0xd   :  { %p4342_p3 = por %p4341_p2, %p4340_p1 }
   0xf   :  { %p4343_p4 = pnand %p4342_p3, %p4336_p0 }
  0x11   :  { %4346 = shalt.err (!%p4343_p4)
}
  0x12   :  { %s4520_s14 = smov 256   ;;  %s4521_s15 = smov 16  }
  0x13   :  { %43 = dma.hbm_to_vmem [thread:$0]  %s4694_s1, 40960, %s38_s12, [#allocation7], %s4520_s14, %s4520_s14, %s4521_s15  }
  0x14   :  { %s4522_s17 = smov [#allocation9]  }
  0x15   :  { %s59_s18 = sshll.u32 %s4522_s17, 4  ;;  %s60_s18 = int_to_ptr.vmem [resolvable:$true] %s59_s18 }
  0x16   :  { %s4355_s19 = scalar_lea.vmem %s60_s18, 8192  ;;  %p4360_p6 = scmp.lt.s32.totalorder %s60_s18, %s60_s18 }
  0x17   :  { %p4356_p5 = scmp.ne.s32.totalorder %s60_s18, %s4355_s19  ;;  %p4361_p7 = scmp.lt.s32.totalorder %s4355_s19, %s4355_s19 }
  0x19   :  { %p4362_p8 = por %p4361_p7, %p4360_p6 }
  0x1b   :  { %p4363_p9 = pnand %p4362_p8, %p4356_p5 }
  0x1d   :  { %4366 = shalt.err (!%p4363_p9)
}
  0x1e   :  { %s4523_s20 = smov 128   ;;  %s4524_s21 = smov 8  }
  0x1f   :  { %65 = dma.hbm_to_vmem [thread:$0]  %s4696_s3, 8192, %s60_s18, [#allocation10], %s4523_s20, %s4523_s20, %s4524_s21  }
  0x20   :  { %s4525_s24 = smov [#allocation12]  }
  0x21   :  { %s81_s25 = sshll.u32 %s4525_s24, 4  ;;  %s82_s25 = int_to_ptr.vmem [resolvable:$true] %s81_s25 }
  0x22   :  { %s4375_s1 = scalar_lea.vmem %s82_s25, 2048  ;;  %p4380_p11 = scmp.lt.s32.totalorder %s82_s25, %s82_s25 }
  0x23   :  { %p4376_p10 = scmp.ne.s32.totalorder %s82_s25, %s4375_s1  ;;  %p4381_p12 = scmp.lt.s32.totalorder %s4375_s1, %s4375_s1 }
  0x25   :  { %p4382_p13 = por %p4381_p12, %p4380_p11 }
  0x27   :  { %p4383_p0 = pnand %p4382_p13, %p4376_p10 }
  0x29   :  { %4386 = shalt.err (!%p4383_p0)
}
  0x2a   :  { %s4526_s26 = smov 64   ;;  %s4527_s27 = smov 4  }
  0x2b   :  { %87 = dma.hbm_to_vmem [thread:$0]  %s4698_s5, 2048, %s82_s25, [#allocation13], %s4526_s26, %s4526_s26, %s4527_s27  }
  0x2c   :  { %s4528_s30 = smov [#allocation3]   ;;  %s4529_s3 = smov [#allocation8]  }
  0x2d   :  { %s28_s10 = sshll.u32 %s4528_s30, 4  ;;  %s50_s11 = sshll.u32 %s4529_s3, 4  ;;  %s29_s10 = int_to_ptr.vmem [resolvable:$true] %s28_s10  ;;  %s51_s11 = int_to_ptr.vmem [resolvable:$true] %s50_s11 }
  0x2e   :  { %s4395_s12 = scalar_lea.vmem %s29_s10, 1280  ;;  %p4400_p2 = scmp.lt.s32.totalorder %s29_s10, %s29_s10 }
  0x2f   :  { %p4396_p1 = scmp.ne.s32.totalorder %s29_s10, %s4395_s12  ;;  %p4401_p3 = scmp.lt.s32.totalorder %s4395_s12, %s4395_s12 }
  0x31   :  { %p4402_p4 = por %p4401_p3, %p4400_p2 }
  0x33   :  { %p4403_p5 = pnand %p4402_p4, %p4396_p1 }
  0x35   :  { %4406 = shalt.err (!%p4403_p5)
}
  0x36   :  { %31 = dma.hbm_to_vmem [thread:$0]  %s4693_s0, 1280, %s29_s10, [#allocation4]  }
  0x37   :  { %s4415_s15 = scalar_lea.vmem %s51_s11, 64  ;;  %p4420_p7 = scmp.lt.s32.totalorder %s51_s11, %s51_s11 }
  0x38   :  { %p4416_p6 = scmp.ne.s32.totalorder %s51_s11, %s4415_s15  ;;  %p4421_p8 = scmp.lt.s32.totalorder %s4415_s15, %s4415_s15 }
  0x3a   :  { %p4422_p9 = por %p4421_p8, %p4420_p7 }
  0x3c   :  { %p4423_p10 = pnand %p4422_p9, %p4416_p6 }
  0x3e   :  { %4426 = shalt.err (!%p4423_p10)
}
  0x3f   :  { %53 = dma.hbm_to_vmem [thread:$0]  %s4695_s2, 64, %s51_s11, [#allocation7]  }
  0x40   :  { %s4530_s16 = smov [#allocation11]   ;;  %s4531_s18 = smov [#allocation14]  }
  0x41   :  { %s72_s17 = sshll.u32 %s4530_s16, 4  ;;  %s94_s19 = sshll.u32 %s4531_s18, 4  ;;  %s73_s17 = int_to_ptr.vmem [resolvable:$true] %s72_s17  ;;  %s95_s19 = int_to_ptr.vmem [resolvable:$true] %s94_s19 }
  0x42   :  { %s4435_s20 = scalar_lea.vmem %s73_s17, 32  ;;  %p4440_p12 = scmp.lt.s32.totalorder %s73_s17, %s73_s17 }
  0x43   :  { %p4436_p11 = scmp.ne.s32.totalorder %s73_s17, %s4435_s20  ;;  %p4441_p13 = scmp.lt.s32.totalorder %s4435_s20, %s4435_s20 }
  0x45   :  { %p4442_p0 = por %p4441_p13, %p4440_p12 }
  0x47   :  { %p4443_p1 = pnand %p4442_p0, %p4436_p11 }
  0x49   :  { %4446 = shalt.err (!%p4443_p1)
}
  0x4a   :  { %75 = dma.hbm_to_vmem [thread:$0]  %s4697_s4, 32, %s73_s17, [#allocation10]  }
  0x4b   :  { %s4455_s22 = scalar_lea.vmem %s95_s19, 16  ;;  %s4459_s2 = scalar_lea.vmem %s95_s19, 32 }
  0x4c   :  { %p4456_p2 = scmp.ne.s32.totalorder %s95_s19, %s4455_s22  ;;  %p4460_p3 = scmp.lt.s32.totalorder %s95_s19, %s95_s19 }
  0x4d   :  { %p4461_p4 = scmp.lt.s32.totalorder %s4459_s2, %s4455_s22 }
  0x4f   :  { %p4462_p5 = por %p4461_p4, %p4460_p3 }
  0x51   :  { %p4463_p6 = pnand %p4462_p5, %p4456_p2 }
  0x53   :  { %4466 = shalt.err (!%p4463_p6)
}
  0x54   :  { %97 = dma.hbm_to_vmem [thread:$0]  %s4699_s6, 16, %s95_s19, [#allocation13]  }
  0x55   :  { %s4532_s25 = smov [#allocation15]  }
  0x56   :  { %s104_s1 = sshll.u32 %s4532_s25, 4  ;;  %s105_s1 = int_to_ptr.vmem [resolvable:$true] %s104_s1 }
  0x57   :  { %s4475_s26 = scalar_lea.vmem %s105_s1, 16  ;;  %s4479_s27 = scalar_lea.vmem %s105_s1, 32 }
  0x58   :  { %p4476_p7 = scmp.ne.s32.totalorder %s105_s1, %s4475_s26  ;;  %p4480_p8 = scmp.lt.s32.totalorder %s105_s1, %s105_s1 }
  0x59   :  { %p4481_p9 = scmp.lt.s32.totalorder %s4479_s27, %s4475_s26 }
  0x5b   :  { %p4482_p10 = por %p4481_p9, %p4480_p8 }
  0x5d   :  { %p4483_p11 = pnand %p4482_p10, %p4476_p7 }
  0x5f   :  { %4486 = shalt.err (!%p4483_p11)
}
  0x60   :  { %107 = dma.hbm_to_vmem [thread:$0]  %s4700_s7, 16, %s105_s1, [#allocation16]  }
  0x61   :  { %4507 = dma.done.wait [#allocation4], 1280  }
  0x62   :  { %4508 = vsyncadd [#allocation4], 4294966016 }
  0x63   :  { %4509 = dma.done.wait [#allocation7], 41024  }
  0x64   :  { %4510 = vsyncadd [#allocation7], 4294926272 }
  0x65   :  { %4511 = dma.done.wait [#allocation10], 8224  }
  0x66   :  { %4512 = vsyncadd [#allocation10], 4294959072 }
  0x67   :  { %4513 = dma.done.wait [#allocation13], 2064  }
  0x68   :  { %4514 = vsyncadd [#allocation13], 4294965232 }
  0x69   :  { %4515 = dma.done.wait [#allocation16], 16  }
  0x6a   :  { %4516 = vsyncadd [#allocation16], 4294967280  ;;  %v3731_v1 = vld [vmem:[#allocation6 + $0xe4] ss:$16 sps:$4 sm:$0xff]   ;;  %v3735_v3 = vld [vmem:[#allocation6 + $0xe0] ss:$16 sps:$4 sm:$0xff]  }
  0x6b   :  { %v3733_v2 = vld [vmem:[#allocation6 + $0x2e4] ss:$16 sps:$4 sm:$0xff]   ;;  %2097 = vmatprep.subr.bf16.mxu0 %v3731_v1  ;;  %v3736_v4 = vld [vmem:[#allocation6 + $0x2e0] ss:$16 sps:$4 sm:$0xff]   ;;  %v136_v47 = vld [vmem:[#allocation3 + $0x8] sm:$0xff]  ;;  %vm4534_vm0 = vmmov 0  }
  0x6c   :  { %2138 = vmatprep.subr.bf16.mxu1 %v3733_v2  ;;  %v3737_v5 = vld [vmem:[#allocation6 + $0xc4] ss:$16 sps:$4 sm:$0xff]   ;;  %2098 = vmatpush1.bf16.msra.mxu0 %v3735_v3  ;;  %v3741_v7 = vld [vmem:[#allocation6 + $0xc0] ss:$16 sps:$4 sm:$0xff]   ;;  %v4614_v50 = vpack.c.bf16 %v136_v47, %v136_v47  ;;  %v138_v51 = vld [vmem:[#allocation3 + $0x18] sm:$0xff]  ;;  %s4536_s6 = smov [#allocation17]  }
  0x6d   :  { %2139 = vmatpush1.bf16.msra.mxu1 %v3736_v4  ;;  %v3739_v6 = vld [vmem:[#allocation6 + $0x2c4] ss:$16 sps:$4 sm:$0xff]   ;;  %2099 = vmatprep.subr.bf16.mxu0 %v3737_v5  ;;  %v3742_v8 = vld [vmem:[#allocation6 + $0x2c0] ss:$16 sps:$4 sm:$0xff]   ;;  %v4616_v53 = vpack.c.bf16 %v138_v51, %v138_v51  ;;  %s3268_s7 = sshll.u32 %s4536_s6, 4  ;;  %vm3260_vm1 = vcmask 57344   ;;  %s3269_s7 = int_to_ptr.vmem [resolvable:$true] %s3268_s7 }
  0x6e   :  { %2140 = vmatprep.subr.bf16.mxu1 %v3739_v6  ;;  %v3743_v9 = vld [vmem:[#allocation6 + $0xa4] ss:$16 sps:$4 sm:$0xff]   ;;  %v3747_v11 = vld [vmem:[#allocation6 + $0xa0] ss:$16 sps:$4 sm:$0xff]   ;;  %2129 = vmatprep.mubr.bf16.mxu0 %v4614_v50  ;;  %s4487_s29 = scalar_lea.vmem %s3269_s7, 16  ;;  %s4491_s30 = scalar_lea.vmem %s3269_s7, 32 }
  0x6f   :  { %v3745_v10 = vld [vmem:[#allocation6 + $0x2a4] ss:$16 sps:$4 sm:$0xff]   ;;  %v3748_v12 = vld [vmem:[#allocation6 + $0x2a0] ss:$16 sps:$4 sm:$0xff]   ;;  %2170 = vmatprep.mubr.bf16.mxu1 %v4616_v53  ;;  %p4488_p12 = scmp.ne.s32.totalorder %s3269_s7, %s4487_s29  ;;  %p4492_p13 = scmp.lt.s32.totalorder %s3269_s7, %s3269_s7 }
  0x70   :  { %2100 = vmatpush1.bf16.msra.mxu0 %v3741_v7  ;;  %v3749_v13 = vld [vmem:[#allocation6 + $0x84] ss:$16 sps:$4 sm:$0xff]   ;;  %v3753_v15 = vld [vmem:[#allocation6 + $0x80] ss:$16 sps:$4 sm:$0xff]   ;;  %p4493_p0 = scmp.lt.s32.totalorder %s4491_s30, %s4487_s29 }
  0x71   :  { %2141 = vmatpush1.bf16.msra.mxu1 %v3742_v8  ;;  %2101 = vmatprep.subr.bf16.mxu0 %v3743_v9  ;;  %v3751_v14 = vld [vmem:[#allocation6 + $0x284] ss:$16 sps:$4 sm:$0xff]   ;;  %v3754_v16 = vld [vmem:[#allocation6 + $0x280] ss:$16 sps:$4 sm:$0xff]  }
  0x72   :  { %2142 = vmatprep.subr.bf16.mxu1 %v3745_v10  ;;  %v3755_v17 = vld [vmem:[#allocation6 + $0x64] ss:$16 sps:$4 sm:$0xff]   ;;  %v3759_v19 = vld [vmem:[#allocation6 + $0x60] ss:$16 sps:$4 sm:$0xff]   ;;  %p4494_p1 = por %p4493_p0, %p4492_p13 }
  0x73   :  { %v3757_v18 = vld [vmem:[#allocation6 + $0x264] ss:$16 sps:$4 sm:$0xff]   ;;  %v3760_v20 = vld [vmem:[#allocation6 + $0x260] ss:$16 sps:$4 sm:$0xff]  }
  0x74   :  { %2102 = vmatpush1.bf16.msra.mxu0 %v3747_v11  ;;  %v3761_v21 = vld [vmem:[#allocation6 + $0x44] ss:$16 sps:$4 sm:$0xff]   ;;  %v3765_v23 = vld [vmem:[#allocation6 + $0x40] ss:$16 sps:$4 sm:$0xff]   ;;  %p4495_p2 = pnand %p4494_p1, %p4488_p12 }
  0x75   :  { %2143 = vmatpush1.bf16.msra.mxu1 %v3748_v12  ;;  %2103 = vmatprep.subr.bf16.mxu0 %v3749_v13  ;;  %v3763_v22 = vld [vmem:[#allocation6 + $0x244] ss:$16 sps:$4 sm:$0xff]   ;;  %v3766_v24 = vld [vmem:[#allocation6 + $0x240] ss:$16 sps:$4 sm:$0xff]  }
  0x76   :  { %2144 = vmatprep.subr.bf16.mxu1 %v3751_v14  ;;  %v3767_v25 = vld [vmem:[#allocation6 + $0x24] ss:$16 sps:$4 sm:$0xff]   ;;  %v3771_v27 = vld [vmem:[#allocation6 + $0x20] ss:$16 sps:$4 sm:$0xff]  }
  0x77   :  { %v3769_v26 = vld [vmem:[#allocation6 + $0x224] ss:$16 sps:$4 sm:$0xff]   ;;  %v3772_v28 = vld [vmem:[#allocation6 + $0x220] ss:$16 sps:$4 sm:$0xff]  }
  0x78   :  { %2104 = vmatpush1.bf16.msra.mxu0 %v3753_v15  ;;  %v3773_v29 = vld [vmem:[#allocation6 + $0x4] ss:$16 sps:$4 sm:$0xff]   ;;  %v3777_v31 = vld [vmem:[#allocation6] ss:$16 sps:$4 sm:$0xff]  }
  0x79   :  { %2145 = vmatpush1.bf16.msra.mxu1 %v3754_v16  ;;  %2105 = vmatprep.subr.bf16.mxu0 %v3755_v17  ;;  %v3775_v30 = vld [vmem:[#allocation6 + $0x204] ss:$16 sps:$4 sm:$0xff]   ;;  %v3778_v32 = vld [vmem:[#allocation6 + $0x200] ss:$16 sps:$4 sm:$0xff]  }
  0x7a   :  { %2146 = vmatprep.subr.bf16.mxu1 %v3757_v18  ;;  %v3779_v33 = vld [vmem:[#allocation6 + $0x1e4] ss:$16 sps:$4 sm:$0xff]   ;;  %v3783_v35 = vld [vmem:[#allocation6 + $0x1e0] ss:$16 sps:$4 sm:$0xff]  }
  0x7b   :  { %v3781_v34 = vld [vmem:[#allocation6 + $0x3e4] ss:$16 sps:$4 sm:$0xff]   ;;  %v3784_v36 = vld [vmem:[#allocation6 + $0x3e0] ss:$16 sps:$4 sm:$0xff]  }
  0x7c   :  { %2106 = vmatpush1.bf16.msra.mxu0 %v3759_v19  ;;  %v3785_v37 = vld [vmem:[#allocation6 + $0x1c4] ss:$16 sps:$4 sm:$0xff]   ;;  %v3789_v39 = vld [vmem:[#allocation6 + $0x1c0] ss:$16 sps:$4 sm:$0xff]  }
  0x7d   :  { %2147 = vmatpush1.bf16.msra.mxu1 %v3760_v20  ;;  %2107 = vmatprep.subr.bf16.mxu0 %v3761_v21  ;;  %v3787_v38 = vld [vmem:[#allocation6 + $0x3c4] ss:$16 sps:$4 sm:$0xff]   ;;  %v3790_v40 = vld [vmem:[#allocation6 + $0x3c0] ss:$16 sps:$4 sm:$0xff]  }
  0x7e   :  { %2148 = vmatprep.subr.bf16.mxu1 %v3763_v22  ;;  %v3791_v41 = vld [vmem:[#allocation6 + $0x1a4] ss:$16 sps:$4 sm:$0xff]   ;;  %v3795_v43 = vld [vmem:[#allocation6 + $0x1a0] ss:$16 sps:$4 sm:$0xff]  }
  0x7f   :  { %v3793_v42 = vld [vmem:[#allocation6 + $0x3a4] ss:$16 sps:$4 sm:$0xff]   ;;  %v3796_v44 = vld [vmem:[#allocation6 + $0x3a0] ss:$16 sps:$4 sm:$0xff]  }
  0x80   :  { %2108 = vmatpush1.bf16.msra.mxu0 %v3765_v23  ;;  %v3797_v45 = vld [vmem:[#allocation6 + $0x184] ss:$16 sps:$4 sm:$0xff]   ;;  %v3801_v48 = vld [vmem:[#allocation6 + $0x180] ss:$16 sps:$4 sm:$0xff]  }
  0x81   :  { %2149 = vmatpush1.bf16.msra.mxu1 %v3766_v24  ;;  %2109 = vmatprep.subr.bf16.mxu0 %v3767_v25  ;;  %v3799_v46 = vld [vmem:[#allocation6 + $0x384] ss:$16 sps:$4 sm:$0xff]   ;;  %v3802_v49 = vld [vmem:[#allocation6 + $0x380] ss:$16 sps:$4 sm:$0xff]  }
  0x82   :  { %2150 = vmatprep.subr.bf16.mxu1 %v3769_v26  ;;  %v3803_v52 = vld [vmem:[#allocation6 + $0x164] ss:$16 sps:$4 sm:$0xff]   ;;  %v3807_v55 = vld [vmem:[#allocation6 + $0x160] ss:$16 sps:$4 sm:$0xff]  }
  0x83   :  { %v3805_v54 = vld [vmem:[#allocation6 + $0x364] ss:$16 sps:$4 sm:$0xff]   ;;  %v3808_v56 = vld [vmem:[#allocation6 + $0x360] ss:$16 sps:$4 sm:$0xff]  }
  0x84   :  { %2110 = vmatpush1.bf16.msra.mxu0 %v3771_v27  ;;  %v3809_v57 = vld [vmem:[#allocation6 + $0x144] ss:$16 sps:$4 sm:$0xff]   ;;  %v3813_v59 = vld [vmem:[#allocation6 + $0x140] ss:$16 sps:$4 sm:$0xff]  }
  0x85   :  { %2151 = vmatpush1.bf16.msra.mxu1 %v3772_v28  ;;  %2111 = vmatprep.subr.bf16.mxu0 %v3773_v29  ;;  %v3811_v58 = vld [vmem:[#allocation6 + $0x344] ss:$16 sps:$4 sm:$0xff]   ;;  %v3814_v60 = vld [vmem:[#allocation6 + $0x340] ss:$16 sps:$4 sm:$0xff]  }
  0x86   :  { %2152 = vmatprep.subr.bf16.mxu1 %v3775_v30  ;;  %v3815_v61 = vld [vmem:[#allocation6 + $0x124] ss:$16 sps:$4 sm:$0xff]   ;;  %v3819_v63 = vld [vmem:[#allocation6 + $0x120] ss:$16 sps:$4 sm:$0xff]  }
  0x87   :  { %v3817_v62 = vld [vmem:[#allocation6 + $0x324] ss:$16 sps:$4 sm:$0xff]   ;;  %v3820_v0 = vld [vmem:[#allocation6 + $0x320] ss:$16 sps:$4 sm:$0xff]  }
  0x88   :  { %2112 = vmatpush1.bf16.msra.mxu0 %v3777_v31  ;;  %v3821_v1 = vld [vmem:[#allocation6 + $0x104] ss:$16 sps:$4 sm:$0xff]   ;;  %v3825_v3 = vld [vmem:[#allocation6 + $0x100] ss:$16 sps:$4 sm:$0xff]  }
  0x89   :  { %2153 = vmatpush1.bf16.msra.mxu1 %v3778_v32  ;;  %2113 = vmatprep.subr.bf16.mxu0 %v3779_v33  ;;  %v3823_v2 = vld [vmem:[#allocation6 + $0x304] ss:$16 sps:$4 sm:$0xff]   ;;  %v3826_v4 = vld [vmem:[#allocation6 + $0x300] ss:$16 sps:$4 sm:$0xff]  }
  0x8a   :  { %2154 = vmatprep.subr.bf16.mxu1 %v3781_v34  ;;  %v135_v5 = vld [vmem:[#allocation3] sm:$0xff]  ;;  %v137_v6 = vld [vmem:[#allocation3 + $0x10] sm:$0xff] }
  0x8b   :  { %v3829_v7 = vld [vmem:[#allocation6 + $0x4e4] ss:$16 sps:$4 sm:$0xff]   ;;  %v4620_v9 = vpack.c.bf16 %v135_v5, %v135_v5  ;;  %v4622_v10 = vpack.c.bf16 %v137_v6, %v137_v6  ;;  %v3827_v11 = vld [vmem:[#allocation6 + $0x4e0] ss:$16 sps:$4 sm:$0xff]  }
  0x8c   :  { %2114 = vmatpush2.bf16.msra.mxu0 %v3783_v35  ;;  %v3832_v8 = vld [vmem:[#allocation6 + $0x6e4] ss:$16 sps:$4 sm:$0xff]   ;;  %v3830_v12 = vld [vmem:[#allocation6 + $0x6e0] ss:$16 sps:$4 sm:$0xff]   ;;  %v140_v35 = vld [vmem:[#allocation3 + $0x28] sm:$0xff] }
  0x8d   :  { %2155 = vmatpush2.bf16.msra.mxu1 %v3784_v36  ;;  %2115 = vmatprep.subr.bf16.mxu0 %v3785_v37  ;;  %v3835_v13 = vld [vmem:[#allocation6 + $0x4c4] ss:$16 sps:$4 sm:$0xff]   ;;  %v3833_v15 = vld [vmem:[#allocation6 + $0x4c0] ss:$16 sps:$4 sm:$0xff]  }
  0x8e   :  { %2156 = vmatprep.subr.bf16.mxu1 %v3787_v38  ;;  %v3838_v14 = vld [vmem:[#allocation6 + $0x6c4] ss:$16 sps:$4 sm:$0xff]   ;;  %v3836_v16 = vld [vmem:[#allocation6 + $0x6c0] ss:$16 sps:$4 sm:$0xff]   ;;  %v4626_v38 = vpack.c.bf16 %v140_v35, %v140_v35 }
  0x8f   :  { %v3841_v17 = vld [vmem:[#allocation6 + $0x4a4] ss:$16 sps:$4 sm:$0xff]   ;;  %v3839_v19 = vld [vmem:[#allocation6 + $0x4a0] ss:$16 sps:$4 sm:$0xff]  }
  0x90   :  { %2116 = vmatpush2.bf16.msra.mxu0 %v3789_v39  ;;  %v3844_v18 = vld [vmem:[#allocation6 + $0x6a4] ss:$16 sps:$4 sm:$0xff]   ;;  %v3842_v20 = vld [vmem:[#allocation6 + $0x6a0] ss:$16 sps:$4 sm:$0xff]   ;;  %v142_v39 = vld [vmem:[#allocation3 + $0x38] sm:$0xff] }
  0x91   :  { %2157 = vmatpush2.bf16.msra.mxu1 %v3790_v40  ;;  %2117 = vmatprep.subr.bf16.mxu0 %v3791_v41  ;;  %v3847_v21 = vld [vmem:[#allocation6 + $0x484] ss:$16 sps:$4 sm:$0xff]   ;;  %v3845_v23 = vld [vmem:[#allocation6 + $0x480] ss:$16 sps:$4 sm:$0xff]   ;;  %v4628_v41 = vpack.c.bf16 %v142_v39, %v142_v39  ;;  %v3944_v39 = vld [vmem:[#allocation6 + $0x88] ss:$16 sps:$4 sm:$0xff]  }
  0x92   :  { %2158 = vmatprep.subr.bf16.mxu1 %v3793_v42  ;;  %v3850_v22 = vld [vmem:[#allocation6 + $0x684] ss:$16 sps:$4 sm:$0xff]   ;;  %v3848_v24 = vld [vmem:[#allocation6 + $0x680] ss:$16 sps:$4 sm:$0xff]  }
  0x93   :  { %v3853_v25 = vld [vmem:[#allocation6 + $0x464] ss:$16 sps:$4 sm:$0xff]   ;;  %v3851_v27 = vld [vmem:[#allocation6 + $0x460] ss:$16 sps:$4 sm:$0xff]  }
  0x94   :  { %2118 = vmatpush2.bf16.msra.mxu0 %v3795_v43  ;;  %v3856_v26 = vld [vmem:[#allocation6 + $0x664] ss:$16 sps:$4 sm:$0xff]   ;;  %v3854_v28 = vld [vmem:[#allocation6 + $0x660] ss:$16 sps:$4 sm:$0xff]  }
  0x95   :  { %2159 = vmatpush2.bf16.msra.mxu1 %v3796_v44  ;;  %2119 = vmatprep.subr.bf16.mxu0 %v3797_v45  ;;  %v3859_v29 = vld [vmem:[#allocation6 + $0x444] ss:$16 sps:$4 sm:$0xff]   ;;  %v3857_v31 = vld [vmem:[#allocation6 + $0x440] ss:$16 sps:$4 sm:$0xff]  }
  0x96   :  { %2160 = vmatprep.subr.bf16.mxu1 %v3799_v46  ;;  %v3862_v30 = vld [vmem:[#allocation6 + $0x644] ss:$16 sps:$4 sm:$0xff]   ;;  %v3860_v32 = vld [vmem:[#allocation6 + $0x640] ss:$16 sps:$4 sm:$0xff]  }
  0x97   :  { %v3865_v33 = vld [vmem:[#allocation6 + $0x424] ss:$16 sps:$4 sm:$0xff]   ;;  %v3863_v36 = vld [vmem:[#allocation6 + $0x420] ss:$16 sps:$4 sm:$0xff]  }
  0x98   :  { %2120 = vmatpush2.bf16.msra.mxu0 %v3801_v48  ;;  %v3868_v34 = vld [vmem:[#allocation6 + $0x624] ss:$16 sps:$4 sm:$0xff]   ;;  %v3866_v37 = vld [vmem:[#allocation6 + $0x620] ss:$16 sps:$4 sm:$0xff]  }
  0x99   :  { %2161 = vmatpush2.bf16.msra.mxu1 %v3802_v49  ;;  %2121 = vmatprep.subr.bf16.mxu0 %v3803_v52  ;;  %v3871_v40 = vld [vmem:[#allocation6 + $0x404] ss:$16 sps:$4 sm:$0xff]   ;;  %v3869_v43 = vld [vmem:[#allocation6 + $0x400] ss:$16 sps:$4 sm:$0xff]  }
  0x9a   :  { %2162 = vmatprep.subr.bf16.mxu1 %v3805_v54  ;;  %v3874_v42 = vld [vmem:[#allocation6 + $0x604] ss:$16 sps:$4 sm:$0xff]   ;;  %v3872_v44 = vld [vmem:[#allocation6 + $0x600] ss:$16 sps:$4 sm:$0xff]  }
  0x9b   :  { %v3877_v45 = vld [vmem:[#allocation6 + $0x5e4] ss:$16 sps:$4 sm:$0xff]   ;;  %v3875_v47 = vld [vmem:[#allocation6 + $0x5e0] ss:$16 sps:$4 sm:$0xff]  }
  0x9c   :  { %2122 = vmatpush2.bf16.msra.mxu0 %v3807_v55  ;;  %v3880_v46 = vld [vmem:[#allocation6 + $0x7e4] ss:$16 sps:$4 sm:$0xff]   ;;  %v3878_v48 = vld [vmem:[#allocation6 + $0x7e0] ss:$16 sps:$4 sm:$0xff]  }
  0x9d   :  { %2163 = vmatpush2.bf16.msra.mxu1 %v3808_v56  ;;  %2123 = vmatprep.subr.bf16.mxu0 %v3809_v57  ;;  %v3883_v49 = vld [vmem:[#allocation6 + $0x5c4] ss:$16 sps:$4 sm:$0xff]   ;;  %v3881_v52 = vld [vmem:[#allocation6 + $0x5c0] ss:$16 sps:$4 sm:$0xff]  }
  0x9e   :  { %2164 = vmatprep.subr.bf16.mxu1 %v3811_v58  ;;  %v3886_v51 = vld [vmem:[#allocation6 + $0x7c4] ss:$16 sps:$4 sm:$0xff]   ;;  %v3884_v54 = vld [vmem:[#allocation6 + $0x7c0] ss:$16 sps:$4 sm:$0xff]  }
  0x9f   :  { %v3889_v55 = vld [vmem:[#allocation6 + $0x5a4] ss:$16 sps:$4 sm:$0xff]   ;;  %v3887_v57 = vld [vmem:[#allocation6 + $0x5a0] ss:$16 sps:$4 sm:$0xff]  }
  0xa0   :  { %2124 = vmatpush2.bf16.msra.mxu0 %v3813_v59  ;;  %v3892_v56 = vld [vmem:[#allocation6 + $0x7a4] ss:$16 sps:$4 sm:$0xff]   ;;  %v3890_v58 = vld [vmem:[#allocation6 + $0x7a0] ss:$16 sps:$4 sm:$0xff]  }
  0xa1   :  { %2165 = vmatpush2.bf16.msra.mxu1 %v3814_v60  ;;  %2125 = vmatprep.subr.bf16.mxu0 %v3815_v61  ;;  %v3895_v59 = vld [vmem:[#allocation6 + $0x584] ss:$16 sps:$4 sm:$0xff]   ;;  %v3893_v61 = vld [vmem:[#allocation6 + $0x580] ss:$16 sps:$4 sm:$0xff]  }
  0xa2   :  { %2166 = vmatprep.subr.bf16.mxu1 %v3817_v62  ;;  %v3898_v60 = vld [vmem:[#allocation6 + $0x784] ss:$16 sps:$4 sm:$0xff]   ;;  %v3896_v62 = vld [vmem:[#allocation6 + $0x780] ss:$16 sps:$4 sm:$0xff]  }
  0xa3   :  { %v3905_v5 = vld [vmem:[#allocation6 + $0x540] ss:$16 sps:$4 sm:$0xff]   ;;  %v3943_v35 = vld [vmem:[#allocation6 + $0x884] ss:$16 sps:$4 sm:$0xff]  }
  0xa4   :  { %2126 = vmatpush2.bf16.msra.mxu0 %v3819_v63  ;;  %v3901_v63 = vld [vmem:[#allocation6 + $0x564] ss:$16 sps:$4 sm:$0xff]   ;;  %v3908_v6 = vld [vmem:[#allocation6 + $0x740] ss:$16 sps:$4 sm:$0xff]  }
  0xa5   :  { %2167 = vmatpush2.bf16.msra.mxu1 %v3820_v0  ;;  %2127 = vmatprep.subr.bf16.mxu0 %v3821_v1  ;;  %v3904_v0 = vld [vmem:[#allocation6 + $0x764] ss:$16 sps:$4 sm:$0xff]   ;;  %v3899_v1 = vld [vmem:[#allocation6 + $0x560] ss:$16 sps:$4 sm:$0xff]  }
  0xa6   :  { %2168 = vmatprep.subr.bf16.mxu1 %v3823_v2  ;;  %v3902_v2 = vld [vmem:[#allocation6 + $0x760] ss:$16 sps:$4 sm:$0xff]  }
  0xa8   :  { %2128 = vmatpush2.bf16.msra.mxu0 %v3825_v3  ;;  %v3907_v3 = vld [vmem:[#allocation6 + $0x544] ss:$16 sps:$4 sm:$0xff]  }
  0xa9   :  { %2169 = vmatpush2.bf16.msra.mxu1 %v3826_v4  ;;  %2179 = vmatprep.subr.bf16.mxu0 %v3829_v7  ;;  %v3910_v4 = vld [vmem:[#allocation6 + $0x744] ss:$16 sps:$4 sm:$0xff]  }
  0xaa   :  { %2220 = vmatprep.subr.bf16.mxu1 %v3832_v8  ;;  %v3913_v7 = vld [vmem:[#allocation6 + $0x524] ss:$16 sps:$4 sm:$0xff]  }
  0xab   :  { %2130 = vmatmul.mubr.bf16.vlgmr.msra.gmra.mxu0 %v4620_v9  ;;  %v3916_v8 = vld [vmem:[#allocation6 + $0x724] ss:$16 sps:$4 sm:$0xff]  }
  0xac   :  { %2171 = vmatmul.mubr.bf16.vlgmr.msra.gmra.mxu1 %v4622_v10  ;;  %2180 = vmatpush1.bf16.msra.mxu0 %v3827_v11  ;;  %v3911_v11 = vld [vmem:[#allocation6 + $0x520] ss:$16 sps:$4 sm:$0xff]  }
  0xad   :  { %2221 = vmatpush1.bf16.msra.mxu1 %v3830_v12  ;;  %2181 = vmatprep.subr.bf16.mxu0 %v3835_v13  ;;  %v3914_v12 = vld [vmem:[#allocation6 + $0x720] ss:$16 sps:$4 sm:$0xff]   ;;  %v3919_v13 = vld [vmem:[#allocation6 + $0x504] ss:$16 sps:$4 sm:$0xff]  }
  0xae   :  { %2222 = vmatprep.subr.bf16.mxu1 %v3838_v14  ;;  %2211 = vmatprep.mubr.bf16.mxu0 %v4626_v38  ;;  %v3922_v14 = vld [vmem:[#allocation6 + $0x704] ss:$16 sps:$4 sm:$0xff]  }
  0xaf   :  { %2252 = vmatprep.mubr.bf16.mxu1 %v4628_v41 }
  0xb0   :  { %2182 = vmatpush1.bf16.msra.mxu0 %v3833_v15  ;;  %v3917_v15 = vld [vmem:[#allocation6 + $0x500] ss:$16 sps:$4 sm:$0xff]  }
  0xb1   :  { %2223 = vmatpush1.bf16.msra.mxu1 %v3836_v16  ;;  %2183 = vmatprep.subr.bf16.mxu0 %v3841_v17  ;;  %v3920_v16 = vld [vmem:[#allocation6 + $0x700] ss:$16 sps:$4 sm:$0xff]  }
  0xb2   :  { %2224 = vmatprep.subr.bf16.mxu1 %v3844_v18  ;;  %v139_v17 = vld [vmem:[#allocation3 + $0x20] sm:$0xff]  ;;  %v141_v18 = vld [vmem:[#allocation3 + $0x30] sm:$0xff] }
  0xb4   :  { %2184 = vmatpush1.bf16.msra.mxu0 %v3839_v19  ;;  %v3925_v19 = vld [vmem:[#allocation6 + $0x8e4] ss:$16 sps:$4 sm:$0xff]  }
  0xb5   :  { %2225 = vmatpush1.bf16.msra.mxu1 %v3842_v20  ;;  %2185 = vmatprep.subr.bf16.mxu0 %v3847_v21  ;;  %v3928_v20 = vld [vmem:[#allocation6 + $0xec] ss:$16 sps:$4 sm:$0xff]   ;;  %v4632_v21 = vpack.c.bf16 %v139_v17, %v139_v17 }
  0xb6   :  { %2226 = vmatprep.subr.bf16.mxu1 %v3850_v22  ;;  %v4634_v22 = vpack.c.bf16 %v141_v18, %v141_v18  ;;  %v4006_v17 = vld [vmem:[#allocation6 + $0x14c] ss:$16 sps:$4 sm:$0xff]   ;;  %v4001_v18 = vld [vmem:[#allocation6 + $0x940] ss:$16 sps:$4 sm:$0xff]  }
  0xb8   :  { %2186 = vmatpush1.bf16.msra.mxu0 %v3845_v23  ;;  %v3923_v23 = vld [vmem:[#allocation6 + $0x8e0] ss:$16 sps:$4 sm:$0xff]  }
  0xb9   :  { %2227 = vmatpush1.bf16.msra.mxu1 %v3848_v24  ;;  %2187 = vmatprep.subr.bf16.mxu0 %v3853_v25  ;;  %v3926_v24 = vld [vmem:[#allocation6 + $0xe8] ss:$16 sps:$4 sm:$0xff]   ;;  %v3931_v25 = vld [vmem:[#allocation6 + $0x8c4] ss:$16 sps:$4 sm:$0xff]  }
  0xba   :  { %2228 = vmatprep.subr.bf16.mxu1 %v3856_v26  ;;  %v3934_v26 = vld [vmem:[#allocation6 + $0xcc] ss:$16 sps:$4 sm:$0xff]  }
  0xbc   :  { %2188 = vmatpush1.bf16.msra.mxu0 %v3851_v27  ;;  %v144_v27 = vld [vmem:[#allocation3 + $0x48] sm:$0xff] }
  0xbd   :  { %2229 = vmatpush1.bf16.msra.mxu1 %v3854_v28  ;;  %2189 = vmatprep.subr.bf16.mxu0 %v3859_v29  ;;  %v4638_v28 = vpack.c.bf16 %v144_v27, %v144_v27  ;;  %v3929_v29 = vld [vmem:[#allocation6 + $0x8c0] ss:$16 sps:$4 sm:$0xff]   ;;  %v4018_v27 = vld [vmem:[#allocation6 + $0x10c] ss:$16 sps:$4 sm:$0xff]  }
  0xbe   :  { %2230 = vmatprep.subr.bf16.mxu1 %v3862_v30  ;;  %v3932_v30 = vld [vmem:[#allocation6 + $0xc8] ss:$16 sps:$4 sm:$0xff]  }
  0xc0   :  { %2190 = vmatpush1.bf16.msra.mxu0 %v3857_v31  ;;  %v3937_v31 = vld [vmem:[#allocation6 + $0x8a4] ss:$16 sps:$4 sm:$0xff]  }
  0xc1   :  { %2231 = vmatpush1.bf16.msra.mxu1 %v3860_v32  ;;  %2191 = vmatprep.subr.bf16.mxu0 %v3865_v33  ;;  %v3940_v32 = vld [vmem:[#allocation6 + $0xac] ss:$16 sps:$4 sm:$0xff]   ;;  %v3935_v33 = vld [vmem:[#allocation6 + $0x8a0] ss:$16 sps:$4 sm:$0xff]  }
  0xc2   :  { %2232 = vmatprep.subr.bf16.mxu1 %v3868_v34  ;;  %v3938_v34 = vld [vmem:[#allocation6 + $0xa8] ss:$16 sps:$4 sm:$0xff]  }
  0xc4   :  { %2192 = vmatpush1.bf16.msra.mxu0 %v3863_v36  ;;  %v3946_v36 = vld [vmem:[#allocation6 + $0x8c] ss:$16 sps:$4 sm:$0xff]  }
  0xc5   :  { %2233 = vmatpush1.bf16.msra.mxu1 %v3866_v37  ;;  %2193 = vmatprep.subr.bf16.mxu0 %v3871_v40  ;;  %v3941_v37 = vld [vmem:[#allocation6 + $0x880] ss:$16 sps:$4 sm:$0xff]   ;;  %v3949_v40 = vld [vmem:[#allocation6 + $0x864] ss:$16 sps:$4 sm:$0xff]  }
  0xc6   :  { %2234 = vmatprep.subr.bf16.mxu1 %v3874_v42  ;;  %v3952_v42 = vld [vmem:[#allocation6 + $0x6c] ss:$16 sps:$4 sm:$0xff]  }
  0xc8   :  { %2194 = vmatpush1.bf16.msra.mxu0 %v3869_v43  ;;  %v3947_v43 = vld [vmem:[#allocation6 + $0x860] ss:$16 sps:$4 sm:$0xff]  }
  0xc9   :  { %2235 = vmatpush1.bf16.msra.mxu1 %v3872_v44  ;;  %2195 = vmatprep.subr.bf16.mxu0 %v3877_v45  ;;  %v3955_v44 = vld [vmem:[#allocation6 + $0x844] ss:$16 sps:$4 sm:$0xff]   ;;  %v3958_v45 = vld [vmem:[#allocation6 + $0x4c] ss:$16 sps:$4 sm:$0xff]  }
  0xca   :  { %2236 = vmatprep.subr.bf16.mxu1 %v3880_v46  ;;  %v3953_v46 = vld [vmem:[#allocation6 + $0x840] ss:$16 sps:$4 sm:$0xff]  }
  0xcc   :  { %2196 = vmatpush2.bf16.msra.mxu0 %v3875_v47  ;;  %v3956_v47 = vld [vmem:[#allocation6 + $0x48] ss:$16 sps:$4 sm:$0xff]  }
  0xcd   :  { %2237 = vmatpush2.bf16.msra.mxu1 %v3878_v48  ;;  %2197 = vmatprep.subr.bf16.mxu0 %v3883_v49  ;;  %v3961_v48 = vld [vmem:[#allocation6 + $0x824] ss:$16 sps:$4 sm:$0xff]   ;;  %v3964_v49 = vld [vmem:[#allocation6 + $0x2c] ss:$16 sps:$4 sm:$0xff]  }
  0xce   :  { %2238 = vmatprep.subr.bf16.mxu1 %v3886_v51  ;;  %v3959_v51 = vld [vmem:[#allocation6 + $0x820] ss:$16 sps:$4 sm:$0xff]  }
  0xd0   :  { %2198 = vmatpush2.bf16.msra.mxu0 %v3881_v52  ;;  %v3962_v52 = vld [vmem:[#allocation6 + $0x28] ss:$16 sps:$4 sm:$0xff]  }
  0xd1   :  { %2239 = vmatpush2.bf16.msra.mxu1 %v3884_v54  ;;  %2199 = vmatprep.subr.bf16.mxu0 %v3889_v55  ;;  %v3967_v54 = vld [vmem:[#allocation6 + $0x804] ss:$16 sps:$4 sm:$0xff]   ;;  %v3970_v55 = vld [vmem:[#allocation6 + $0xc] ss:$16 sps:$4 sm:$0xff]  }
  0xd2   :  { %2240 = vmatprep.subr.bf16.mxu1 %v3892_v56  ;;  %v3965_v56 = vld [vmem:[#allocation6 + $0x800] ss:$16 sps:$4 sm:$0xff]  }
  0xd4   :  { %2200 = vmatpush2.bf16.msra.mxu0 %v3887_v57  ;;  %v3968_v57 = vld [vmem:[#allocation6 + $0x8] ss:$16 sps:$4 sm:$0xff]  }
  0xd5   :  { %2241 = vmatpush2.bf16.msra.mxu1 %v3890_v58  ;;  %2201 = vmatprep.subr.bf16.mxu0 %v3895_v59  ;;  %v3973_v58 = vld [vmem:[#allocation6 + $0x9e4] ss:$16 sps:$4 sm:$0xff]   ;;  %v3976_v59 = vld [vmem:[#allocation6 + $0x1ec] ss:$16 sps:$4 sm:$0xff]  }
  0xd6   :  { %2242 = vmatprep.subr.bf16.mxu1 %v3898_v60  ;;  %v3971_v60 = vld [vmem:[#allocation6 + $0x9e0] ss:$16 sps:$4 sm:$0xff]  }
  0xd8   :  { %2202 = vmatpush2.bf16.msra.mxu0 %v3893_v61  ;;  %v3974_v61 = vld [vmem:[#allocation6 + $0x1e8] ss:$16 sps:$4 sm:$0xff]  }
  0xd9   :  { %2243 = vmatpush2.bf16.msra.mxu1 %v3896_v62  ;;  %2203 = vmatprep.subr.bf16.mxu0 %v3901_v63  ;;  %v3979_v62 = vld [vmem:[#allocation6 + $0x9c4] ss:$16 sps:$4 sm:$0xff]   ;;  %v3982_v63 = vld [vmem:[#allocation6 + $0x1cc] ss:$16 sps:$4 sm:$0xff]  }
  0xda   :  { %2244 = vmatprep.subr.bf16.mxu1 %v3904_v0  ;;  %v3977_v0 = vld [vmem:[#allocation6 + $0x9c0] ss:$16 sps:$4 sm:$0xff]  }
  0xdc   :  { %2204 = vmatpush2.bf16.msra.mxu0 %v3899_v1  ;;  %v3980_v1 = vld [vmem:[#allocation6 + $0x1c8] ss:$16 sps:$4 sm:$0xff]  }
  0xdd   :  { %2245 = vmatpush2.bf16.msra.mxu1 %v3902_v2  ;;  %2205 = vmatprep.subr.bf16.mxu0 %v3907_v3  ;;  %v3985_v2 = vld [vmem:[#allocation6 + $0x9a4] ss:$16 sps:$4 sm:$0xff]   ;;  %v3988_v3 = vld [vmem:[#allocation6 + $0x1ac] ss:$16 sps:$4 sm:$0xff]  }
  0xde   :  { %2246 = vmatprep.subr.bf16.mxu1 %v3910_v4  ;;  %v3983_v4 = vld [vmem:[#allocation6 + $0x9a0] ss:$16 sps:$4 sm:$0xff]  }
  0xe0   :  { %2206 = vmatpush2.bf16.msra.mxu0 %v3905_v5  ;;  %v3986_v5 = vld [vmem:[#allocation6 + $0x1a8] ss:$16 sps:$4 sm:$0xff]  }
  0xe1   :  { %2247 = vmatpush2.bf16.msra.mxu1 %v3908_v6  ;;  %2207 = vmatprep.subr.bf16.mxu0 %v3913_v7  ;;  %v3991_v6 = vld [vmem:[#allocation6 + $0x984] ss:$16 sps:$4 sm:$0xff]   ;;  %v3994_v7 = vld [vmem:[#allocation6 + $0x18c] ss:$16 sps:$4 sm:$0xff]  }
  0xe2   :  { %2248 = vmatprep.subr.bf16.mxu1 %v3916_v8  ;;  %v3989_v8 = vld [vmem:[#allocation6 + $0x980] ss:$16 sps:$4 sm:$0xff]  }
  0xe4   :  { %2208 = vmatpush2.bf16.msra.mxu0 %v3911_v11  ;;  %v3992_v11 = vld [vmem:[#allocation6 + $0x188] ss:$16 sps:$4 sm:$0xff]  }
  0xe5   :  { %2249 = vmatpush2.bf16.msra.mxu1 %v3914_v12  ;;  %2209 = vmatprep.subr.bf16.mxu0 %v3919_v13  ;;  %v3997_v12 = vld [vmem:[#allocation6 + $0x964] ss:$16 sps:$4 sm:$0xff]   ;;  %v4000_v13 = vld [vmem:[#allocation6 + $0x16c] ss:$16 sps:$4 sm:$0xff]  }
  0xe6   :  { %2250 = vmatprep.subr.bf16.mxu1 %v3922_v14  ;;  %v3995_v14 = vld [vmem:[#allocation6 + $0x960] ss:$16 sps:$4 sm:$0xff]  }
  0xe8   :  { %2210 = vmatpush2.bf16.msra.mxu0 %v3917_v15  ;;  %v3998_v15 = vld [vmem:[#allocation6 + $0x168] ss:$16 sps:$4 sm:$0xff]  }
  0xe9   :  { %2251 = vmatpush2.bf16.msra.mxu1 %v3920_v16  ;;  %2261 = vmatprep.subr.bf16.mxu0 %v3925_v19  ;;  %v4003_v16 = vld [vmem:[#allocation6 + $0x944] ss:$16 sps:$4 sm:$0xff]   ;;  %v4004_v19 = vld [vmem:[#allocation6 + $0x148] ss:$16 sps:$4 sm:$0xff]  }
  0xea   :  { %2302 = vmatprep.subr.bf16.mxu1 %v3928_v20  ;;  %v4009_v20 = vld [vmem:[#allocation6 + $0x924] ss:$16 sps:$4 sm:$0xff]  }
  0xeb   :  { %2212 = vmatmul.mubr.bf16.vlgmr.msra.gmra.mxu0 %v4632_v21 }
  0xec   :  { %2253 = vmatmul.mubr.bf16.vlgmr.msra.gmra.mxu1 %v4634_v22  ;;  %2262 = vmatpush1.bf16.msra.mxu0 %v3923_v23  ;;  %v4012_v23 = vld [vmem:[#allocation6 + $0x12c] ss:$16 sps:$4 sm:$0xff]  }
  0xed   :  { %2303 = vmatpush1.bf16.msra.mxu1 %v3926_v24  ;;  %2263 = vmatprep.subr.bf16.mxu0 %v3931_v25  ;;  %v4007_v24 = vld [vmem:[#allocation6 + $0x920] ss:$16 sps:$4 sm:$0xff]   ;;  %v4010_v25 = vld [vmem:[#allocation6 + $0x128] ss:$16 sps:$4 sm:$0xff]  }
  0xee   :  { %2304 = vmatprep.subr.bf16.mxu1 %v3934_v26  ;;  %2293 = vmatprep.mubr.bf16.mxu0 %v4638_v28  ;;  %v4015_v26 = vld [vmem:[#allocation6 + $0x904] ss:$16 sps:$4 sm:$0xff]  }
  0xef   :  { %2334 = vmatprep.mubr.bf16.mxu1 %v4614_v50  ;;  %v3950_v50 = vld [vmem:[#allocation6 + $0x68] ss:$16 sps:$4 sm:$0xff]  }
  0xf0   :  { %2264 = vmatpush1.bf16.msra.mxu0 %v3929_v29  ;;  %v4013_v29 = vld [vmem:[#allocation6 + $0x900] ss:$16 sps:$4 sm:$0xff]  }
  0xf1   :  { %2305 = vmatpush1.bf16.msra.mxu1 %v3932_v30  ;;  %2265 = vmatprep.subr.bf16.mxu0 %v3937_v31  ;;  %v4016_v30 = vld [vmem:[#allocation6 + $0x108] ss:$16 sps:$4 sm:$0xff]   ;;  %v143_v31 = vld [vmem:[#allocation3 + $0x40] sm:$0xff] }
  0xf2   :  { %2306 = vmatprep.subr.bf16.mxu1 %v3940_v32  ;;  %v4021_v32 = vld [vmem:[#allocation6 + $0x2ec] ss:$16 sps:$4 sm:$0xff]  }
  0xf4   :  { %2266 = vmatpush1.bf16.msra.mxu0 %v3935_v33  ;;  %v4024_v33 = vld [vmem:[#allocation6 + $0x4ec] ss:$16 sps:$4 sm:$0xff]  }
  0xf5   :  { %2307 = vmatpush1.bf16.msra.mxu1 %v3938_v34  ;;  %2267 = vmatprep.subr.bf16.mxu0 %v3943_v35  ;;  %v4642_v34 = vpack.c.bf16 %v143_v31, %v143_v31  ;;  %v4019_v35 = vld [vmem:[#allocation6 + $0x2e8] ss:$16 sps:$4 sm:$0xff]  }
  0xf6   :  { %2308 = vmatprep.subr.bf16.mxu1 %v3946_v36  ;;  %v4022_v36 = vld [vmem:[#allocation6 + $0x4e8] ss:$16 sps:$4 sm:$0xff]  }
  0xf8   :  { %2268 = vmatpush1.bf16.msra.mxu0 %v3941_v37  ;;  %v4027_v37 = vld [vmem:[#allocation6 + $0x2cc] ss:$16 sps:$4 sm:$0xff]  }
  0xf9   :  { %2309 = vmatpush1.bf16.msra.mxu1 %v3944_v39  ;;  %2269 = vmatprep.subr.bf16.mxu0 %v3949_v40  ;;  %v4030_v39 = vld [vmem:[#allocation6 + $0x4cc] ss:$16 sps:$4 sm:$0xff]   ;;  %v4025_v40 = vld [vmem:[#allocation6 + $0x2c8] ss:$16 sps:$4 sm:$0xff]  }
  0xfa   :  { %2310 = vmatprep.subr.bf16.mxu1 %v3952_v42  ;;  %v4028_v42 = vld [vmem:[#allocation6 + $0x4c8] ss:$16 sps:$4 sm:$0xff]  }
  0xfc   :  { %2270 = vmatpush1.bf16.msra.mxu0 %v3947_v43  ;;  %v4033_v43 = vld [vmem:[#allocation6 + $0x2ac] ss:$16 sps:$4 sm:$0xff]  }
  0xfd   :  { %2311 = vmatpush1.bf16.msra.mxu1 %v3950_v50  ;;  %2271 = vmatprep.subr.bf16.mxu0 %v3955_v44  ;;  %v4036_v50 = vld [vmem:[#allocation6 + $0x4ac] ss:$16 sps:$4 sm:$0xff]   ;;  %v4031_v44 = vld [vmem:[#allocation6 + $0x2a8] ss:$16 sps:$4 sm:$0xff]  }
  0xfe   :  { %2312 = vmatprep.subr.bf16.mxu1 %v3958_v45  ;;  %v4034_v45 = vld [vmem:[#allocation6 + $0x4a8] ss:$16 sps:$4 sm:$0xff]  }
 0x100   :  { %2272 = vmatpush1.bf16.msra.mxu0 %v3953_v46  ;;  %v4039_v46 = vld [vmem:[#allocation6 + $0x28c] ss:$16 sps:$4 sm:$0xff]  }
 0x101   :  { %2313 = vmatpush1.bf16.msra.mxu1 %v3956_v47  ;;  %2273 = vmatprep.subr.bf16.mxu0 %v3961_v48  ;;  %v4037_v47 = vld [vmem:[#allocation6 + $0x288] ss:$16 sps:$4 sm:$0xff]  }
 0x102   :  { %2314 = vmatprep.subr.bf16.mxu1 %v3964_v49  ;;  %v4040_v48 = vld [vmem:[#allocation6 + $0x488] ss:$16 sps:$4 sm:$0xff]   ;;  %v4045_v49 = vld [vmem:[#allocation6 + $0x26c] ss:$16 sps:$4 sm:$0xff]  }
 0x104   :  { %2274 = vmatpush1.bf16.msra.mxu0 %v3959_v51  ;;  %v4048_v51 = vld [vmem:[#allocation6 + $0x46c] ss:$16 sps:$4 sm:$0xff]  }
 0x105   :  { %2315 = vmatpush1.bf16.msra.mxu1 %v3962_v52  ;;  %2275 = vmatprep.subr.bf16.mxu0 %v3967_v54  ;;  %v4043_v52 = vld [vmem:[#allocation6 + $0x268] ss:$16 sps:$4 sm:$0xff]   ;;  %v4054_v54 = vld [vmem:[#allocation6 + $0x44c] ss:$16 sps:$4 sm:$0xff]  }
 0x106   :  { %2316 = vmatprep.subr.bf16.mxu1 %v3970_v55  ;;  %v4049_v55 = vld [vmem:[#allocation6 + $0x248] ss:$16 sps:$4 sm:$0xff]  }
 0x108   :  { %2276 = vmatpush1.bf16.msra.mxu0 %v3965_v56  ;;  %v4052_v56 = vld [vmem:[#allocation6 + $0x448] ss:$16 sps:$4 sm:$0xff]  }
 0x109   :  { %2317 = vmatpush1.bf16.msra.mxu1 %v3968_v57  ;;  %2277 = vmatprep.subr.bf16.mxu0 %v3973_v58  ;;  %v4057_v57 = vld [vmem:[#allocation6 + $0x22c] ss:$16 sps:$4 sm:$0xff]  }
 0x10a   :  { %2318 = vmatprep.subr.bf16.mxu1 %v3976_v59  ;;  %v4060_v58 = vld [vmem:[#allocation6 + $0x42c] ss:$16 sps:$4 sm:$0xff]   ;;  %v4055_v59 = vld [vmem:[#allocation6 + $0x228] ss:$16 sps:$4 sm:$0xff]  }
 0x10c   :  { %2278 = vmatpush2.bf16.msra.mxu0 %v3971_v60  ;;  %v4058_v60 = vld [vmem:[#allocation6 + $0x428] ss:$16 sps:$4 sm:$0xff]  }
 0x10d   :  { %2319 = vmatpush2.bf16.msra.mxu1 %v3974_v61  ;;  %2279 = vmatprep.subr.bf16.mxu0 %v3979_v62  ;;  %v4063_v61 = vld [vmem:[#allocation6 + $0x20c] ss:$16 sps:$4 sm:$0xff]  }
 0x10e   :  { %2320 = vmatprep.subr.bf16.mxu1 %v3982_v63  ;;  %v4066_v62 = vld [vmem:[#allocation6 + $0x40c] ss:$16 sps:$4 sm:$0xff]   ;;  %v4061_v63 = vld [vmem:[#allocation6 + $0x208] ss:$16 sps:$4 sm:$0xff]  }
 0x110   :  { %2280 = vmatpush2.bf16.msra.mxu0 %v3977_v0  ;;  %v4064_v0 = vld [vmem:[#allocation6 + $0x408] ss:$16 sps:$4 sm:$0xff]  }
 0x111   :  { %2321 = vmatpush2.bf16.msra.mxu1 %v3980_v1  ;;  %2281 = vmatprep.subr.bf16.mxu0 %v3985_v2  ;;  %v4069_v1 = vld [vmem:[#allocation6 + $0x3ec] ss:$16 sps:$4 sm:$0xff]  }
 0x112   :  { %2322 = vmatprep.subr.bf16.mxu1 %v3988_v3  ;;  %v4072_v2 = vld [vmem:[#allocation6 + $0x5ec] ss:$16 sps:$4 sm:$0xff]   ;;  %v4067_v3 = vld [vmem:[#allocation6 + $0x3e8] ss:$16 sps:$4 sm:$0xff]  }
 0x114   :  { %2282 = vmatpush2.bf16.msra.mxu0 %v3983_v4  ;;  %v4070_v4 = vld [vmem:[#allocation6 + $0x5e8] ss:$16 sps:$4 sm:$0xff]  }
 0x115   :  { %2323 = vmatpush2.bf16.msra.mxu1 %v3986_v5  ;;  %2283 = vmatprep.subr.bf16.mxu0 %v3991_v6  ;;  %v4075_v5 = vld [vmem:[#allocation6 + $0x3cc] ss:$16 sps:$4 sm:$0xff]  }
 0x116   :  { %2324 = vmatprep.subr.bf16.mxu1 %v3994_v7  ;;  %v4078_v6 = vld [vmem:[#allocation6 + $0x5cc] ss:$16 sps:$4 sm:$0xff]   ;;  %v4073_v7 = vld [vmem:[#allocation6 + $0x3c8] ss:$16 sps:$4 sm:$0xff]  }
 0x118   :  { %2284 = vmatpush2.bf16.msra.mxu0 %v3989_v8  ;;  %v4076_v8 = vld [vmem:[#allocation6 + $0x5c8] ss:$16 sps:$4 sm:$0xff]  }
 0x119   :  { %2325 = vmatpush2.bf16.msra.mxu1 %v3992_v11  ;;  %2285 = vmatprep.subr.bf16.mxu0 %v3997_v12  ;;  %v4081_v11 = vld [vmem:[#allocation6 + $0x3ac] ss:$16 sps:$4 sm:$0xff]  }
 0x11a   :  { %2326 = vmatprep.subr.bf16.mxu1 %v4000_v13  ;;  %v4084_v12 = vld [vmem:[#allocation6 + $0x5ac] ss:$16 sps:$4 sm:$0xff]   ;;  %v4079_v13 = vld [vmem:[#allocation6 + $0x3a8] ss:$16 sps:$4 sm:$0xff]  }
 0x11c   :  { %2286 = vmatpush2.bf16.msra.mxu0 %v3995_v14  ;;  %v4082_v14 = vld [vmem:[#allocation6 + $0x5a8] ss:$16 sps:$4 sm:$0xff]  }
 0x11d   :  { %2327 = vmatpush2.bf16.msra.mxu1 %v3998_v15  ;;  %2287 = vmatprep.subr.bf16.mxu0 %v4003_v16  ;;  %v4087_v15 = vld [vmem:[#allocation6 + $0x38c] ss:$16 sps:$4 sm:$0xff]  }
 0x11e   :  { %2328 = vmatprep.subr.bf16.mxu1 %v4006_v17  ;;  %v4090_v16 = vld [vmem:[#allocation6 + $0x58c] ss:$16 sps:$4 sm:$0xff]   ;;  %v4085_v17 = vld [vmem:[#allocation6 + $0x388] ss:$16 sps:$4 sm:$0xff]  }
 0x120   :  { %2288 = vmatpush2.bf16.msra.mxu0 %v4001_v18  ;;  %v4088_v18 = vld [vmem:[#allocation6 + $0x588] ss:$16 sps:$4 sm:$0xff]  }
 0x121   :  { %2329 = vmatpush2.bf16.msra.mxu1 %v4004_v19  ;;  %2289 = vmatprep.subr.bf16.mxu0 %v4009_v20  ;;  %v4093_v19 = vld [vmem:[#allocation6 + $0x36c] ss:$16 sps:$4 sm:$0xff]  }
 0x122   :  { %2330 = vmatprep.subr.bf16.mxu1 %v4012_v23  ;;  %v4096_v20 = vld [vmem:[#allocation6 + $0x56c] ss:$16 sps:$4 sm:$0xff]   ;;  %v4091_v23 = vld [vmem:[#allocation6 + $0x368] ss:$16 sps:$4 sm:$0xff]  }
 0x124   :  { %2290 = vmatpush2.bf16.msra.mxu0 %v4007_v24  ;;  %v4094_v24 = vld [vmem:[#allocation6 + $0x568] ss:$16 sps:$4 sm:$0xff]  }
 0x125   :  { %2331 = vmatpush2.bf16.msra.mxu1 %v4010_v25  ;;  %2291 = vmatprep.subr.bf16.mxu0 %v4015_v26  ;;  %v477_v25 = vlaneseq  ;;  %v4099_v26 = vld [vmem:[#allocation6 + $0x34c] ss:$16 sps:$4 sm:$0xff]  }
 0x126   :  { %2332 = vmatprep.subr.bf16.mxu1 %v4018_v27  ;;  %v4102_v27 = vld [vmem:[#allocation6 + $0x54c] ss:$16 sps:$4 sm:$0xff]  }
 0x127   :  { %v4648_v31 = vshrl.u32 %v477_v25, 7  ;;  %v4160_v25 = vld [vmem:[#allocation6 + $0x808] ss:$16 sps:$4 sm:$0xff]  }
 0x128   :  { %2292 = vmatpush2.bf16.msra.mxu0 %v4013_v29  ;;  %v4097_v29 = vld [vmem:[#allocation6 + $0x348] ss:$16 sps:$4 sm:$0xff]  }
 0x129   :  { %2333 = vmatpush2.bf16.msra.mxu1 %v4016_v30  ;;  %2343 = vmatprep.subr.bf16.mxu0 %v4021_v32  ;;  %v4100_v30 = vld [vmem:[#allocation6 + $0x548] ss:$16 sps:$4 sm:$0xff]   ;;  %v4105_v32 = vld [vmem:[#allocation6 + $0x32c] ss:$16 sps:$4 sm:$0xff]  }
 0x12a   :  { %2384 = vmatprep.subr.bf16.mxu1 %v4024_v33  ;;  %v4108_v33 = vld [vmem:[#allocation6 + $0x52c] ss:$16 sps:$4 sm:$0xff]  }
 0x12b   :  { %2294 = vmatmul.mubr.bf16.vlgmr.msra.gmra.mxu0 %v4642_v34 }
 0x12c   :  { %2335 = vmatmul.mubr.bf16.vlgmr.msra.gmra.mxu1 %v4620_v9  ;;  %2344 = vmatpush1.bf16.msra.mxu0 %v4019_v35  ;;  %v4042_v9 = vld [vmem:[#allocation6 + $0x48c] ss:$16 sps:$4 sm:$0xff]   ;;  %v4103_v35 = vld [vmem:[#allocation6 + $0x328] ss:$16 sps:$4 sm:$0xff]  }
 0x12d   :  { %2385 = vmatpush1.bf16.msra.mxu1 %v4022_v36  ;;  %2345 = vmatprep.subr.bf16.mxu0 %v4027_v37  ;;  %v4106_v36 = vld [vmem:[#allocation6 + $0x528] ss:$16 sps:$4 sm:$0xff]   ;;  %v4111_v37 = vld [vmem:[#allocation6 + $0x30c] ss:$16 sps:$4 sm:$0xff]  }
 0x12e   :  { %2386 = vmatprep.subr.bf16.mxu1 %v4030_v39  ;;  %2375 = vmatprep.mubr.bf16.mxu0 %v4616_v53  ;;  %v4046_v53 = vld [vmem:[#allocation6 + $0x468] ss:$16 sps:$4 sm:$0xff]   ;;  %v4114_v39 = vld [vmem:[#allocation6 + $0x50c] ss:$16 sps:$4 sm:$0xff]  }
 0x12f   :  { %2416 = vmatprep.mubr.bf16.mxu1 %v4626_v38  ;;  %v4051_v38 = vld [vmem:[#allocation6 + $0x24c] ss:$16 sps:$4 sm:$0xff]  }
 0x130   :  { %2346 = vmatpush1.bf16.msra.mxu0 %v4025_v40  ;;  %v4651_v40 = vsub.s32 0, %v4648_v31 }
 0x131   :  { %2387 = vmatpush1.bf16.msra.mxu1 %v4028_v42  ;;  %2347 = vmatprep.subr.bf16.mxu0 %v4033_v43  ;;  %v483_v42 = vsub.s32 1, %v4648_v31  ;;  %v4109_v43 = vld [vmem:[#allocation6 + $0x308] ss:$16 sps:$4 sm:$0xff]  }
 0x132   :  { %2388 = vmatprep.subr.bf16.mxu1 %v4036_v50  ;;  %v4112_v50 = vld [vmem:[#allocation6 + $0x508] ss:$16 sps:$4 sm:$0xff]  }
 0x134   :  { %2348 = vmatpush1.bf16.msra.mxu0 %v4031_v44  ;;  %v4654_v44 = vld [vmem:[#allocation8] sm:$0xf] }
 0x135   :  { %2389 = vmatpush1.bf16.msra.mxu1 %v4034_v45  ;;  %2349 = vmatprep.subr.bf16.mxu0 %v4039_v46  ;;  %v4117_v45 = vld [vmem:[#allocation6 + $0x6ec] ss:$16 sps:$4 sm:$0xff]  }
 0x136   :  { %2390 = vmatprep.subr.bf16.mxu1 %v4042_v9  ;;  %v4120_v46 = vld [vmem:[#allocation6 + $0x8ec] ss:$16 sps:$4 sm:$0xff]   ;;  %v4115_v9 = vld [vmem:[#allocation6 + $0x6e8] ss:$16 sps:$4 sm:$0xff]  }
 0x138   :  { %2350 = vmatpush1.bf16.msra.mxu0 %v4037_v47  ;;  %v4118_v47 = vld [vmem:[#allocation6 + $0x8e8] ss:$16 sps:$4 sm:$0xff]  }
 0x139   :  { %2391 = vmatpush1.bf16.msra.mxu1 %v4040_v48  ;;  %2351 = vmatprep.subr.bf16.mxu0 %v4045_v49  ;;  %v4123_v48 = vld [vmem:[#allocation6 + $0x6cc] ss:$16 sps:$4 sm:$0xff]  }
 0x13a   :  { %2392 = vmatprep.subr.bf16.mxu1 %v4048_v51  ;;  %v4126_v49 = vld [vmem:[#allocation6 + $0x8cc] ss:$16 sps:$4 sm:$0xff]   ;;  %v480_v51 = vrot.slane %v4654_v44, %v4651_v40 }
 0x13c   :  { %2352 = vmatpush1.bf16.msra.mxu0 %v4043_v52  ;;  %v484_v52 = vrot.slane %v4654_v44, %v483_v42 }
 0x13d   :  { %2393 = vmatpush1.bf16.msra.mxu1 %v4046_v53  ;;  %2353 = vmatprep.subr.bf16.mxu0 %v4051_v38 }
 0x13e   :  { %2394 = vmatprep.subr.bf16.mxu1 %v4054_v54 }
 0x140   :  { %2354 = vmatpush1.bf16.msra.mxu0 %v4049_v55  ;;  %v4121_v55 = vld [vmem:[#allocation6 + $0x6c8] ss:$16 sps:$4 sm:$0xff]  }
 0x141   :  { %2395 = vmatpush1.bf16.msra.mxu1 %v4052_v56  ;;  %2355 = vmatprep.subr.bf16.mxu0 %v4057_v57  ;;  %v4124_v56 = vld [vmem:[#allocation6 + $0x8c8] ss:$16 sps:$4 sm:$0xff]  }
 0x142   :  { %2396 = vmatprep.subr.bf16.mxu1 %v4060_v58 }
 0x144   :  { %2356 = vmatpush1.bf16.msra.mxu0 %v4055_v59  ;;  %v4129_v59 = vld [vmem:[#allocation6 + $0x6ac] ss:$16 sps:$4 sm:$0xff]  }
 0x145   :  { %2397 = vmatpush1.bf16.msra.mxu1 %v4058_v60  ;;  %2357 = vmatprep.subr.bf16.mxu0 %v4063_v61  ;;  %v4132_v60 = vld [vmem:[#allocation6 + $0x8ac] ss:$16 sps:$4 sm:$0xff]  }
 0x146   :  { %2398 = vmatprep.subr.bf16.mxu1 %v4066_v62 }
 0x148   :  { %2358 = vmatpush1.bf16.msra.mxu0 %v4061_v63 }
 0x149   :  { %2399 = vmatpush1.bf16.msra.mxu1 %v4064_v0  ;;  %2359 = vmatprep.subr.bf16.mxu0 %v4069_v1  ;;  %v4127_v0 = vld [vmem:[#allocation6 + $0x6a8] ss:$16 sps:$4 sm:$0xff]  }
 0x14a   :  { %2400 = vmatprep.subr.bf16.mxu1 %v4072_v2  ;;  %v4130_v1 = vld [vmem:[#allocation6 + $0x8a8] ss:$16 sps:$4 sm:$0xff]  }
 0x14c   :  { %2360 = vmatpush2.bf16.msra.mxu0 %v4067_v3 }
 0x14d   :  { %2401 = vmatpush2.bf16.msra.mxu1 %v4070_v4  ;;  %2361 = vmatprep.subr.bf16.mxu0 %v4075_v5  ;;  %v4135_v4 = vld [vmem:[#allocation6 + $0x68c] ss:$16 sps:$4 sm:$0xff]  }
 0x14e   :  { %2402 = vmatprep.subr.bf16.mxu1 %v4078_v6  ;;  %v4138_v5 = vld [vmem:[#allocation6 + $0x88c] ss:$16 sps:$4 sm:$0xff]   ;;  %v4133_v6 = vld [vmem:[#allocation6 + $0x688] ss:$16 sps:$4 sm:$0xff]  }
 0x150   :  { %2362 = vmatpush2.bf16.msra.mxu0 %v4073_v7  ;;  %v4144_v7 = vld [vmem:[#allocation6 + $0x86c] ss:$16 sps:$4 sm:$0xff]  }
 0x151   :  { %2403 = vmatpush2.bf16.msra.mxu1 %v4076_v8  ;;  %2363 = vmatprep.subr.bf16.mxu0 %v4081_v11  ;;  %v4139_v8 = vld [vmem:[#allocation6 + $0x668] ss:$16 sps:$4 sm:$0xff]  }
 0x152   :  { %2404 = vmatprep.subr.bf16.mxu1 %v4084_v12  ;;  %v4142_v11 = vld [vmem:[#allocation6 + $0x868] ss:$16 sps:$4 sm:$0xff]   ;;  %v4147_v12 = vld [vmem:[#allocation6 + $0x64c] ss:$16 sps:$4 sm:$0xff]  }
 0x154   :  { %2364 = vmatpush2.bf16.msra.mxu0 %v4079_v13  ;;  %v4150_v13 = vld [vmem:[#allocation6 + $0x84c] ss:$16 sps:$4 sm:$0xff]  }
 0x155   :  { %2405 = vmatpush2.bf16.msra.mxu1 %v4082_v14  ;;  %2365 = vmatprep.subr.bf16.mxu0 %v4087_v15  ;;  %v4145_v14 = vld [vmem:[#allocation6 + $0x648] ss:$16 sps:$4 sm:$0xff]  }
 0x156   :  { %2406 = vmatprep.subr.bf16.mxu1 %v4090_v16  ;;  %v4148_v15 = vld [vmem:[#allocation6 + $0x848] ss:$16 sps:$4 sm:$0xff]   ;;  %v4153_v16 = vld [vmem:[#allocation6 + $0x62c] ss:$16 sps:$4 sm:$0xff]  }
 0x158   :  { %2366 = vmatpush2.bf16.msra.mxu0 %v4085_v17  ;;  %v4156_v17 = vld [vmem:[#allocation6 + $0x82c] ss:$16 sps:$4 sm:$0xff]  }
 0x159   :  { %2407 = vmatpush2.bf16.msra.mxu1 %v4088_v18  ;;  %2367 = vmatprep.subr.bf16.mxu0 %v4093_v19  ;;  %v4151_v18 = vld [vmem:[#allocation6 + $0x628] ss:$16 sps:$4 sm:$0xff]  }
 0x15a   :  { %2408 = vmatprep.subr.bf16.mxu1 %v4096_v20  ;;  %v4154_v19 = vld [vmem:[#allocation6 + $0x828] ss:$16 sps:$4 sm:$0xff]   ;;  %v4159_v20 = vld [vmem:[#allocation6 + $0x60c] ss:$16 sps:$4 sm:$0xff]  }
 0x15c   :  { %2368 = vmatpush2.bf16.msra.mxu0 %v4091_v23  ;;  %v4162_v23 = vld [vmem:[#allocation6 + $0x80c] ss:$16 sps:$4 sm:$0xff]  }
 0x15d   :  { %2409 = vmatpush2.bf16.msra.mxu1 %v4094_v24  ;;  %2369 = vmatprep.subr.bf16.mxu0 %v4099_v26  ;;  %v4157_v24 = vld [vmem:[#allocation6 + $0x608] ss:$16 sps:$4 sm:$0xff]   ;;  %v4165_v26 = vld [vmem:[#allocation6 + $0x7ec] ss:$16 sps:$4 sm:$0xff]  }
 0x15e   :  { %2410 = vmatprep.subr.bf16.mxu1 %v4102_v27  ;;  %v4168_v27 = vld [vmem:[#allocation6 + $0x9ec] ss:$16 sps:$4 sm:$0xff]  }
 0x160   :  { %2370 = vmatpush2.bf16.msra.mxu0 %v4097_v29  ;;  %v4163_v29 = vld [vmem:[#allocation6 + $0x7e8] ss:$16 sps:$4 sm:$0xff]  }
 0x161   :  { %2411 = vmatpush2.bf16.msra.mxu1 %v4100_v30  ;;  %2371 = vmatprep.subr.bf16.mxu0 %v4105_v32  ;;  %v4166_v30 = vld [vmem:[#allocation6 + $0x9e8] ss:$16 sps:$4 sm:$0xff]   ;;  %v4171_v32 = vld [vmem:[#allocation6 + $0x7cc] ss:$16 sps:$4 sm:$0xff]  }
 0x162   :  { %2412 = vmatprep.subr.bf16.mxu1 %v4108_v33  ;;  %v4174_v33 = vld [vmem:[#allocation6 + $0x9cc] ss:$16 sps:$4 sm:$0xff]  }
 0x164   :  { %2372 = vmatpush2.bf16.msra.mxu0 %v4103_v35  ;;  %v4169_v35 = vld [vmem:[#allocation6 + $0x7c8] ss:$16 sps:$4 sm:$0xff]  }
 0x165   :  { %2413 = vmatpush2.bf16.msra.mxu1 %v4106_v36  ;;  %2373 = vmatprep.subr.bf16.mxu0 %v4111_v37  ;;  %v4172_v36 = vld [vmem:[#allocation6 + $0x9c8] ss:$16 sps:$4 sm:$0xff]   ;;  %v4177_v37 = vld [vmem:[#allocation6 + $0x7ac] ss:$16 sps:$4 sm:$0xff]  }
 0x166   :  { %2414 = vmatprep.subr.bf16.mxu1 %v4114_v39  ;;  %v4180_v39 = vld [vmem:[#allocation6 + $0x9ac] ss:$16 sps:$4 sm:$0xff]  }
 0x168   :  { %2374 = vmatpush2.bf16.msra.mxu0 %v4109_v43  ;;  %v4175_v43 = vld [vmem:[#allocation6 + $0x7a8] ss:$16 sps:$4 sm:$0xff]  }
 0x169   :  { %2415 = vmatpush2.bf16.msra.mxu1 %v4112_v50  ;;  %2425 = vmatprep.subr.bf16.mxu0 %v4117_v45  ;;  %v4178_v50 = vld [vmem:[#allocation6 + $0x9a8] ss:$16 sps:$4 sm:$0xff]   ;;  %v4183_v45 = vld [vmem:[#allocation6 + $0x78c] ss:$16 sps:$4 sm:$0xff]  }
 0x16a   :  { %2466 = vmatprep.subr.bf16.mxu1 %v4120_v46  ;;  %v4186_v46 = vld [vmem:[#allocation6 + $0x98c] ss:$16 sps:$4 sm:$0xff]  }
 0x16b   :  { %v2131_v53 = vpop.f32.mrf.mxu0  ;;  %2376 = vmatmul.mubr.bf16.vlgmr.msra.gmra.mxu0 %v4622_v10 }
 0x16c   :  { %v2172_v38 = vpop.f32.mrf.mxu1  ;;  %2417 = vmatmul.mubr.bf16.vlgmr.msra.gmra.mxu1 %v4632_v21  ;;  %v2132_v54 = vadd.f32 %v2131_v53, %v480_v51  ;;  %2426 = vmatpush1.bf16.msra.mxu0 %v4115_v9  ;;  %v4181_v9 = vld [vmem:[#allocation6 + $0x788] ss:$16 sps:$4 sm:$0xff]   ;;  %v4195_v53 = vld [vmem:[#allocation6 + $0x74c] ss:$16 sps:$4 sm:$0xff]  }
 0x16d   :  { %2467 = vmatpush1.bf16.msra.mxu1 %v4118_v47  ;;  %v2133_v57 = vpop.f32.mrf.mxu0  ;;  %2427 = vmatprep.subr.bf16.mxu0 %v4123_v48  ;;  %v4184_v47 = vld [vmem:[#allocation6 + $0x988] ss:$16 sps:$4 sm:$0xff]   ;;  %v4189_v48 = vld [vmem:[#allocation6 + $0x76c] ss:$16 sps:$4 sm:$0xff]  }
 0x16e   :  { %v2174_v58 = vpop.f32.mrf.mxu1  ;;  %2468 = vmatprep.subr.bf16.mxu1 %v4126_v49  ;;  %v4663_v61 = vadd.f32 %v2172_v38, %v2132_v54  ;;  %v2134_v62 = vadd.f32 %v2133_v57, %v484_v52  ;;  %2457 = vmatprep.mubr.bf16.mxu0 %v4628_v41  ;;  %v4136_v41 = vld [vmem:[#allocation6 + $0x888] ss:$16 sps:$4 sm:$0xff]   ;;  %v4192_v49 = vld [vmem:[#allocation6 + $0x96c] ss:$16 sps:$4 sm:$0xff]  }
 0x16f   :  { %2498 = vmatprep.mubr.bf16.mxu1 %v4638_v28  ;;  %v2135_v10 = vpop.f32.mrf.mxu0  ;;  %v4141_v28 = vld [vmem:[#allocation6 + $0x66c] ss:$16 sps:$4 sm:$0xff]   ;;  %v4187_v51 = vld [vmem:[#allocation6 + $0x768] ss:$16 sps:$4 sm:$0xff]  }
 0x170   :  { %v2176_v21 = vpop.f32.mrf.mxu1  ;;  %v4667_v63 = vadd.f32 %v2174_v58, %v2134_v62  ;;  %2428 = vmatpush1.bf16.msra.mxu0 %v4121_v55  ;;  %v4190_v52 = vld [vmem:[#allocation6 + $0x968] ss:$16 sps:$4 sm:$0xff]   ;;  %v4198_v38 = vld [vmem:[#allocation6 + $0x94c] ss:$16 sps:$4 sm:$0xff]  }
 0x171   :  { %2469 = vmatpush1.bf16.msra.mxu1 %v4124_v56  ;;  %v2136_v2 = vpop.f32.mrf.mxu0  ;;  %2429 = vmatprep.subr.bf16.mxu0 %v4129_v59  ;;  %v4193_v54 = vld [vmem:[#allocation6 + $0x748] ss:$16 sps:$4 sm:$0xff]   ;;  %v4201_v56 = vld [vmem:[#allocation6 + $0x72c] ss:$16 sps:$4 sm:$0xff]  }
 0x172   :  { %v2177_v3 = vpop.f32.mrf.mxu1  ;;  %2470 = vmatprep.subr.bf16.mxu1 %v4132_v60  ;;  %v4196_v55 = vld [vmem:[#allocation6 + $0x948] ss:$16 sps:$4 sm:$0xff]   ;;  %v4204_v57 = vld [vmem:[#allocation6 + $0x92c] ss:$16 sps:$4 sm:$0xff]  }
 0x173   :  { %v4199_v58 = vld [vmem:[#allocation6 + $0x728] ss:$16 sps:$4 sm:$0xff]   ;;  %v4207_v60 = vld [vmem:[#allocation6 + $0x70c] ss:$16 sps:$4 sm:$0xff]  }
 0x174   :  { %2430 = vmatpush1.bf16.msra.mxu0 %v4127_v0  ;;  %v4202_v59 = vld [vmem:[#allocation6 + $0x928] ss:$16 sps:$4 sm:$0xff]   ;;  %v4210_v62 = vld [vmem:[#allocation6 + $0x90c] ss:$16 sps:$4 sm:$0xff]  }
 0x175   :  { %2471 = vmatpush1.bf16.msra.mxu1 %v4130_v1  ;;  %2431 = vmatprep.subr.bf16.mxu0 %v4135_v4  ;;  %v4205_v10 = vld [vmem:[#allocation6 + $0x708] ss:$16 sps:$4 sm:$0xff]   ;;  %v4211_v1 = vld [vmem:[#allocation9 + $0x70] ss:$8 sps:$4 sm:$0xff]  }
 0x176   :  { %2472 = vmatprep.subr.bf16.mxu1 %v4138_v5  ;;  %v4208_v21 = vld [vmem:[#allocation6 + $0x908] ss:$16 sps:$4 sm:$0xff]  }
 0x177   :  { %v4213_v0 = vld [vmem:[#allocation9 + $0x74] ss:$8 sps:$4 sm:$0xff]   ;;  %v4216_v2 = vld [vmem:[#allocation9 + $0x64] ss:$8 sps:$4 sm:$0xff]  }
 0x178   :  { %2432 = vmatpush1.bf16.msra.mxu0 %v4133_v6  ;;  %v4214_v6 = vld [vmem:[#allocation9 + $0x60] ss:$8 sps:$4 sm:$0xff]  }
 0x179   :  { %2473 = vmatpush1.bf16.msra.mxu1 %v4136_v41  ;;  %2433 = vmatprep.subr.bf16.mxu0 %v4141_v28 }
 0x17a   :  { %2474 = vmatprep.subr.bf16.mxu1 %v4144_v7  ;;  %v4219_v7 = vld [vmem:[#allocation9 + $0x54] ss:$8 sps:$4 sm:$0xff]  }
 0x17c   :  { %2434 = vmatpush1.bf16.msra.mxu0 %v4139_v8 }
 0x17d   :  { %2475 = vmatpush1.bf16.msra.mxu1 %v4142_v11  ;;  %2435 = vmatprep.subr.bf16.mxu0 %v4147_v12 }
 0x17e   :  { %2476 = vmatprep.subr.bf16.mxu1 %v4150_v13  ;;  %v4217_v13 = vld [vmem:[#allocation9 + $0x50] ss:$8 sps:$4 sm:$0xff]  }
 0x180   :  { %2436 = vmatpush1.bf16.msra.mxu0 %v4145_v14 }
 0x181   :  { %2477 = vmatpush1.bf16.msra.mxu1 %v4148_v15  ;;  %2437 = vmatprep.subr.bf16.mxu0 %v4153_v16  ;;  %v4259_v15 = vld [vmem:[#allocation9 + $0x170] ss:$8 sps:$4 sm:$0xff]   ;;  %v4264_v16 = vld [vmem:[#allocation9 + $0x164] ss:$8 sps:$4 sm:$0xff]  }
 0x182   :  { %2478 = vmatprep.subr.bf16.mxu1 %v4156_v17  ;;  %v4220_v17 = vld [vmem:[#allocation9 + $0x40] ss:$8 sps:$4 sm:$0xff]  }
 0x184   :  { %2438 = vmatpush1.bf16.msra.mxu0 %v4151_v18  ;;  %v4262_v18 = vld [vmem:[#allocation9 + $0x160] ss:$8 sps:$4 sm:$0xff]  }
 0x185   :  { %2479 = vmatpush1.bf16.msra.mxu1 %v4154_v19  ;;  %2439 = vmatprep.subr.bf16.mxu0 %v4159_v20  ;;  %v4225_v19 = vld [vmem:[#allocation9 + $0x34] ss:$8 sps:$4 sm:$0xff]  }
 0x186   :  { %2480 = vmatprep.subr.bf16.mxu1 %v4162_v23  ;;  %v4267_v20 = vld [vmem:[#allocation9 + $0x154] ss:$8 sps:$4 sm:$0xff]   ;;  %v4223_v23 = vld [vmem:[#allocation9 + $0x30] ss:$8 sps:$4 sm:$0xff]  }
 0x188   :  { %2440 = vmatpush1.bf16.msra.mxu0 %v4157_v24  ;;  %v4265_v24 = vld [vmem:[#allocation9 + $0x150] ss:$8 sps:$4 sm:$0xff]  }
 0x189   :  { %2481 = vmatpush1.bf16.msra.mxu1 %v4160_v25  ;;  %2441 = vmatprep.subr.bf16.mxu0 %v4165_v26  ;;  %v4228_v25 = vld [vmem:[#allocation9 + $0x24] ss:$8 sps:$4 sm:$0xff]  }
 0x18a   :  { %2482 = vmatprep.subr.bf16.mxu1 %v4168_v27  ;;  %v4270_v26 = vld [vmem:[#allocation9 + $0x144] ss:$8 sps:$4 sm:$0xff]   ;;  %v4226_v27 = vld [vmem:[#allocation9 + $0x20] ss:$8 sps:$4 sm:$0xff]  }
 0x18c   :  { %2442 = vmatpush2.bf16.msra.mxu0 %v4163_v29  ;;  %v4268_v29 = vld [vmem:[#allocation9 + $0x140] ss:$8 sps:$4 sm:$0xff]  }
 0x18d   :  { %2483 = vmatpush2.bf16.msra.mxu1 %v4166_v30  ;;  %2443 = vmatprep.subr.bf16.mxu0 %v4171_v32  ;;  %v4231_v30 = vld [vmem:[#allocation9 + $0x14] ss:$8 sps:$4 sm:$0xff]  }
 0x18e   :  { %2484 = vmatprep.subr.bf16.mxu1 %v4174_v33  ;;  %v4273_v32 = vld [vmem:[#allocation9 + $0x134] ss:$8 sps:$4 sm:$0xff]   ;;  %v4229_v33 = vld [vmem:[#allocation9 + $0x10] ss:$8 sps:$4 sm:$0xff]  }
 0x190   :  { %2444 = vmatpush2.bf16.msra.mxu0 %v4169_v35  ;;  %v4271_v35 = vld [vmem:[#allocation9 + $0x130] ss:$8 sps:$4 sm:$0xff]  }
 0x191   :  { %2485 = vmatpush2.bf16.msra.mxu1 %v4172_v36  ;;  %2445 = vmatprep.subr.bf16.mxu0 %v4177_v37  ;;  %v4234_v36 = vld [vmem:[#allocation9 + $0x4] ss:$8 sps:$4 sm:$0xff]  }
 0x192   :  { %2486 = vmatprep.subr.bf16.mxu1 %v4180_v39  ;;  %v4276_v37 = vld [vmem:[#allocation9 + $0x124] ss:$8 sps:$4 sm:$0xff]   ;;  %v4232_v39 = vld [vmem:[#allocation9] ss:$8 sps:$4 sm:$0xff]  }
 0x194   :  { %2446 = vmatpush2.bf16.msra.mxu0 %v4175_v43  ;;  %v4274_v43 = vld [vmem:[#allocation9 + $0x120] ss:$8 sps:$4 sm:$0xff]  }
 0x195   :  { %2487 = vmatpush2.bf16.msra.mxu1 %v4178_v50  ;;  %2447 = vmatprep.subr.bf16.mxu0 %v4183_v45  ;;  %v4237_v50 = vld [vmem:[#allocation9 + $0xf4] ss:$8 sps:$4 sm:$0xff]  }
 0x196   :  { %2488 = vmatprep.subr.bf16.mxu1 %v4186_v46  ;;  %v4279_v45 = vld [vmem:[#allocation9 + $0x114] ss:$8 sps:$4 sm:$0xff]   ;;  %v4235_v46 = vld [vmem:[#allocation9 + $0xf0] ss:$8 sps:$4 sm:$0xff]  }
 0x198   :  { %2448 = vmatpush2.bf16.msra.mxu0 %v4181_v9  ;;  %v4277_v9 = vld [vmem:[#allocation9 + $0x110] ss:$8 sps:$4 sm:$0xff]  }
 0x199   :  { %2489 = vmatpush2.bf16.msra.mxu1 %v4184_v47  ;;  %2449 = vmatprep.subr.bf16.mxu0 %v4189_v48  ;;  %v4240_v47 = vld [vmem:[#allocation9 + $0xe4] ss:$8 sps:$4 sm:$0xff]  }
 0x19a   :  { %2490 = vmatprep.subr.bf16.mxu1 %v4192_v49  ;;  %v4282_v48 = vld [vmem:[#allocation9 + $0x104] ss:$8 sps:$4 sm:$0xff]   ;;  %v4238_v49 = vld [vmem:[#allocation9 + $0xe0] ss:$8 sps:$4 sm:$0xff]  }
 0x19c   :  { %2450 = vmatpush2.bf16.msra.mxu0 %v4187_v51  ;;  %v4280_v51 = vld [vmem:[#allocation9 + $0x100] ss:$8 sps:$4 sm:$0xff]  }
 0x19d   :  { %2491 = vmatpush2.bf16.msra.mxu1 %v4190_v52  ;;  %2451 = vmatprep.subr.bf16.mxu0 %v4195_v53  ;;  %v4243_v52 = vld [vmem:[#allocation9 + $0xd4] ss:$8 sps:$4 sm:$0xff]  }
 0x19e   :  { %2492 = vmatprep.subr.bf16.mxu1 %v4198_v38  ;;  %v4285_v53 = vld [vmem:[#allocation9 + $0x1f4] ss:$8 sps:$4 sm:$0xff]   ;;  %v4241_v38 = vld [vmem:[#allocation9 + $0xd0] ss:$8 sps:$4 sm:$0xff]  }
 0x1a0   :  { %2452 = vmatpush2.bf16.msra.mxu0 %v4193_v54  ;;  %v4283_v54 = vld [vmem:[#allocation9 + $0x1f0] ss:$8 sps:$4 sm:$0xff]  }
 0x1a1   :  { %2493 = vmatpush2.bf16.msra.mxu1 %v4196_v55  ;;  %2453 = vmatprep.subr.bf16.mxu0 %v4201_v56  ;;  %v4246_v55 = vld [vmem:[#allocation9 + $0xc4] ss:$8 sps:$4 sm:$0xff]  }
 0x1a2   :  { %2494 = vmatprep.subr.bf16.mxu1 %v4204_v57  ;;  %v4288_v56 = vld [vmem:[#allocation9 + $0x1e4] ss:$8 sps:$4 sm:$0xff]   ;;  %v4244_v57 = vld [vmem:[#allocation9 + $0xc0] ss:$8 sps:$4 sm:$0xff]  }
 0x1a4   :  { %2454 = vmatpush2.bf16.msra.mxu0 %v4199_v58  ;;  %v4286_v58 = vld [vmem:[#allocation9 + $0x1e0] ss:$8 sps:$4 sm:$0xff]  }
 0x1a5   :  { %2495 = vmatpush2.bf16.msra.mxu1 %v4202_v59  ;;  %2455 = vmatprep.subr.bf16.mxu0 %v4207_v60  ;;  %v4249_v59 = vld [vmem:[#allocation9 + $0xb4] ss:$8 sps:$4 sm:$0xff]  }
 0x1a6   :  { %2496 = vmatprep.subr.bf16.mxu1 %v4210_v62  ;;  %v4291_v60 = vld [vmem:[#allocation9 + $0x1d4] ss:$8 sps:$4 sm:$0xff]   ;;  %v4247_v62 = vld [vmem:[#allocation9 + $0xb0] ss:$8 sps:$4 sm:$0xff]  }
 0x1a8   :  { %2456 = vmatpush2.bf16.msra.mxu0 %v4205_v10  ;;  %v4289_v10 = vld [vmem:[#allocation9 + $0x1d0] ss:$8 sps:$4 sm:$0xff]  }
 0x1a9   :  { %2497 = vmatpush2.bf16.msra.mxu1 %v4208_v21  ;;  %2911 = vmatprep.subr.bf16.mxu0 %v4213_v0  ;;  %v4252_v21 = vld [vmem:[#allocation9 + $0xa4] ss:$8 sps:$4 sm:$0xff]  }
 0x1aa   :  { %v4294_v0 = vld [vmem:[#allocation9 + $0x1c4] ss:$8 sps:$4 sm:$0xff]  }
 0x1ab   :  { %v2213_v3 = vpop.f32.mrf.mxu0  ;;  %2458 = vmatmul.mubr.bf16.vlgmr.msra.gmra.mxu0 %v4634_v22 }
 0x1ac   :  { %v2254_v4 = vpop.f32.mrf.mxu1  ;;  %2499 = vmatmul.mubr.bf16.vlgmr.msra.gmra.mxu1 %v4642_v34  ;;  %v2214_v5 = vadd.f32 %v2213_v3, %v4663_v61  ;;  %2912 = vmatpush1.bf16.msra.mxu0 %v4211_v1  ;;  %v4222_v34 = vld [vmem:[#allocation9 + $0x44] ss:$8 sps:$4 sm:$0xff]   ;;  %v4261_v61 = vld [vmem:[#allocation9 + $0x174] ss:$8 sps:$4 sm:$0xff]   ;;  %v4250_v1 = vld [vmem:[#allocation9 + $0xa0] ss:$8 sps:$4 sm:$0xff]  }
 0x1ad   :  { %v4672_v41 = vpop.f32.mrf.mxu0  ;;  %2913 = vmatprep.subr.bf16.mxu0 %v4216_v2  ;;  %2952 = vmatprep.subr.bf16.mxu1 %v4261_v61  ;;  %v4292_v2 = vld [vmem:[#allocation9 + $0x1c0] ss:$8 sps:$4 sm:$0xff]   ;;  %v4255_v3 = vld [vmem:[#allocation9 + $0x94] ss:$8 sps:$4 sm:$0xff]  }
 0x1ae   :  { %v4674_v28 = vpop.f32.mrf.mxu1  ;;  %v4676_v8 = vadd.f32 %v2254_v4, %v2214_v5  ;;  %2953 = vmatpush1.bf16.msra.mxu1 %v4259_v15  ;;  %v4297_v4 = vld [vmem:[#allocation9 + $0x1b4] ss:$8 sps:$4 sm:$0xff]   ;;  %v4253_v5 = vld [vmem:[#allocation9 + $0x90] ss:$8 sps:$4 sm:$0xff]  }
 0x1af   :  { %v2217_v11 = vpop.f32.mrf.mxu0  ;;  %2954 = vmatprep.subr.bf16.mxu1 %v4264_v16 }
 0x1b0   :  { %v2258_v12 = vpop.f32.mrf.mxu1  ;;  %2914 = vmatpush1.bf16.msra.mxu0 %v4214_v6  ;;  %v4295_v6 = vld [vmem:[#allocation9 + $0x1b0] ss:$8 sps:$4 sm:$0xff]   ;;  %v4256_v11 = vld [vmem:[#allocation9 + $0x80] ss:$8 sps:$4 sm:$0xff]  }
 0x1b1   :  { %v2218_v14 = vpop.f32.mrf.mxu0  ;;  %2915 = vmatprep.subr.bf16.mxu0 %v4219_v7  ;;  %v4258_v7 = vld [vmem:[#allocation9 + $0x84] ss:$8 sps:$4 sm:$0xff]   ;;  %v2216_v12 = vadd.f32 %v4672_v41, %v4667_v63 }
 0x1b2   :  { %v2259_v22 = vpop.f32.mrf.mxu1  ;;  %2955 = vmatpush1.bf16.msra.mxu1 %v4262_v18  ;;  %v4298_v14 = vld [vmem:[#allocation9 + $0x1a0] ss:$8 sps:$4 sm:$0xff]   ;;  %v4303_v18 = vld [vmem:[#allocation9 + $0x194] ss:$8 sps:$4 sm:$0xff]  }
 0x1b3   :  { %2956 = vmatprep.subr.bf16.mxu1 %v4267_v20  ;;  %v2257_v15 = vadd.f32 %v4674_v28, %v2216_v12  ;;  %v4301_v20 = vld [vmem:[#allocation9 + $0x190] ss:$8 sps:$4 sm:$0xff]  }
 0x1b4   :  { %2916 = vmatpush1.bf16.msra.mxu0 %v4217_v13  ;;  %v4300_v13 = vld [vmem:[#allocation9 + $0x1a4] ss:$8 sps:$4 sm:$0xff]  }
 0x1b5   :  { %2917 = vmatprep.subr.bf16.mxu0 %v4222_v34 }
 0x1b6   :  { %2957 = vmatpush1.bf16.msra.mxu1 %v4265_v24 }
 0x1b7   :  { %2958 = vmatprep.subr.bf16.mxu1 %v4270_v26 }
 0x1b8   :  { %2918 = vmatpush1.bf16.msra.mxu0 %v4220_v17 }
 0x1b9   :  { %2919 = vmatprep.subr.bf16.mxu0 %v4225_v19 }
 0x1ba   :  { %2959 = vmatpush1.bf16.msra.mxu1 %v4268_v29 }
 0x1bb   :  { %2960 = vmatprep.subr.bf16.mxu1 %v4273_v32 }
 0x1bc   :  { %2920 = vmatpush1.bf16.msra.mxu0 %v4223_v23 }
 0x1bd   :  { %2921 = vmatprep.subr.bf16.mxu0 %v4228_v25 }
 0x1be   :  { %2961 = vmatpush1.bf16.msra.mxu1 %v4271_v35 }
 0x1bf   :  { %2962 = vmatprep.subr.bf16.mxu1 %v4276_v37 }
 0x1c0   :  { %2922 = vmatpush1.bf16.msra.mxu0 %v4226_v27  ;;  %v4306_v27 = vld [vmem:[#allocation9 + $0x184] ss:$8 sps:$4 sm:$0xff]  }
 0x1c1   :  { %2923 = vmatprep.subr.bf16.mxu0 %v4231_v30  ;;  %v4304_v30 = vld [vmem:[#allocation9 + $0x180] ss:$8 sps:$4 sm:$0xff]  }
 0x1c2   :  { %2963 = vmatpush1.bf16.msra.mxu1 %v4274_v43 }
 0x1c3   :  { %2964 = vmatprep.subr.bf16.mxu1 %v4279_v45 }
 0x1c4   :  { %2924 = vmatpush1.bf16.msra.mxu0 %v4229_v33 }
 0x1c5   :  { %2925 = vmatprep.subr.bf16.mxu0 %v4234_v36 }
 0x1c6   :  { %2965 = vmatpush1.bf16.msra.mxu1 %v4277_v9 }
 0x1c7   :  { %2966 = vmatprep.subr.bf16.mxu1 %v4282_v48  ;;  %v4307_v48 = vld [vmem:[#allocation12 + $0x78] sm:$0xff]  }
 0x1c8   :  { %2926 = vmatpush1.bf16.msra.mxu0 %v4232_v39 }
 0x1c9   :  { %2927 = vmatprep.subr.bf16.mxu0 %v4237_v50 }
 0x1ca   :  { %2967 = vmatpush1.bf16.msra.mxu1 %v4280_v51  ;;  %v4309_v51 = vld [vmem:[#allocation12 + $0x70] sm:$0xff]  }
 0x1cb   :  { %2968 = vmatprep.subr.bf16.mxu1 %v4285_v53  ;;  %v4311_v53 = vld [vmem:[#allocation12 + $0x68] sm:$0xff]  }
 0x1cc   :  { %2928 = vmatpush2.bf16.msra.mxu0 %v4235_v46 }
 0x1cd   :  { %2929 = vmatprep.subr.bf16.mxu0 %v4240_v47 }
 0x1ce   :  { %2969 = vmatpush2.bf16.msra.mxu1 %v4283_v54  ;;  %v4313_v54 = vld [vmem:[#allocation12 + $0x60] sm:$0xff]  }
 0x1cf   :  { %2970 = vmatprep.subr.bf16.mxu1 %v4288_v56  ;;  %v4315_v56 = vld [vmem:[#allocation12 + $0x58] sm:$0xff]  }
 0x1d0   :  { %2930 = vmatpush2.bf16.msra.mxu0 %v4238_v49  ;;  %v4308_v49 = vld [vmem:[#allocation12 + $0x38] sm:$0xff]  }
 0x1d1   :  { %2931 = vmatprep.subr.bf16.mxu0 %v4243_v52  ;;  %v4310_v52 = vld [vmem:[#allocation12 + $0x30] sm:$0xff]  }
 0x1d2   :  { %2971 = vmatpush2.bf16.msra.mxu1 %v4286_v58  ;;  %v4317_v58 = vld [vmem:[#allocation12 + $0x50] sm:$0xff]  }
 0x1d3   :  { %2972 = vmatprep.subr.bf16.mxu1 %v4291_v60  ;;  %v491_v60 = vsub.s32 3, %v4648_v31 }
 0x1d4   :  { %2932 = vmatpush2.bf16.msra.mxu0 %v4241_v38  ;;  %v4312_v38 = vld [vmem:[#allocation12 + $0x28] sm:$0xff]  }
 0x1d5   :  { %2933 = vmatprep.subr.bf16.mxu0 %v4246_v55  ;;  %v4314_v55 = vld [vmem:[#allocation12 + $0x20] sm:$0xff]  }
 0x1d6   :  { %2973 = vmatpush2.bf16.msra.mxu1 %v4289_v10 }
 0x1d7   :  { %2974 = vmatprep.subr.bf16.mxu1 %v4294_v0 }
 0x1d8   :  { %2934 = vmatpush2.bf16.msra.mxu0 %v4244_v57  ;;  %v4316_v57 = vld [vmem:[#allocation12 + $0x18] sm:$0xff]  }
 0x1d9   :  { %2935 = vmatprep.subr.bf16.mxu0 %v4249_v59  ;;  %v4318_v59 = vld [vmem:[#allocation12 + $0x10] sm:$0xff]  }
 0x1da   :  { %2975 = vmatpush2.bf16.msra.mxu1 %v4292_v2 }
 0x1db   :  { %2976 = vmatprep.subr.bf16.mxu1 %v4297_v4 }
 0x1dc   :  { %2936 = vmatpush2.bf16.msra.mxu0 %v4247_v62  ;;  %v492_v62 = vrot.slane %v4654_v44, %v491_v60 }
 0x1dd   :  { %2937 = vmatprep.subr.bf16.mxu0 %v4252_v21 }
 0x1de   :  { %2977 = vmatpush2.bf16.msra.mxu1 %v4295_v6 }
 0x1df   :  { %2978 = vmatprep.subr.bf16.mxu1 %v4300_v13 }
 0x1e0   :  { %2938 = vmatpush2.bf16.msra.mxu0 %v4250_v1 }
 0x1e1   :  { %2939 = vmatprep.subr.bf16.mxu0 %v4255_v3 }
 0x1e2   :  { %2979 = vmatpush2.bf16.msra.mxu1 %v4298_v14 }
 0x1e3   :  { %2980 = vmatprep.subr.bf16.mxu1 %v4303_v18  ;;  %v4319_v18 = vld [vmem:[#allocation12 + $0x48] sm:$0xff]  }
 0x1e4   :  { %2940 = vmatpush2.bf16.msra.mxu0 %v4253_v5 }
 0x1e5   :  { %2941 = vmatprep.subr.bf16.mxu0 %v4258_v7 }
 0x1e6   :  { %2981 = vmatpush2.bf16.msra.mxu1 %v4301_v20 }
 0x1e7   :  { %2982 = vmatprep.subr.bf16.mxu1 %v4306_v27 }
 0x1e8   :  { %2942 = vmatpush2.bf16.msra.mxu0 %v4256_v11 }
 0x1e9   :  { %3683 = vmatprep.subr.bf16.mxu0 %v4307_v48 }
 0x1ea   :  { %2983 = vmatpush2.bf16.msra.mxu1 %v4304_v30 }
 0x1eb   :  { %v2295_v22 = vpop.f32.mrf.mxu0 }
 0x1ec   :  { %v2336_v34 = vpop.f32.mrf.mxu1  ;;  %v2296_v61 = vadd.f32 %v2295_v22, %v4676_v8  ;;  %v487_v8 = vsub.s32 2, %v4648_v31  ;;  %v3174_v31 = vld [vmem:[#allocation2] sm:$0x1] }
 0x1ed   :  { %v2297_v16 = vpop.f32.mrf.mxu0 }
 0x1ee   :  { %v2338_v17 = vpop.f32.mrf.mxu1  ;;  %v2298_v19 = vadd.f32 %v2297_v16, %v2257_v15  ;;  %v2507_v23 = vmax.f32 %v2296_v61, 0.0  ;;  %v488_v32 = vrot.slane %v4654_v44, %v487_v8 }
 0x1ef   :  { %v2299_v24 = vpop.f32.mrf.mxu0  ;;  %v2339_v10 = vadd.f32 %v2338_v17, %v492_v62 }
 0x1f0   :  { %v2340_v25 = vpop.f32.mrf.mxu1  ;;  %v2508_v63 = vmax.f32 %v2298_v19, 0.0  ;;  %v2511_v28 = vpack.c.bf16 %v2507_v23, %v2507_v23  ;;  %v2337_v33 = vadd.f32 %v2336_v34, %v488_v32  ;;  %v4320_v19 = vld [vmem:[#allocation12 + $0x8] sm:$0xff]   ;;  %v4321_v24 = vld [vmem:[#allocation12 + $0x40] sm:$0xff]  }
 0x1f1   :  { %v2300_v41 = vpop.f32.mrf.mxu0  ;;  %v4322_v25 = vld [vmem:[#allocation12] sm:$0xff]  }
 0x1f2   :  { %v2341_v26 = vpop.f32.mrf.mxu1  ;;  %v2512_v29 = vpack.c.bf16 %v2508_v63, %v2508_v63  ;;  %v2579_v63 = vld [vmem:[#allocation11] sm:$0x3] }
 0x1f3   :  { %v2584_v41 = vrot.slane %v2579_v63, %v4651_v40  ;;  %v2588_v26 = vrot.slane %v2579_v63, %v483_v42  ;;  %v4535_v42 = vmov 0  }
 0x1f4   :  { %2943 = vmatprep.mubr.bf16.mxu0 %v2512_v29  ;;  %3730 = vset.pattern.permute.xlu0 %v4535_v42 }
 0x1f5   :  { %2944 = vmatmul.mubr.bf16.vlgmr.msra.gmra.mxu0 %v2511_v28  ;;  %3177 = vperm.xlu0 %3730, %v3174_v31  }
 0x1f6   :  { %3684 = vmatpush3.bf16.msra.mxu0 %v4308_v49 }
 0x1f7   :  { %3685 = vmatprep.subr.bf16.mxu0 %v4309_v51 }
 0x1fa   :  { %3686 = vmatpush3.bf16.msra.mxu0 %v4310_v52 }
 0x1fb   :  { %3687 = vmatprep.subr.bf16.mxu0 %v4311_v53  ;;  %v3173_v53 = vld [vmem:[#allocation15] sm:$0x1] }
 0x1fe   :  { %3688 = vmatpush3.bf16.msra.mxu0 %v4312_v38 }
 0x1ff   :  { %3689 = vmatprep.subr.bf16.mxu0 %v4313_v54 }
 0x202   :  { %3690 = vmatpush3.bf16.msra.mxu0 %v4314_v55 }
 0x203   :  { %3691 = vmatprep.subr.bf16.mxu0 %v4315_v56 }
 0x206   :  { %3692 = vmatpush3.bf16.msra.mxu0 %v4316_v57 }
 0x207   :  { %3693 = vmatprep.subr.bf16.mxu0 %v4317_v58 }
 0x20a   :  { %3694 = vmatpush3.bf16.msra.mxu0 %v4318_v59 }
 0x20b   :  { %3695 = vmatprep.subr.bf16.mxu0 %v4319_v18 }
 0x20e   :  { %3696 = vmatpush3.bf16.msra.mxu0 %v4320_v19 }
 0x20f   :  { %3697 = vmatprep.subr.bf16.mxu0 %v4321_v24 }
 0x212   :  { %3698 = vmatpush3.bf16.msra.mxu0 %v4322_v25 }
 0x22b   :  { %v2377_v35 = vpop.f32.mrf.mxu0 }
 0x22c   :  { %v2418_v36 = vpop.f32.mrf.mxu1  ;;  %v2378_v37 = vadd.f32 %v2377_v35, %v2337_v33 }
 0x22d   :  { %v2379_v39 = vpop.f32.mrf.mxu0 }
 0x22e   :  { %v2420_v43 = vpop.f32.mrf.mxu1  ;;  %v2419_v50 = vadd.f32 %v2418_v36, %v2378_v37  ;;  %v2380_v21 = vadd.f32 %v2379_v39, %v2339_v10 }
 0x22f   :  { %v2381_v45 = vpop.f32.mrf.mxu0 }
 0x230   :  { %v2422_v46 = vpop.f32.mrf.mxu1  ;;  %v2421_v2 = vadd.f32 %v2420_v43, %v2380_v21 }
 0x231   :  { %v2382_v9 = vpop.f32.mrf.mxu0  ;;  %v3665_v46 = vld [vmem:[#allocation14] ss:$0 sm:$0xff] }
 0x232   :  { %v2423_v47 = vpop.f32.mrf.mxu1 }
 0x26b   :  { %v2459_v0 = vpop.f32.mrf.mxu0 }
 0x26c   :  { %v2500_v1 = vpop.f32.mrf.mxu1  ;;  %v2460_v3 = vadd.f32 %v2459_v0, %v2419_v50  ;;  %v4533_v50 = vmov 0.0  }
 0x26d   :  { %v2461_v4 = vpop.f32.mrf.mxu0  ;;  %3707 = vmatprep.subr.mxu1 %v4533_v50 }
 0x26e   :  { %v2502_v5 = vpop.f32.mrf.mxu1  ;;  %v2501_v6 = vadd.f32 %v2500_v1, %v2460_v3  ;;  %v2462_v7 = vadd.f32 %v2461_v4, %v2421_v2 }
 0x26f   :  { %v2463_v11 = vpop.f32.mrf.mxu0 }
 0x270   :  { %v2504_v12 = vpop.f32.mrf.mxu1  ;;  %v2503_v13 = vadd.f32 %v2502_v5, %v2462_v7  ;;  %v2509_v14 = vmax.f32 %v2501_v6, 0.0  ;;  %v3178_v38 = vpop.permute.xlu0 %3177 }
 0x271   :  { %v2464_v22 = vpop.f32.mrf.mxu0  ;;  %v3183_v54 = vrot.slane %v3178_v38, %v4651_v40 }
 0x272   :  { %v2505_v34 = vpop.f32.mrf.mxu1  ;;  %v2510_v15 = vmax.f32 %v2503_v13, 0.0  ;;  %v2513_v16 = vpack.c.bf16 %v2509_v14, %v2509_v14 }
 0x274   :  { %v2514_v61 = vpack.c.bf16 %v2510_v15, %v2510_v15 }
 0x276   :  { %2984 = vmatprep.mubr.bf16.mxu1 %v2514_v61 }
 0x277   :  { %2985 = vmatmul.mubr.bf16.vlgmr.msra.gmra.mxu1 %v2513_v16 }
 0x278   :  { %3709 = vmatprep.mubr.msk.f32.mxu1 %vm4534_vm0, %v4533_v50 }
 0x2b5   :  { %v2945_v44 = vpop.f32.mrf.mxu0 }
 0x2b6   :  { %v2946_v27 = vadd.f32 %v2945_v44, %v2584_v41 }
 0x2b7   :  { %v2947_v17 = vpop.f32.mrf.mxu0 }
 0x2b8   :  { %v2948_v30 = vadd.f32 %v2947_v17, %v2588_v26 }
 0x2b9   :  { %v2949_v20 = vpop.f32.mrf.mxu0 }
 0x2bb   :  { %v2950_v23 = vpop.f32.mrf.mxu0 }
 0x337   :  { %v2986_v29 = vpop.f32.mrf.mxu1 }
 0x338   :  { %v2987_v28 = vadd.f32 %v2986_v29, %v2946_v27 }
 0x339   :  { %v2988_v8 = vpop.f32.mrf.mxu1 }
 0x33a   :  { %v2989_v32 = vadd.f32 %v2988_v8, %v2948_v30  ;;  %v2993_v33 = vmax.f32 %v2987_v28, 0.0 }
 0x33b   :  { %v2990_v35 = vpop.f32.mrf.mxu1 }
 0x33c   :  { %v2994_v36 = vmax.f32 %v2989_v32, 0.0  ;;  %v2995_v43 = vpack.c.bf16 %v2993_v33, %v2993_v33 }
 0x33d   :  { %v2991_v37 = vpop.f32.mrf.mxu1 }
 0x33e   :  { %v2996_v39 = vpack.c.bf16 %v2994_v36, %v2994_v36 }
 0x340   :  { %3164 = vmatprep.mubr.bf16.mxu0 %v2996_v39 }
 0x341   :  { %3165 = vmatmul.mubr.bf16.vlgmr.msra.gmra.mxu0 %v2995_v43 }
 0x401   :  { %v3699_v45 = vpop.f32.mrf.mxu0 }
 0x403   :  { %v3700_v9 = vpop.f32.mrf.mxu0 }
 0x404   :  { %v3701_v47 = vadd.f32 %v3700_v9, %v3699_v45 }
 0x405   :  { %v3702_v48 = vpop.f32.mrf.mxu0 }
 0x406   :  { %v3167_v49 = vadd.f32 %v3701_v47, %v3665_v46 }
 0x407   :  { %v3703_v51 = vpop.f32.mrf.mxu0 }
 0x408   :  { %v3172_v52 = vmax.f32 %v3167_v49, 0.0 }
 0x40a   :  { %3708 = vmatpush3.xpose.msra.mxu1 %v3172_v52 }
 0x40d   :  { %3710 = vmatmul.mubr.f32.vlgmr.msra.gmra.mxu1 %v3173_v53 }
 0x4cd   :  { %v3250_v55 = vpop.f32.mrf.mxu1 }
 0x4ce   :  { %v3251_v56 = vadd.f32 %v3250_v55, %v3183_v54 }
 0x4cf   :  { %v3711_v57 = vpop.f32.mrf.mxu1 }
 0x4d0   :  { %v3682_v58 = vmul.f32 -1.442695, %v3251_v56 }
 0x4d2   :  { %4323 = vpow2.f32 %v3682_v58 }
 0x4df   :  { %v4324_v59 = vpop.eup %4323 }
 0x4e0   :  { %v3257_v60 = vadd.f32 1.0, %v4324_v59 }
 0x4e2   :  { %4325 = vrcp.f32 %v3257_v60 }
 0x4ef   :  { %v4326_v62 = vpop.eup %4325 }
 0x4f0   :  { %3261 = vst.msk [vmem:[#allocation17] sm:$0x1] %vm3260_vm1, %v4326_v62 }
 0x4f1   :  { %4498 = shalt.err (!%p4495_p2)
}
 0x4f2   :  { %3271 = dma.vmem_to_hbm [thread:$0]  %s3269_s7, 16, %s4702_s9, [#allocation5]  }
 0x4f3   :  { %4517 = dma.done.wait [#allocation5], 16  }
 0x4f4   :  { %4518 = vsyncadd [#allocation5], 4294967280 }
 0x4f5   :  { %3275 = vsyncpa [#allocation4], 1 }
 0x4f6   :  { %3276 = vsyncpa [#allocation7], 1 }
 0x4f7   :  { %3277 = vsyncpa [#allocation10], 1 }
 0x4f8   :  { %3278 = vsyncpa [#allocation13], 1 }
 0x4f9   :  { %3279 = vsyncpa [#allocation16], 1 }
 0x4fa   :  { %3280 = vsyncpa [#allocation5], 1 }

</bundles_post_ra>
